<compile_context>
chip_gen: v7x
topology: tpu7x:2x2x1
jax: 0.10.0
libtpu: 0.0.40
codegen_flags: <defaults>
</compile_context>

<pallas_src>
import functools
import math

import jax
import jax.numpy as jnp
from jax import lax
from jax.experimental import pallas as pl
from jax.experimental.pallas import tpu as pltpu


# --------------------------------------------------------------------------
# Hardware-aware sizing helpers
# --------------------------------------------------------------------------
def _tpu_vmem_capacity():
    try:
        return int(pltpu.get_tpu_info().vmem_capacity_bytes)
    except Exception:
        return 128 * 1024 * 1024


def _vmem_limit_bytes(cap):
    # ~0.75x physical VMEM, never more than 100 MiB (headroom for
    # double-buffered blocks + compiler scratch on every generation).
    return int(min(cap * 3 // 4, 100 * 1024 * 1024))


def _pick_ffn_tile(cap):
    # 512-row tiles hit ~85% of HBM roofline on 128 MiB chips (v5e/v6e);
    # stay at 256 on 64 MiB chips (v7x).
    return 512 if cap >= 100 * 1024 * 1024 else 256


def _pick_q_tile(slen, emb, itemsize, vmem_limit):
    """Query-row tile so the double-buffered know block stays within ~1/4 of
    the VMEM budget."""
    budget = vmem_limit // 4
    per_row = 2 * slen * emb * itemsize          # double-buffered bytes / q row
    tq = budget // max(per_row, 1)
    if tq >= slen:
        return slen
    return min(slen, max(16, int(tq) // 16 * 16))


# --------------------------------------------------------------------------
# Pallas kernels
# --------------------------------------------------------------------------
def _attention_kernel(x_kv_ref, x_q_ref, know_ref, adj_ref, smask_ref,
                      omask_ref, relk_ref, relv_ref,
                      wq_ref, wk_ref, wvs_ref, wvo_ref, wkn_ref,
                      out_ref, *, nhead, hd):
    """All heads of MultiHeadAttention (up to, not including, the output
    projection) for one batch element and one query-row tile."""
    f32 = jnp.float32
    cdt = x_kv_ref.dtype
    dn_nt = (((1,), (1,)), ((), ()))      # A @ B.T (contract last dims)
    dn_b0 = (((2,), (2,)), ((0,), (0,)))  # batch axis 0, contract last dims
    dn_b0k1 = (((2,), (1,)), ((0,), (0,)))  # batch axis 0, lhs last . rhs mid

    xkv = x_kv_ref[...]                   # (slen, E)   all key/value rows
    xq = x_q_ref[...]                     # (TQ,  E)    this tile's query rows

    # Projections (weights pre-transposed to (in, out)); f32 accumulation.
    q = jnp.dot(xq, wq_ref[...], preferred_element_type=f32)      # (TQ, E)
    k = jnp.dot(xkv, wk_ref[...], preferred_element_type=f32)     # (slen, E)
    vs = jnp.dot(xkv, wvs_ref[...], preferred_element_type=f32)   # (slen, E)
    vo = jnp.dot(xkv, wvo_ref[...], preferred_element_type=f32)   # (slen, E)

    know3 = know_ref[...]                 # (TQ, slen, E)   raw knowledge block
    rk3 = relk_ref[...]                   # (TQ, slen, hd)
    rv3 = relv_ref[...]                   # (TQ, slen, hd)
    adj = adj_ref[...].astype(f32)        # (TQ, slen)
    smc = smask_ref[...].astype(cdt)      # (TQ, slen)
    omc = omask_ref[...].astype(cdt)

    scaling = float(hd) ** (-0.5)
    neg = (1.0 - adj) * 1e30              # mask_logic term

    # Wkn folded onto the query:  q_h . (Wkn_h . know) == (q_h . Wkn_h) . know.
    q_heads, qt_heads = [], []
    for h in range(nhead):                # nhead is small & static
        qh = q[:, h * hd:(h + 1) * hd].astype(cdt)                 # (TQ, hd)
        q_heads.append(qh)
        qt_heads.append(
            jnp.dot(qh, wkn_ref[h], preferred_element_type=f32).astype(cdt))
    qh3 = jnp.stack(q_heads, axis=1)      # (TQ, nhead, hd)
    qt3 = jnp.stack(qt_heads, axis=1)     # (TQ, nhead, E)

    # Knowledge + relative-position score terms for all heads at once:
    # batched MXU dot_generals (batch = query row), hoisted out of the loop.
    extra = (lax.dot_general(qt3, know3, dn_b0, preferred_element_type=f32)
             + lax.dot_general(qh3, rk3, dn_b0, preferred_element_type=f32))
    # extra: (TQ, nhead, slen)

    attw_heads, pv_heads = [], []
    for h in range(nhead):
        sl = slice(h * hd, (h + 1) * hd)
        kh = k[:, sl].astype(cdt)
        scores = (lax.dot_general(q_heads[h], kh, dn_nt,
                                  preferred_element_type=f32)
                  + extra[:, h, :]) * scaling - neg
        m = jnp.max(scores, axis=-1, keepdims=True)
        e = jnp.exp(scores - m)
        denom = jnp.sum(e, axis=-1, keepdims=True)
        attw = e * pl.reciprocal(denom, approx=True)      # softmax (EUP recip)
        attw_heads.append(attw)

        # Fused masked P.V: one (TQ, 2*slen)@(2*slen, hd) MXU matmul per head.
        p = attw.astype(cdt)
        pcat = jnp.concatenate([p * smc, p * omc], axis=-1)        # (TQ, 2*slen)
        vcat = jnp.concatenate([vs[:, sl], vo[:, sl]], axis=0).astype(cdt)
        pv_heads.append(jnp.dot(pcat, vcat, preferred_element_type=f32))

    # Relative-position value term for all heads at once (batch = query row).
    attw3 = jnp.stack(attw_heads, axis=1).astype(cdt)     # (TQ, nhead, slen)
    out_rel = lax.dot_general(attw3, rv3, dn_b0k1,
                              preferred_element_type=f32)  # (TQ, nhead, hd)

    outs = [pv_heads[h] + out_rel[:, h, :] for h in range(nhead)]
    out_ref[...] = jnp.concatenate(outs, axis=-1).astype(out_ref.dtype)


def _layernorm(x, w, b, eps=1e-5):
    mu = jnp.mean(x, axis=-1, keepdims=True)
    xc = x - mu
    var = jnp.mean(xc * xc, axis=-1, keepdims=True)
    return xc * lax.rsqrt(var + eps) * w + b


def _outproj_ffn_kernel(attn_ref, x_ref, wo_ref,
                        ln1w_ref, ln1b_ref,
                        w1_ref, b1_ref, w2_ref, b2_ref,
                        ln2w_ref, ln2b_ref, out_ref):
    """Attention output projection + residual + LayerNorm + MLP (dropout = id)
    for one (TILE_M, E) row tile."""
    f32 = jnp.float32
    cdt = attn_ref.dtype

    attn_out = jnp.dot(attn_ref[...], wo_ref[...],
                       preferred_element_type=f32)          # (TILE_M, E)
    ss = x_ref[...].astype(f32) + attn_out
    ss = _layernorm(ss, ln1w_ref[...], ln1b_ref[...])
    h = jnp.dot(ss.astype(cdt), w1_ref[...],
                preferred_element_type=f32) + b1_ref[...]
    h = jnp.maximum(h, 0.0)
    ff = jnp.dot(h.astype(cdt), w2_ref[...],
                 preferred_element_type=f32) + b2_ref[...]
    out_ref[...] = _layernorm(ff + ss, ln2w_ref[...],
                              ln2b_ref[...]).astype(out_ref.dtype)


# --------------------------------------------------------------------------
# Pallas wrappers
# --------------------------------------------------------------------------
def _multi_head_attention_core(x_bse, know4, adj, s_mask, o_mask,
                               rel_k3, rel_v3,
                               wq_t, wk_t, wvs_t, wvo_t, wkn3,
                               nhead, q_tile, vmem_limit):
    bsz, slen, E = x_bse.shape
    hd = E // nhead
    n_qt = pl.cdiv(slen, q_tile)
    kern = functools.partial(_attention_kernel, nhead=nhead, hd=hd)

    kv_map = lambda b, qt: (b, 0, 0)          # constant over qt -> no re-DMA
    q_map = lambda b, qt: (b, qt, 0)
    know_map = lambda b, qt: (b, qt, 0, 0)
    rel_map = lambda b, qt: (qt, 0, 0)
    w2_map = lambda b, qt: (0, 0)             # weights stay resident
    w3_map = lambda b, qt: (0, 0, 0)

    return pl.pallas_call(
        kern,
        out_shape=jax.ShapeDtypeStruct((bsz, slen, E), x_bse.dtype),
        grid=(bsz, n_qt),
        in_specs=[
            pl.BlockSpec((None, slen, E), kv_map),        # x (key/value rows)
            pl.BlockSpec((None, q_tile, E), q_map),       # x (query rows)
            pl.BlockSpec((None, q_tile, slen, E), know_map),  # know
            pl.BlockSpec((None, q_tile, slen), q_map),    # adj
            pl.BlockSpec((None, q_tile, slen), q_map),    # s_mask
            pl.BlockSpec((None, q_tile, slen), q_map),    # o_mask
            pl.BlockSpec((q_tile, slen, hd), rel_map),    # rel_pos_k
            pl.BlockSpec((q_tile, slen, hd), rel_map),    # rel_pos_v
            pl.BlockSpec((E, E), w2_map),                 # Wq^T
            pl.BlockSpec((E, E), w2_map),                 # Wk^T
            pl.BlockSpec((E, E), w2_map),                 # Wv_s^T
            pl.BlockSpec((E, E), w2_map),                 # Wv_o^T
            pl.BlockSpec((nhead, hd, E), w3_map),         # Wknow (head-split)
        ],
        out_specs=pl.BlockSpec((None, q_tile, E), q_map),  # lane-dense tile
        compiler_params=pltpu.CompilerParams(
            dimension_semantics=("parallel", "parallel"),
            vmem_limit_bytes=vmem_limit),
    )(x_bse, x_bse, know4, adj, s_mask, o_mask, rel_k3, rel_v3,
      wq_t, wk_t, wvs_t, wvo_t, wkn3)


def _outproj_ffn(attn_bse, x_bse, p, compute_dtype, vmem_limit, max_tile):
    bsz, slen, E = x_bse.shape
    M = bsz * slen
    F_dim = p['w1'].shape[0]
    cd = compute_dtype

    attn2 = attn_bse.reshape(M, E)              # already compute_dtype
    x2 = x_bse.reshape(M, E)                    # residual stays in x dtype
    tile_m = M if M <= max_tile else max_tile   # ragged last tile handled by
    grid_m = pl.cdiv(M, tile_m)                 # the BlockSpec (no jnp.pad)

    row = lambda i: (i, 0)
    full = lambda i: (0, 0)

    out = pl.pallas_call(
        _outproj_ffn_kernel,
        out_shape=jax.ShapeDtypeStruct((M, E), x_bse.dtype),
        grid=(grid_m,),
        in_specs=[
            pl.BlockSpec((tile_m, E), row),                   # attn tile
            pl.BlockSpec((tile_m, E), row),                   # x tile (residual)
            pl.BlockSpec((E, E), full),                       # Wo^T
            pl.BlockSpec((1, E), full), pl.BlockSpec((1, E), full),      # ln1
            pl.BlockSpec((E, F_dim), full), pl.BlockSpec((1, F_dim), full),  # W1^T, b1
            pl.BlockSpec((F_dim, E), full), pl.BlockSpec((1, E), full),      # W2^T, b2
            pl.BlockSpec((1, E), full), pl.BlockSpec((1, E), full),      # ln2
        ],
        out_specs=pl.BlockSpec((tile_m, E), row),
        compiler_params=pltpu.CompilerParams(
            dimension_semantics=("parallel",),
            vmem_limit_bytes=vmem_limit),
    )(attn2, x2, p['wo'].T.astype(cd), p['ln1w'], p['ln1b'],
      p['w1'].T.astype(cd), p['b1'],
      p['w2'].T.astype(cd), p['b2'],
      p['ln2w'], p['ln2b'])
    return out.reshape(bsz, slen, E)


def transformer_layer(x_bse, adj, s_mask, o_mask, know4, rel_k3, rel_v3, p,
                      nhead, compute_dtype, vmem_limit, ffn_tile, q_tile):
    cd = compute_dtype
    _, _, E = x_bse.shape
    hd = E // nhead
    attn = _multi_head_attention_core(
        x_bse.astype(cd), know4, adj, s_mask, o_mask, rel_k3, rel_v3,
        p['wq'].T.astype(cd), p['wk'].T.astype(cd),
        p['wvs'].T.astype(cd), p['wvo'].T.astype(cd),
        p['wkn'].reshape(nhead, hd, E).astype(cd),
        nhead, q_tile, vmem_limit)
    return _outproj_ffn(attn, x_bse, p, cd, vmem_limit, ffn_tile)


def transformer_encoder(x, adj, s_mask, o_mask, knowledge, know_adj, pos_mask,
                        params, nhead, compute_dtype=jnp.bfloat16):
    """x: (bsz, slen, E). Returns (bsz, slen, E).

    compute_dtype=bf16 by default (2x MXU throughput, half the HBM/VMEM
    traffic on v6e/v7x); matmul accumulation and LayerNorm/softmax stay f32.
    Pass compute_dtype=jnp.float32 to match the torch reference tightly."""
    bsz, slen, E = x.shape
    cd = compute_dtype

    cap = _tpu_vmem_capacity()
    vmem_limit = _vmem_limit_bytes(cap)
    ffn_tile = _pick_ffn_tile(cap)
    q_tile = _pick_q_tile(slen, E, jnp.dtype(cd).itemsize, vmem_limit)

    max_len = params['pe_k'].shape[0] - 1
    # RelativePositionEncoding (embedding gathers are glue in plain JAX)
    pos = jnp.clip(pos_mask, 0, max_len).astype(jnp.int32)
    rel_k3 = params['pe_k'].astype(cd)[pos]          # (slen, slen, hd)
    rel_v3 = params['pe_v'].astype(cd)[pos]          # (slen, slen, hd)

    # knowledge lookup: index_select(knowledge, flatten(know_adj)); gathered
    # once (in compute dtype) and reused by every layer.
    # TODO(synk): for large slen / knowledge tables, gather per query tile
    # inside the kernel (scalar-prefetch know_adj + one-hot / DMA gather)
    # instead of materializing the (bsz, slen, slen, E) tensor in HBM.
    know4 = knowledge.astype(cd)[know_adj.reshape(-1)].reshape(
        bsz, slen, slen, E)

    adj = adj.astype(jnp.float32)
    s_mask = s_mask.astype(jnp.float32)
    o_mask = o_mask.astype(jnp.float32)

    x1 = x
    for p in params['layers']:
        x1 = transformer_layer(x1, adj, s_mask, o_mask, know4, rel_k3, rel_v3,
                               p, nhead, cd, vmem_limit, ffn_tile, q_tile)
    return x1


# --------------------------------------------------------------------------
# Deterministic parameter initialization (shapes per the module __init__)
# --------------------------------------------------------------------------
def init_params(key, num_layers, nhead, E, F_dim, max_len):
    hd = E // nhead

    def xavier(k, shape):
        bound = math.sqrt(6.0 / (shape[0] + shape[1]))
        return jax.random.uniform(k, shape, jnp.float32, -bound, bound)

    def linear(k, out_dim, in_dim):
        kw, kb = jax.random.split(k)
        bound = 1.0 / math.sqrt(in_dim)
        w = jax.random.uniform(kw, (out_dim, in_dim), jnp.float32, -bound, bound)
        b = jax.random.uniform(kb, (1, out_dim), jnp.float32, -bound, bound)
        return w, b

    keys = jax.random.split(key, num_layers + 2)
    pe_k = jax.random.normal(keys[-1], (max_len + 1, hd), jnp.float32).at[0].set(0.0)
    pe_v = jax.random.normal(keys[-2], (max_len + 1, hd), jnp.float32).at[0].set(0.0)

    layers = []
    for i in range(num_layers):
        lk = jax.random.split(keys[i], 8)
        w1, b1 = linear(lk[6], F_dim, E)
        w2, b2 = linear(lk[7], E, F_dim)
        layers.append(dict(
            wq=xavier(lk[0], (E, E)), wk=xavier(lk[1], (E, E)),
            wvs=xavier(lk[2], (E, E)), wvo=xavier(lk[3], (E, E)),
            wo=xavier(lk[4], (E, E)), wkn=xavier(lk[5], (E, E)),
            w1=w1, b1=b1, w2=w2, b2=b2,
            ln1w=jnp.ones((1, E), jnp.float32), ln1b=jnp.zeros((1, E), jnp.float32),
            ln2w=jnp.ones((1, E), jnp.float32), ln2b=jnp.zeros((1, E), jnp.float32),
        ))
    return dict(layers=layers, pe_k=pe_k, pe_v=pe_v)


# --------------------------------------------------------------------------
if __name__ == "__main__":
    bsz, slen, nhead, E, F_dim = 2, 8, 4, 32, 64
    num_layers, max_len, n_know = 2, 10, 16

    key = jax.random.PRNGKey(0)
    ks = jax.random.split(key, 8)
    x = jax.random.normal(ks[0], (bsz, slen, E), jnp.float32)
    adj = (jax.random.uniform(ks[1], (bsz, slen, slen)) > 0.3).astype(jnp.float32)
    adj = jnp.maximum(adj, jnp.eye(slen, dtype=jnp.float32)[None])  # non-empty rows
    s_mask = (jax.random.uniform(ks[2], (bsz, slen, slen)) > 0.5).astype(jnp.float32)
    o_mask = 1.0 - s_mask
    knowledge = jax.random.normal(ks[3], (n_know, E), jnp.float32)
    know_adj = jax.random.randint(ks[4], (bsz, slen, slen), 0, n_know, dtype=jnp.int32)
    pos_mask = jax.random.randint(ks[5], (slen, slen), 0, max_len + 1, dtype=jnp.int32)

    params = init_params(ks[6], num_layers, nhead, E, F_dim, max_len)

    out = transformer_encoder(x, adj, s_mask, o_mask, knowledge, know_adj,
                              pos_mask, params, nhead)
    jax.block_until_ready(out)
    assert out.shape == (bsz, slen, E)
    # TODO(synk): dropout layers are identity (eval mode); training-mode
    # stochastic dropout and the pe_type='abs' branch are not reproduced.
    print("KERNEL_OK")
</pallas_src>

<mosaic_0001>
module attributes {stable_mosaic.version = 11 : i64} {
  func.func @_attention_kernel(%arg0: i32, %arg1: i32, %arg2: memref<1x8x32xbf16, #tpu.memory_space<vmem>>, %arg3: memref<1x8x32xbf16, #tpu.memory_space<vmem>>, %arg4: memref<1x8x8x32xbf16, #tpu.memory_space<vmem>>, %arg5: memref<1x8x8xf32, #tpu.memory_space<vmem>>, %arg6: memref<1x8x8xf32, #tpu.memory_space<vmem>>, %arg7: memref<1x8x8xf32, #tpu.memory_space<vmem>>, %arg8: memref<8x8x8xbf16, #tpu.memory_space<vmem>>, %arg9: memref<8x8x8xbf16, #tpu.memory_space<vmem>>, %arg10: memref<32x32xbf16, #tpu.memory_space<vmem>>, %arg11: memref<32x32xbf16, #tpu.memory_space<vmem>>, %arg12: memref<32x32xbf16, #tpu.memory_space<vmem>>, %arg13: memref<32x32xbf16, #tpu.memory_space<vmem>>, %arg14: memref<4x8x32xbf16, #tpu.memory_space<vmem>>, %arg15: memref<1x8x32xbf16, #tpu.memory_space<vmem>>) attributes {dimension_semantics = [#tpu.dimension_semantics<parallel>, #tpu.dimension_semantics<parallel>], iteration_bounds = array<i64: 2, 1>, scalar_prefetch = 0 : i64, scratch_operands = 0 : i64, tpu.core_type = #tpu.core_type<tc>, window_params = [{transform_indices = @transform_0, window_bounds = array<i64: 1, 8, 32>}, {transform_indices = @transform_1, window_bounds = array<i64: 1, 8, 32>}, {transform_indices = @transform_2, window_bounds = array<i64: 1, 8, 8, 32>}, {transform_indices = @transform_3, window_bounds = array<i64: 1, 8, 8>}, {transform_indices = @transform_4, window_bounds = array<i64: 1, 8, 8>}, {transform_indices = @transform_5, window_bounds = array<i64: 1, 8, 8>}, {transform_indices = @transform_6, window_bounds = array<i64: 8, 8, 8>}, {transform_indices = @transform_7, window_bounds = array<i64: 8, 8, 8>}, {pipeline_mode = #tpu.pipeline_mode<synchronous>, transform_indices = @transform_8, window_bounds = array<i64: 32, 32>}, {pipeline_mode = #tpu.pipeline_mode<synchronous>, transform_indices = @transform_9, window_bounds = array<i64: 32, 32>}, {pipeline_mode = #tpu.pipeline_mode<synchronous>, transform_indices = @transform_10, window_bounds = array<i64: 32, 32>}, {pipeline_mode = #tpu.pipeline_mode<synchronous>, transform_indices = @transform_11, window_bounds = array<i64: 32, 32>}, {pipeline_mode = #tpu.pipeline_mode<synchronous>, transform_indices = @transform_12, window_bounds = array<i64: 4, 8, 32>}, {transform_indices = @transform_13, window_bounds = array<i64: 1, 8, 32>}]} {
    %c0 = arith.constant 0 : index
    %c0_0 = arith.constant 0 : index
    %c0_1 = arith.constant 0 : index
    %0 = vector.load %arg2[%c0, %c0_0, %c0_1] : memref<1x8x32xbf16, #tpu.memory_space<vmem>>, vector<1x8x32xbf16>
    %1 = vector.shape_cast %0 : vector<1x8x32xbf16> to vector<8x32xbf16>
    %c0_2 = arith.constant 0 : index
    %c0_3 = arith.constant 0 : index
    %c0_4 = arith.constant 0 : index
    %2 = vector.load %arg3[%c0_2, %c0_3, %c0_4] : memref<1x8x32xbf16, #tpu.memory_space<vmem>>, vector<1x8x32xbf16>
    %3 = vector.shape_cast %2 : vector<1x8x32xbf16> to vector<8x32xbf16>
    %c0_5 = arith.constant 0 : index
    %c0_6 = arith.constant 0 : index
    %4 = vector.load %arg10[%c0_5, %c0_6] : memref<32x32xbf16, #tpu.memory_space<vmem>>, vector<32x32xbf16>
    %cst = arith.constant dense<0.000000e+00> : vector<8x32xf32>
    %5 = tpu.matmul %3, %4, %cst {dimension_numbers = #tpu.dot_dimension_numbers<[1], [0], [0], [1], [0, 0, 1, 1], [], []>} : vector<8x32xbf16>, vector<32x32xbf16>, vector<8x32xf32> -> vector<8x32xf32>
    %c0_7 = arith.constant 0 : index
    %c0_8 = arith.constant 0 : index
    %6 = vector.load %arg11[%c0_7, %c0_8] : memref<32x32xbf16, #tpu.memory_space<vmem>>, vector<32x32xbf16>
    %cst_9 = arith.constant dense<0.000000e+00> : vector<8x32xf32>
    %7 = tpu.matmul %1, %6, %cst_9 {dimension_numbers = #tpu.dot_dimension_numbers<[1], [0], [0], [1], [0, 0, 1, 1], [], []>} : vector<8x32xbf16>, vector<32x32xbf16>, vector<8x32xf32> -> vector<8x32xf32>
    %c0_10 = arith.constant 0 : index
    %c0_11 = arith.constant 0 : index
    %8 = vector.load %arg12[%c0_10, %c0_11] : memref<32x32xbf16, #tpu.memory_space<vmem>>, vector<32x32xbf16>
    %cst_12 = arith.constant dense<0.000000e+00> : vector<8x32xf32>
    %9 = tpu.matmul %1, %8, %cst_12 {dimension_numbers = #tpu.dot_dimension_numbers<[1], [0], [0], [1], [0, 0, 1, 1], [], []>} : vector<8x32xbf16>, vector<32x32xbf16>, vector<8x32xf32> -> vector<8x32xf32>
    %c0_13 = arith.constant 0 : index
    %c0_14 = arith.constant 0 : index
    %10 = vector.load %arg13[%c0_13, %c0_14] : memref<32x32xbf16, #tpu.memory_space<vmem>>, vector<32x32xbf16>
    %cst_15 = arith.constant dense<0.000000e+00> : vector<8x32xf32>
    %11 = tpu.matmul %1, %10, %cst_15 {dimension_numbers = #tpu.dot_dimension_numbers<[1], [0], [0], [1], [0, 0, 1, 1], [], []>} : vector<8x32xbf16>, vector<32x32xbf16>, vector<8x32xf32> -> vector<8x32xf32>
    %c0_16 = arith.constant 0 : index
    %c0_17 = arith.constant 0 : index
    %c0_18 = arith.constant 0 : index
    %c0_19 = arith.constant 0 : index
    %12 = vector.load %arg4[%c0_16, %c0_17, %c0_18, %c0_19] : memref<1x8x8x32xbf16, #tpu.memory_space<vmem>>, vector<1x8x8x32xbf16>
    %13 = vector.shape_cast %12 : vector<1x8x8x32xbf16> to vector<8x8x32xbf16>
    %c0_20 = arith.constant 0 : index
    %c0_21 = arith.constant 0 : index
    %c0_22 = arith.constant 0 : index
    %14 = vector.load %arg8[%c0_20, %c0_21, %c0_22] : memref<8x8x8xbf16, #tpu.memory_space<vmem>>, vector<8x8x8xbf16>
    %c0_23 = arith.constant 0 : index
    %c0_24 = arith.constant 0 : index
    %c0_25 = arith.constant 0 : index
    %15 = vector.load %arg9[%c0_23, %c0_24, %c0_25] : memref<8x8x8xbf16, #tpu.memory_space<vmem>>, vector<8x8x8xbf16>
    %c0_26 = arith.constant 0 : index
    %c0_27 = arith.constant 0 : index
    %c0_28 = arith.constant 0 : index
    %16 = vector.load %arg5[%c0_26, %c0_27, %c0_28] : memref<1x8x8xf32, #tpu.memory_space<vmem>>, vector<1x8x8xf32>
    %17 = vector.shape_cast %16 : vector<1x8x8xf32> to vector<8x8xf32>
    %c0_29 = arith.constant 0 : index
    %c0_30 = arith.constant 0 : index
    %c0_31 = arith.constant 0 : index
    %18 = vector.load %arg6[%c0_29, %c0_30, %c0_31] : memref<1x8x8xf32, #tpu.memory_space<vmem>>, vector<1x8x8xf32>
    %19 = vector.shape_cast %18 : vector<1x8x8xf32> to vector<8x8xf32>
    %20 = arith.truncf %19 : vector<8x8xf32> to vector<8x8xbf16>
    %c0_32 = arith.constant 0 : index
    %c0_33 = arith.constant 0 : index
    %c0_34 = arith.constant 0 : index
    %21 = vector.load %arg7[%c0_32, %c0_33, %c0_34] : memref<1x8x8xf32, #tpu.memory_space<vmem>>, vector<1x8x8xf32>
    %22 = vector.shape_cast %21 : vector<1x8x8xf32> to vector<8x8xf32>
    %23 = arith.truncf %22 : vector<8x8xf32> to vector<8x8xbf16>
    %cst_35 = arith.constant 1.000000e+00 : f32
    %24 = vector.broadcast %cst_35 : f32 to vector<8x8xf32>
    %25 = arith.subf %24, %17 : vector<8x8xf32>
    %cst_36 = arith.constant 1.000000e+30 : f32
    %26 = vector.broadcast %cst_36 : f32 to vector<8x8xf32>
    %27 = arith.mulf %25, %26 : vector<8x8xf32>
    %28 = vector.extract_strided_slice %5 {offsets = [0, 0], sizes = [8, 8], strides = [1, 1]} : vector<8x32xf32> to vector<8x8xf32>
    %29 = arith.truncf %28 : vector<8x8xf32> to vector<8x8xbf16>
    %c0_37 = arith.constant 0 : index
    %c0_38 = arith.constant 0 : index
    %c0_39 = arith.constant 0 : index
    %30 = vector.load %arg14[%c0_37, %c0_38, %c0_39] : memref<4x8x32xbf16, #tpu.memory_space<vmem>>, vector<1x8x32xbf16>
    %31 = vector.shape_cast %30 : vector<1x8x32xbf16> to vector<8x32xbf16>
    %cst_40 = arith.constant dense<0.000000e+00> : vector<8x32xf32>
    %32 = tpu.matmul %29, %31, %cst_40 {dimension_numbers = #tpu.dot_dimension_numbers<[1], [0], [0], [1], [0, 0, 1, 1], [], []>} : vector<8x8xbf16>, vector<8x32xbf16>, vector<8x32xf32> -> vector<8x32xf32>
    %33 = arith.truncf %32 : vector<8x32xf32> to vector<8x32xbf16>
    %34 = vector.extract_strided_slice %5 {offsets = [0, 8], sizes = [8, 8], strides = [1, 1]} : vector<8x32xf32> to vector<8x8xf32>
    %35 = arith.truncf %34 : vector<8x8xf32> to vector<8x8xbf16>
    %c1 = arith.constant 1 : index
    %c0_41 = arith.constant 0 : index
    %c0_42 = arith.constant 0 : index
    %36 = vector.load %arg14[%c1, %c0_41, %c0_42] : memref<4x8x32xbf16, #tpu.memory_space<vmem>>, vector<1x8x32xbf16>
    %37 = vector.shape_cast %36 : vector<1x8x32xbf16> to vector<8x32xbf16>
    %cst_43 = arith.constant dense<0.000000e+00> : vector<8x32xf32>
    %38 = tpu.matmul %35, %37, %cst_43 {dimension_numbers = #tpu.dot_dimension_numbers<[1], [0], [0], [1], [0, 0, 1, 1], [], []>} : vector<8x8xbf16>, vector<8x32xbf16>, vector<8x32xf32> -> vector<8x32xf32>
    %39 = arith.truncf %38 : vector<8x32xf32> to vector<8x32xbf16>
    %40 = vector.extract_strided_slice %5 {offsets = [0, 16], sizes = [8, 8], strides = [1, 1]} : vector<8x32xf32> to vector<8x8xf32>
    %41 = arith.truncf %40 : vector<8x8xf32> to vector<8x8xbf16>
    %c2 = arith.constant 2 : index
    %c0_44 = arith.constant 0 : index
    %c0_45 = arith.constant 0 : index
    %42 = vector.load %arg14[%c2, %c0_44, %c0_45] : memref<4x8x32xbf16, #tpu.memory_space<vmem>>, vector<1x8x32xbf16>
    %43 = vector.shape_cast %42 : vector<1x8x32xbf16> to vector<8x32xbf16>
    %cst_46 = arith.constant dense<0.000000e+00> : vector<8x32xf32>
    %44 = tpu.matmul %41, %43, %cst_46 {dimension_numbers = #tpu.dot_dimension_numbers<[1], [0], [0], [1], [0, 0, 1, 1], [], []>} : vector<8x8xbf16>, vector<8x32xbf16>, vector<8x32xf32> -> vector<8x32xf32>
    %45 = arith.truncf %44 : vector<8x32xf32> to vector<8x32xbf16>
    %46 = vector.extract_strided_slice %5 {offsets = [0, 24], sizes = [8, 8], strides = [1, 1]} : vector<8x32xf32> to vector<8x8xf32>
    %47 = arith.truncf %46 : vector<8x8xf32> to vector<8x8xbf16>
    %c3 = arith.constant 3 : index
    %c0_47 = arith.constant 0 : index
    %c0_48 = arith.constant 0 : index
    %48 = vector.load %arg14[%c3, %c0_47, %c0_48] : memref<4x8x32xbf16, #tpu.memory_space<vmem>>, vector<1x8x32xbf16>
    %49 = vector.shape_cast %48 : vector<1x8x32xbf16> to vector<8x32xbf16>
    %cst_49 = arith.constant dense<0.000000e+00> : vector<8x32xf32>
    %50 = tpu.matmul %47, %49, %cst_49 {dimension_numbers = #tpu.dot_dimension_numbers<[1], [0], [0], [1], [0, 0, 1, 1], [], []>} : vector<8x8xbf16>, vector<8x32xbf16>, vector<8x32xf32> -> vector<8x32xf32>
    %51 = arith.truncf %50 : vector<8x32xf32> to vector<8x32xbf16>
    %52 = vector.shape_cast %29 : vector<8x8xbf16> to vector<8x1x8xbf16>
    %53 = vector.shape_cast %35 : vector<8x8xbf16> to vector<8x1x8xbf16>
    %54 = vector.shape_cast %41 : vector<8x8xbf16> to vector<8x1x8xbf16>
    %55 = vector.shape_cast %47 : vector<8x8xbf16> to vector<8x1x8xbf16>
    %56 = tpu.concatenate %52, %53, %54, %55 in 1 : vector<8x1x8xbf16>, vector<8x1x8xbf16>, vector<8x1x8xbf16>, vector<8x1x8xbf16> -> vector<8x4x8xbf16>
    %57 = vector.shape_cast %33 : vector<8x32xbf16> to vector<8x1x32xbf16>
    %58 = vector.shape_cast %39 : vector<8x32xbf16> to vector<8x1x32xbf16>
    %59 = vector.shape_cast %45 : vector<8x32xbf16> to vector<8x1x32xbf16>
    %60 = vector.shape_cast %51 : vector<8x32xbf16> to vector<8x1x32xbf16>
    %61 = tpu.concatenate %57, %58, %59, %60 in 1 : vector<8x1x32xbf16>, vector<8x1x32xbf16>, vector<8x1x32xbf16>, vector<8x1x32xbf16> -> vector<8x4x32xbf16>
    %cst_50 = arith.constant dense<0.000000e+00> : vector<8x4x8xf32>
    %62 = tpu.matmul %61, %13, %cst_50 {dimension_numbers = #tpu.dot_dimension_numbers<[2], [2], [1], [1], [0, 0, 0, 1, 1, 1], [0], [0]>} : vector<8x4x32xbf16>, vector<8x8x32xbf16>, vector<8x4x8xf32> -> vector<8x4x8xf32>
    %cst_51 = arith.constant dense<0.000000e+00> : vector<8x4x8xf32>
    %63 = tpu.matmul %56, %14, %cst_51 {dimension_numbers = #tpu.dot_dimension_numbers<[2], [2], [1], [1], [0, 0, 0, 1, 1, 1], [0], [0]>} : vector<8x4x8xbf16>, vector<8x8x8xbf16>, vector<8x4x8xf32> -> vector<8x4x8xf32>
    %64 = arith.addf %62, %63 : vector<8x4x8xf32>
    %65 = vector.extract_strided_slice %7 {offsets = [0, 0], sizes = [8, 8], strides = [1, 1]} : vector<8x32xf32> to vector<8x8xf32>
    %66 = arith.truncf %65 : vector<8x8xf32> to vector<8x8xbf16>
    %cst_52 = arith.constant dense<0.000000e+00> : vector<8x8xf32>
    %67 = tpu.matmul %29, %66, %cst_52 {dimension_numbers = #tpu.dot_dimension_numbers<[1], [1], [0], [0], [0, 0, 1, 0], [], []>} : vector<8x8xbf16>, vector<8x8xbf16>, vector<8x8xf32> -> vector<8x8xf32>
    %68 = vector.extract_strided_slice %64 {offsets = [0, 0, 0], sizes = [8, 1, 8], strides = [1, 1, 1]} : vector<8x4x8xf32> to vector<8x1x8xf32>
    %69 = vector.shape_cast %68 : vector<8x1x8xf32> to vector<8x8xf32>
    %70 = arith.addf %67, %69 : vector<8x8xf32>
    %cst_53 = arith.constant 0.353553385 : f32
    %71 = vector.broadcast %cst_53 : f32 to vector<8x8xf32>
    %72 = arith.mulf %70, %71 : vector<8x8xf32>
    %73 = arith.subf %72, %27 : vector<8x8xf32>
    %cst_54 = arith.constant dense<0xFF800000> : vector<8xf32>
    %74 = vector.multi_reduction <maximumf>, %73, %cst_54 [1] : vector<8x8xf32> to vector<8xf32>
    %75 = vector.shape_cast %74 : vector<8xf32> to vector<8x1xf32>
    %76 = vector.broadcast %75 : vector<8x1xf32> to vector<8x8xf32>
    %77 = arith.subf %73, %76 : vector<8x8xf32>
    %78 = math.exp %77 : vector<8x8xf32>
    %cst_55 = arith.constant dense<0.000000e+00> : vector<8xf32>
    %79 = vector.multi_reduction <add>, %78, %cst_55 [1] : vector<8x8xf32> to vector<8xf32>
    %80 = vector.shape_cast %79 : vector<8xf32> to vector<8x1xf32>
    %81 = tpu.reciprocal %80 {approx = true} : vector<8x1xf32> -> vector<8x1xf32>
    %82 = vector.broadcast %81 : vector<8x1xf32> to vector<8x8xf32>
    %83 = arith.mulf %78, %82 : vector<8x8xf32>
    %84 = arith.truncf %83 : vector<8x8xf32> to vector<8x8xbf16>
    %85 = arith.mulf %84, %20 : vector<8x8xbf16>
    %86 = arith.mulf %84, %23 : vector<8x8xbf16>
    %87 = tpu.concatenate %85, %86 in 1 : vector<8x8xbf16>, vector<8x8xbf16> -> vector<8x16xbf16>
    %88 = vector.extract_strided_slice %9 {offsets = [0, 0], sizes = [8, 8], strides = [1, 1]} : vector<8x32xf32> to vector<8x8xf32>
    %89 = vector.extract_strided_slice %11 {offsets = [0, 0], sizes = [8, 8], strides = [1, 1]} : vector<8x32xf32> to vector<8x8xf32>
    %90 = tpu.concatenate %88, %89 in 0 : vector<8x8xf32>, vector<8x8xf32> -> vector<16x8xf32>
    %91 = arith.truncf %90 : vector<16x8xf32> to vector<16x8xbf16>
    %cst_56 = arith.constant dense<0.000000e+00> : vector<8x8xf32>
    %92 = tpu.matmul %87, %91, %cst_56 {dimension_numbers = #tpu.dot_dimension_numbers<[1], [0], [0], [1], [0, 0, 1, 1], [], []>} : vector<8x16xbf16>, vector<16x8xbf16>, vector<8x8xf32> -> vector<8x8xf32>
    %93 = vector.extract_strided_slice %7 {offsets = [0, 8], sizes = [8, 8], strides = [1, 1]} : vector<8x32xf32> to vector<8x8xf32>
    %94 = arith.truncf %93 : vector<8x8xf32> to vector<8x8xbf16>
    %cst_57 = arith.constant dense<0.000000e+00> : vector<8x8xf32>
    %95 = tpu.matmul %35, %94, %cst_57 {dimension_numbers = #tpu.dot_dimension_numbers<[1], [1], [0], [0], [0, 0, 1, 0], [], []>} : vector<8x8xbf16>, vector<8x8xbf16>, vector<8x8xf32> -> vector<8x8xf32>
    %96 = vector.extract_strided_slice %64 {offsets = [0, 1, 0], sizes = [8, 1, 8], strides = [1, 1, 1]} : vector<8x4x8xf32> to vector<8x1x8xf32>
    %97 = vector.shape_cast %96 : vector<8x1x8xf32> to vector<8x8xf32>
    %98 = arith.addf %95, %97 : vector<8x8xf32>
    %cst_58 = arith.constant 0.353553385 : f32
    %99 = vector.broadcast %cst_58 : f32 to vector<8x8xf32>
    %100 = arith.mulf %98, %99 : vector<8x8xf32>
    %101 = arith.subf %100, %27 : vector<8x8xf32>
    %cst_59 = arith.constant dense<0xFF800000> : vector<8xf32>
    %102 = vector.multi_reduction <maximumf>, %101, %cst_59 [1] : vector<8x8xf32> to vector<8xf32>
    %103 = vector.shape_cast %102 : vector<8xf32> to vector<8x1xf32>
    %104 = vector.broadcast %103 : vector<8x1xf32> to vector<8x8xf32>
    %105 = arith.subf %101, %104 : vector<8x8xf32>
    %106 = math.exp %105 : vector<8x8xf32>
    %cst_60 = arith.constant dense<0.000000e+00> : vector<8xf32>
    %107 = vector.multi_reduction <add>, %106, %cst_60 [1] : vector<8x8xf32> to vector<8xf32>
    %108 = vector.shape_cast %107 : vector<8xf32> to vector<8x1xf32>
    %109 = tpu.reciprocal %108 {approx = true} : vector<8x1xf32> -> vector<8x1xf32>
    %110 = vector.broadcast %109 : vector<8x1xf32> to vector<8x8xf32>
    %111 = arith.mulf %106, %110 : vector<8x8xf32>
    %112 = arith.truncf %111 : vector<8x8xf32> to vector<8x8xbf16>
    %113 = arith.mulf %112, %20 : vector<8x8xbf16>
    %114 = arith.mulf %112, %23 : vector<8x8xbf16>
    %115 = tpu.concatenate %113, %114 in 1 : vector<8x8xbf16>, vector<8x8xbf16> -> vector<8x16xbf16>
    %116 = vector.extract_strided_slice %9 {offsets = [0, 8], sizes = [8, 8], strides = [1, 1]} : vector<8x32xf32> to vector<8x8xf32>
    %117 = vector.extract_strided_slice %11 {offsets = [0, 8], sizes = [8, 8], strides = [1, 1]} : vector<8x32xf32> to vector<8x8xf32>
    %118 = tpu.concatenate %116, %117 in 0 : vector<8x8xf32>, vector<8x8xf32> -> vector<16x8xf32>
    %119 = arith.truncf %118 : vector<16x8xf32> to vector<16x8xbf16>
    %cst_61 = arith.constant dense<0.000000e+00> : vector<8x8xf32>
    %120 = tpu.matmul %115, %119, %cst_61 {dimension_numbers = #tpu.dot_dimension_numbers<[1], [0], [0], [1], [0, 0, 1, 1], [], []>} : vector<8x16xbf16>, vector<16x8xbf16>, vector<8x8xf32> -> vector<8x8xf32>
    %121 = vector.extract_strided_slice %7 {offsets = [0, 16], sizes = [8, 8], strides = [1, 1]} : vector<8x32xf32> to vector<8x8xf32>
    %122 = arith.truncf %121 : vector<8x8xf32> to vector<8x8xbf16>
    %cst_62 = arith.constant dense<0.000000e+00> : vector<8x8xf32>
    %123 = tpu.matmul %41, %122, %cst_62 {dimension_numbers = #tpu.dot_dimension_numbers<[1], [1], [0], [0], [0, 0, 1, 0], [], []>} : vector<8x8xbf16>, vector<8x8xbf16>, vector<8x8xf32> -> vector<8x8xf32>
    %124 = vector.extract_strided_slice %64 {offsets = [0, 2, 0], sizes = [8, 1, 8], strides = [1, 1, 1]} : vector<8x4x8xf32> to vector<8x1x8xf32>
    %125 = vector.shape_cast %124 : vector<8x1x8xf32> to vector<8x8xf32>
    %126 = arith.addf %123, %125 : vector<8x8xf32>
    %cst_63 = arith.constant 0.353553385 : f32
    %127 = vector.broadcast %cst_63 : f32 to vector<8x8xf32>
    %128 = arith.mulf %126, %127 : vector<8x8xf32>
    %129 = arith.subf %128, %27 : vector<8x8xf32>
    %cst_64 = arith.constant dense<0xFF800000> : vector<8xf32>
    %130 = vector.multi_reduction <maximumf>, %129, %cst_64 [1] : vector<8x8xf32> to vector<8xf32>
    %131 = vector.shape_cast %130 : vector<8xf32> to vector<8x1xf32>
    %132 = vector.broadcast %131 : vector<8x1xf32> to vector<8x8xf32>
    %133 = arith.subf %129, %132 : vector<8x8xf32>
    %134 = math.exp %133 : vector<8x8xf32>
    %cst_65 = arith.constant dense<0.000000e+00> : vector<8xf32>
    %135 = vector.multi_reduction <add>, %134, %cst_65 [1] : vector<8x8xf32> to vector<8xf32>
    %136 = vector.shape_cast %135 : vector<8xf32> to vector<8x1xf32>
    %137 = tpu.reciprocal %136 {approx = true} : vector<8x1xf32> -> vector<8x1xf32>
    %138 = vector.broadcast %137 : vector<8x1xf32> to vector<8x8xf32>
    %139 = arith.mulf %134, %138 : vector<8x8xf32>
    %140 = arith.truncf %139 : vector<8x8xf32> to vector<8x8xbf16>
    %141 = arith.mulf %140, %20 : vector<8x8xbf16>
    %142 = arith.mulf %140, %23 : vector<8x8xbf16>
    %143 = tpu.concatenate %141, %142 in 1 : vector<8x8xbf16>, vector<8x8xbf16> -> vector<8x16xbf16>
    %144 = vector.extract_strided_slice %9 {offsets = [0, 16], sizes = [8, 8], strides = [1, 1]} : vector<8x32xf32> to vector<8x8xf32>
    %145 = vector.extract_strided_slice %11 {offsets = [0, 16], sizes = [8, 8], strides = [1, 1]} : vector<8x32xf32> to vector<8x8xf32>
    %146 = tpu.concatenate %144, %145 in 0 : vector<8x8xf32>, vector<8x8xf32> -> vector<16x8xf32>
    %147 = arith.truncf %146 : vector<16x8xf32> to vector<16x8xbf16>
    %cst_66 = arith.constant dense<0.000000e+00> : vector<8x8xf32>
    %148 = tpu.matmul %143, %147, %cst_66 {dimension_numbers = #tpu.dot_dimension_numbers<[1], [0], [0], [1], [0, 0, 1, 1], [], []>} : vector<8x16xbf16>, vector<16x8xbf16>, vector<8x8xf32> -> vector<8x8xf32>
    %149 = vector.extract_strided_slice %7 {offsets = [0, 24], sizes = [8, 8], strides = [1, 1]} : vector<8x32xf32> to vector<8x8xf32>
    %150 = arith.truncf %149 : vector<8x8xf32> to vector<8x8xbf16>
    %cst_67 = arith.constant dense<0.000000e+00> : vector<8x8xf32>
    %151 = tpu.matmul %47, %150, %cst_67 {dimension_numbers = #tpu.dot_dimension_numbers<[1], [1], [0], [0], [0, 0, 1, 0], [], []>} : vector<8x8xbf16>, vector<8x8xbf16>, vector<8x8xf32> -> vector<8x8xf32>
    %152 = vector.extract_strided_slice %64 {offsets = [0, 3, 0], sizes = [8, 1, 8], strides = [1, 1, 1]} : vector<8x4x8xf32> to vector<8x1x8xf32>
    %153 = vector.shape_cast %152 : vector<8x1x8xf32> to vector<8x8xf32>
    %154 = arith.addf %151, %153 : vector<8x8xf32>
    %cst_68 = arith.constant 0.353553385 : f32
    %155 = vector.broadcast %cst_68 : f32 to vector<8x8xf32>
    %156 = arith.mulf %154, %155 : vector<8x8xf32>
    %157 = arith.subf %156, %27 : vector<8x8xf32>
    %cst_69 = arith.constant dense<0xFF800000> : vector<8xf32>
    %158 = vector.multi_reduction <maximumf>, %157, %cst_69 [1] : vector<8x8xf32> to vector<8xf32>
    %159 = vector.shape_cast %158 : vector<8xf32> to vector<8x1xf32>
    %160 = vector.broadcast %159 : vector<8x1xf32> to vector<8x8xf32>
    %161 = arith.subf %157, %160 : vector<8x8xf32>
    %162 = math.exp %161 : vector<8x8xf32>
    %cst_70 = arith.constant dense<0.000000e+00> : vector<8xf32>
    %163 = vector.multi_reduction <add>, %162, %cst_70 [1] : vector<8x8xf32> to vector<8xf32>
    %164 = vector.shape_cast %163 : vector<8xf32> to vector<8x1xf32>
    %165 = tpu.reciprocal %164 {approx = true} : vector<8x1xf32> -> vector<8x1xf32>
    %166 = vector.broadcast %165 : vector<8x1xf32> to vector<8x8xf32>
    %167 = arith.mulf %162, %166 : vector<8x8xf32>
    %168 = arith.truncf %167 : vector<8x8xf32> to vector<8x8xbf16>
    %169 = arith.mulf %168, %20 : vector<8x8xbf16>
    %170 = arith.mulf %168, %23 : vector<8x8xbf16>
    %171 = tpu.concatenate %169, %170 in 1 : vector<8x8xbf16>, vector<8x8xbf16> -> vector<8x16xbf16>
    %172 = vector.extract_strided_slice %9 {offsets = [0, 24], sizes = [8, 8], strides = [1, 1]} : vector<8x32xf32> to vector<8x8xf32>
    %173 = vector.extract_strided_slice %11 {offsets = [0, 24], sizes = [8, 8], strides = [1, 1]} : vector<8x32xf32> to vector<8x8xf32>
    %174 = tpu.concatenate %172, %173 in 0 : vector<8x8xf32>, vector<8x8xf32> -> vector<16x8xf32>
    %175 = arith.truncf %174 : vector<16x8xf32> to vector<16x8xbf16>
    %cst_71 = arith.constant dense<0.000000e+00> : vector<8x8xf32>
    %176 = tpu.matmul %171, %175, %cst_71 {dimension_numbers = #tpu.dot_dimension_numbers<[1], [0], [0], [1], [0, 0, 1, 1], [], []>} : vector<8x16xbf16>, vector<16x8xbf16>, vector<8x8xf32> -> vector<8x8xf32>
    %177 = vector.shape_cast %83 : vector<8x8xf32> to vector<8x1x8xf32>
    %178 = vector.shape_cast %111 : vector<8x8xf32> to vector<8x1x8xf32>
    %179 = vector.shape_cast %139 : vector<8x8xf32> to vector<8x1x8xf32>
    %180 = vector.shape_cast %167 : vector<8x8xf32> to vector<8x1x8xf32>
    %181 = tpu.concatenate %177, %178, %179, %180 in 1 : vector<8x1x8xf32>, vector<8x1x8xf32>, vector<8x1x8xf32>, vector<8x1x8xf32> -> vector<8x4x8xf32>
    %182 = arith.truncf %181 : vector<8x4x8xf32> to vector<8x4x8xbf16>
    %cst_72 = arith.constant dense<0.000000e+00> : vector<8x4x8xf32>
    %183 = tpu.matmul %182, %15, %cst_72 {dimension_numbers = #tpu.dot_dimension_numbers<[2], [1], [1], [2], [0, 0, 0, 1, 1, 2], [0], [0]>} : vector<8x4x8xbf16>, vector<8x8x8xbf16>, vector<8x4x8xf32> -> vector<8x4x8xf32>
    %184 = vector.extract_strided_slice %183 {offsets = [0, 0, 0], sizes = [8, 1, 8], strides = [1, 1, 1]} : vector<8x4x8xf32> to vector<8x1x8xf32>
    %185 = vector.shape_cast %184 : vector<8x1x8xf32> to vector<8x8xf32>
    %186 = arith.addf %92, %185 : vector<8x8xf32>
    %187 = vector.extract_strided_slice %183 {offsets = [0, 1, 0], sizes = [8, 1, 8], strides = [1, 1, 1]} : vector<8x4x8xf32> to vector<8x1x8xf32>
    %188 = vector.shape_cast %187 : vector<8x1x8xf32> to vector<8x8xf32>
    %189 = arith.addf %120, %188 : vector<8x8xf32>
    %190 = vector.extract_strided_slice %183 {offsets = [0, 2, 0], sizes = [8, 1, 8], strides = [1, 1, 1]} : vector<8x4x8xf32> to vector<8x1x8xf32>
    %191 = vector.shape_cast %190 : vector<8x1x8xf32> to vector<8x8xf32>
    %192 = arith.addf %148, %191 : vector<8x8xf32>
    %193 = vector.extract_strided_slice %183 {offsets = [0, 3, 0], sizes = [8, 1, 8], strides = [1, 1, 1]} : vector<8x4x8xf32> to vector<8x1x8xf32>
    %194 = vector.shape_cast %193 : vector<8x1x8xf32> to vector<8x8xf32>
    %195 = arith.addf %176, %194 : vector<8x8xf32>
    %196 = tpu.concatenate %186, %189, %192, %195 in 1 : vector<8x8xf32>, vector<8x8xf32>, vector<8x8xf32>, vector<8x8xf32> -> vector<8x32xf32>
    %197 = arith.truncf %196 : vector<8x32xf32> to vector<8x32xbf16>
    %c0_73 = arith.constant 0 : index
    %c0_74 = arith.constant 0 : index
    %c0_75 = arith.constant 0 : index
    %198 = vector.load %arg15[%c0_73, %c0_74, %c0_75] : memref<1x8x32xbf16, #tpu.memory_space<vmem>>, vector<1x8x32xbf16>
    %199 = vector.shape_cast %198 : vector<1x8x32xbf16> to vector<8x32xbf16>
    %200 = vector.shape_cast %197 : vector<8x32xbf16> to vector<1x8x32xbf16>
    tpu.vector_store %arg15[%c0_73, %c0_74, %c0_75], %200 {strides = array<i32>} : memref<1x8x32xbf16, #tpu.memory_space<vmem>>, vector<1x8x32xbf16>,
    return
  }
  func.func @transform_0(%arg0: i32, %arg1: i32) -> (i32, i32, i32) {
    %c0_i32 = arith.constant 0 : i32
    %c0_i32_0 = arith.constant 0 : i32
    %c0_i32_1 = arith.constant 0 : i32
    return %arg0, %c0_i32, %c0_i32_0 : i32, i32, i32
  }
  func.func @transform_1(%arg0: i32, %arg1: i32) -> (i32, i32, i32) {
    %c0_i32 = arith.constant 0 : i32
    %c0_i32_0 = arith.constant 0 : i32
    return %arg0, %arg1, %c0_i32 : i32, i32, i32
  }
  func.func @transform_2(%arg0: i32, %arg1: i32) -> (i32, i32, i32, i32) {
    %c0_i32 = arith.constant 0 : i32
    %c0_i32_0 = arith.constant 0 : i32
    %c0_i32_1 = arith.constant 0 : i32
    return %arg0, %arg1, %c0_i32, %c0_i32_0 : i32, i32, i32, i32
  }
  func.func @transform_3(%arg0: i32, %arg1: i32) -> (i32, i32, i32) {
    %c0_i32 = arith.constant 0 : i32
    %c0_i32_0 = arith.constant 0 : i32
    return %arg0, %arg1, %c0_i32 : i32, i32, i32
  }
  func.func @transform_4(%arg0: i32, %arg1: i32) -> (i32, i32, i32) {
    %c0_i32 = arith.constant 0 : i32
    %c0_i32_0 = arith.constant 0 : i32
    return %arg0, %arg1, %c0_i32 : i32, i32, i32
  }
  func.func @transform_5(%arg0: i32, %arg1: i32) -> (i32, i32, i32) {
    %c0_i32 = arith.constant 0 : i32
    %c0_i32_0 = arith.constant 0 : i32
    return %arg0, %arg1, %c0_i32 : i32, i32, i32
  }
  func.func @transform_6(%arg0: i32, %arg1: i32) -> (i32, i32, i32) {
    %c0_i32 = arith.constant 0 : i32
    %c0_i32_0 = arith.constant 0 : i32
    %c0_i32_1 = arith.constant 0 : i32
    return %arg1, %c0_i32, %c0_i32_0 : i32, i32, i32
  }
  func.func @transform_7(%arg0: i32, %arg1: i32) -> (i32, i32, i32) {
    %c0_i32 = arith.constant 0 : i32
    %c0_i32_0 = arith.constant 0 : i32
    %c0_i32_1 = arith.constant 0 : i32
    return %arg1, %c0_i32, %c0_i32_0 : i32, i32, i32
  }
  func.func @transform_8(%arg0: i32, %arg1: i32) -> (i32, i32) {
    %c0_i32 = arith.constant 0 : i32
    %c0_i32_0 = arith.constant 0 : i32
    %c0_i32_1 = arith.constant 0 : i32
    return %c0_i32, %c0_i32_0 : i32, i32
  }
  func.func @transform_9(%arg0: i32, %arg1: i32) -> (i32, i32) {
    %c0_i32 = arith.constant 0 : i32
    %c0_i32_0 = arith.constant 0 : i32
    %c0_i32_1 = arith.constant 0 : i32
    return %c0_i32, %c0_i32_0 : i32, i32
  }
  func.func @transform_10(%arg0: i32, %arg1: i32) -> (i32, i32) {
    %c0_i32 = arith.constant 0 : i32
    %c0_i32_0 = arith.constant 0 : i32
    %c0_i32_1 = arith.constant 0 : i32
    return %c0_i32, %c0_i32_0 : i32, i32
  }
  func.func @transform_11(%arg0: i32, %arg1: i32) -> (i32, i32) {
    %c0_i32 = arith.constant 0 : i32
    %c0_i32_0 = arith.constant 0 : i32
    %c0_i32_1 = arith.constant 0 : i32
    return %c0_i32, %c0_i32_0 : i32, i32
  }
  func.func @transform_12(%arg0: i32, %arg1: i32) -> (i32, i32, i32) {
    %c0_i32 = arith.constant 0 : i32
    %c0_i32_0 = arith.constant 0 : i32
    %c0_i32_1 = arith.constant 0 : i32
    %c0_i32_2 = arith.constant 0 : i32
    return %c0_i32, %c0_i32_0, %c0_i32_1 : i32, i32, i32
  }
  func.func @transform_13(%arg0: i32, %arg1: i32) -> (i32, i32, i32) {
    %c0_i32 = arith.constant 0 : i32
    %c0_i32_0 = arith.constant 0 : i32
    return %arg0, %arg1, %c0_i32 : i32, i32, i32
  }
}

</mosaic_0001>

<bundles_post_ra>
// kernel: tpu_custom_call.1
= control target key start
LH: loop header
LB: loop body
LE: loop exit
PB: predicated region body
PF: predicated region fallthrough
CT: control target
= control target key end

     0   :  { %s6728_s0 = inlined_call_operand.hbm [shape: bf16[2,8,32], index: 0, kind: input, shape index: {}]   ;;  %s6729_s1 = inlined_call_operand.hbm [shape: bf16[2,8,32], index: 1, kind: input, shape index: {}]   ;;  %s6730_s2 = inlined_call_operand.hbm [shape: bf16[2,8,8,32], index: 2, kind: input, shape index: {}]   ;;  %s6731_s3 = inlined_call_operand.hbm [shape: f32[2,8,8], index: 3, kind: input, shape index: {}]   ;;  %s6732_s4 = inlined_call_operand.hbm [shape: f32[2,8,8], index: 4, kind: input, shape index: {}]   ;;  %s6733_s5 = inlined_call_operand.hbm [shape: f32[2,8,8], index: 5, kind: input, shape index: {}]   ;;  %s6734_s6 = inlined_call_operand.hbm [shape: bf16[8,8,8], index: 6, kind: input, shape index: {}]   ;;  %s6735_s7 = inlined_call_operand.hbm [shape: bf16[8,8,8], index: 7, kind: input, shape index: {}]   ;;  %s6736_s8 = inlined_call_operand.hbm [shape: bf16[32,32], index: 8, kind: input, shape index: {}]   ;;  %s6737_s9 = inlined_call_operand.hbm [shape: bf16[32,32], index: 9, kind: input, shape index: {}]   ;;  %s6738_s10 = inlined_call_operand.hbm [shape: bf16[32,32], index: 10, kind: input, shape index: {}]   ;;  %s6739_s11 = inlined_call_operand.hbm [shape: bf16[32,32], index: 11, kind: input, shape index: {}]   ;;  %s6740_s12 = inlined_call_operand.hbm [shape: bf16[4,8,32], index: 12, kind: input, shape index: {}]   ;;  %s6741_s13 = inlined_call_operand.hbm [shape: bf16[2,8,32], index: 13, kind: output, shape index: {}]  }
   0x1   :  { %6774 = sst [smem:[#allocation41_spill]] %s6728_s0 }
   0x2   :  { %6775 = sst [smem:[#allocation42_spill]] %s6729_s1 }
   0x3   :  { %6776 = sst [smem:[#allocation43_spill]] %s6730_s2 }
   0x4   :  { %6777 = sst [smem:[#allocation44_spill]] %s6731_s3 }
   0x5   :  { %6778 = sst [smem:[#allocation45_spill]] %s6732_s4 }
   0x6   :  { %6779 = sst [smem:[#allocation46_spill]] %s6733_s5 }
   0x7   :  { %6780 = sst [smem:[#allocation47_spill]] %s6734_s6 }
   0x8   :  { %6781 = sst [smem:[#allocation48_spill]] %s6735_s7 }
   0x9   :  { %6782 = sst [smem:[#allocation49_spill]] %s6737_s9 }
   0xa   :  { %6783 = sst [smem:[#allocation50_spill]] %s6739_s11 }
   0xb   :  { %6784 = sst [smem:[#allocation51_spill]] %s6741_s13 }
   0xc   :  { %18 = vsyncpa [#allocation3], 0 }
   0xd   :  { %20 = vsyncpa [#allocation3 + $0x1], 0 }
   0xe   :  { %21 = vsyncpa [#allocation6], 0 }
   0xf   :  { %23 = vsyncpa [#allocation6 + $0x1], 0 }
  0x10   :  { %24 = vsyncpa [#allocation9], 0 }
  0x11   :  { %26 = vsyncpa [#allocation9 + $0x1], 0 }
  0x12   :  { %27 = vsyncpa [#allocation12], 0 }
  0x13   :  { %29 = vsyncpa [#allocation12 + $0x1], 0 }
  0x14   :  { %30 = vsyncpa [#allocation15], 0 }
  0x15   :  { %31 = vsyncpa [#allocation18], 0 }
  0x16   :  { %32 = vsyncpa [#allocation21], 0 }
  0x17   :  { %33 = vsyncpa [#allocation4], 0 }
  0x18   :  { %35 = vsyncpa [#allocation4 + $0x1], 0  ;;  %s5429_s25 = smov 0   ;;  %s5431_s26 = smov 0  }
  0x19   :  { %s5433_s27 = smov 0   ;;  %s5435_s28 = smov 0  }
  0x1a   :  { %s5437_s29 = smov 0   ;;  %s5439_s30 = smov 0  }
  0x1b LB: > { %6785 = sst [smem:[#allocation33_spill]] %s5312_s25  ;;  %s5460_s14 = sadd.s32 4294967295, %s5332_s30   ;;  %s5332_s30 = sphi %s5439_s30, %s41_s30   ;;  %s5328_s29 = sphi %s5437_s29, %s6856_s29   ;;  %s5324_s28 = sphi %s5435_s28, %s6855_s28   ;;  %s5320_s27 = sphi %s5433_s27, %s6851_s27   ;;  %s5316_s26 = sphi %s5431_s26, %s6854_s26   ;;  %s5312_s25 = sphi %s5429_s25, %s6853_s25  }
  0x1c   : > { %6786 = sst [smem:[#allocation34_spill]] %s5320_s27  ;;  %p4179_p0 = scmp.ge.s32.totalorder %s5332_s30, 1 }
  0x1d   : > { %6787 = sst [smem:[#allocation35_spill]] %s5324_s28  ;;  %p6748_p1 = scmp.eq.s32.totalorder %s5460_s14, 0 }
  0x1e   : > { %6788 = sst [smem:[#allocation36_spill]] %s5332_s30  ;;  %p409_p2 = scmp.lt.s32.totalorder %s5332_s30, 3 }
  0x1f   : > { %s5334_s16 = smov [#allocation13]   ;;  %s5335_s19 = smov [#allocation14]  }
  0x20   : > { %p5465_p3 = pnand %p4179_p0, %p409_p2  ;;  %s424_s17 = sshll.u32 %s5334_s16, 4  ;;  %s5469_s17 = int_to_ptr.vmem [resolvable:$true] %s424_s17 }
  0x21   : > { %s440_s20 = sshll.u32 %s5335_s19, 4  ;;  %s5336_s21 = smov [#allocation17]   ;;  %s5480_s20 = int_to_ptr.vmem [resolvable:$true] %s440_s20 }
  0x22   : > { %s6789_s15 = scalar_select %p5465_p3, 1, 0 }
  0x23   : > { %p4695_p4 = pneg %p5465_p3  ;;  %s5482_s22 = sshll.u32 %s5336_s21, 4  ;;  %s467_s22 = int_to_ptr.vmem [resolvable:$true] %s5482_s22 }
  0x24   : > { %6790 = sst [smem:[#allocation37_spill]] %s6789_s15  ;;  %s6792_s6 = sld [smem:[#allocation47_spill]] }
  0x25   : > { %p5476_p6 = pnand %p4695_p4, %p6748_p1 }
  0x27   : > { %s6791_s18 = scalar_select %p5476_p6, 1, 0 }
  0x28   : > { %p5492_p8 = pneg %p5476_p6 }
  0x2a   : > { %s4846_s16 = scalar_lea.hbm %s6792_s6, 512 }
  0x2b   : > { %p4847_p7 = scmp.ne.s32.totalorder %s6792_s6, %s4846_s16  ;;  %p4853_p11 = scmp.lt.u32.totalorder %s4846_s16, %s6792_s6 }
  0x2c   : > { %s6793_s15 = scalar_select %p5492_p8, 1, 0 }
  0x2d   : > { %p4849_p9 = pnand %p5492_p8, %p4847_p7 }
  0x2f   : > { %p4850_p10 = pneg %p4849_p9 }
  0x31   : > { %p4855_p12 = pnand %p4853_p11, %p4850_p10 }
  0x33   : > { %4858 = shalt.err (!%p4855_p12)
}
  0x34   : > { %s4859_s13 = scalar_lea.vmem %s5469_s17, 512  ;;  %p4867_p4 = scmp.lt.s32.totalorder %s5469_s17, %s5469_s17 }
  0x35   : > { %p4860_p13 = scmp.ne.s32.totalorder %s5469_s17, %s4859_s13  ;;  %p4868_p5 = scmp.lt.s32.totalorder %s4859_s13, %s4859_s13 }
  0x37   : > { %p4862_p0 = pnand %p4860_p13, %p5492_p8  ;;  %p4869_p7 = por %p4868_p5, %p4867_p4 }
  0x39   : > { %p4863_p2 = pneg %p4862_p0 }
  0x3b   : > { %p4870_p9 = pnand %p4869_p7, %p4863_p2 }
  0x3d   : > { %4873 = shalt.err (!%p4870_p9)
}
  0x3e   : > { %s6750_s28 = smov 64   ;;  %s6752_s23 = smov 4  }
  0x3f   : > { %4698 = dma.hbm_to_vmem [thread:$0]  (!%p5476_p6), %s6792_s6, 512, %s5469_s17, [#allocation12], %s6750_s28, %s6750_s28, %s6752_s23  }
  0x40   : > { %s6794_s7 = sld [smem:[#allocation48_spill]] }
  0x46   : > { %s4874_s13 = scalar_lea.hbm %s6794_s7, 512 }
  0x47   : > { %p4875_p5 = scmp.ne.s32.totalorder %s6794_s7, %s4874_s13  ;;  %p4881_p12 = scmp.lt.u32.totalorder %s4874_s13, %s6794_s7 }
  0x49   : > { %p4877_p10 = pnand %p4875_p5, %p5492_p8 }
  0x4b   : > { %p4878_p11 = pneg %p4877_p10 }
  0x4d   : > { %p4883_p13 = pnand %p4881_p12, %p4878_p11 }
  0x4f   : > { %4886 = shalt.err (!%p4883_p13)
}
  0x50   : > { %s4887_s17 = scalar_lea.vmem %s5480_s20, 512  ;;  %p4895_p7 = scmp.lt.s32.totalorder %s5480_s20, %s5480_s20 }
  0x51   : > { %p4888_p0 = scmp.ne.s32.totalorder %s5480_s20, %s4887_s17  ;;  %p4896_p9 = scmp.lt.s32.totalorder %s4887_s17, %s4887_s17 }
  0x53   : > { %p4890_p2 = pnand %p4888_p0, %p5492_p8  ;;  %p4897_p5 = por %p4896_p9, %p4895_p7 }
  0x55   : > { %p4891_p4 = pneg %p4890_p2 }
  0x57   : > { %p4898_p10 = pnand %p4897_p5, %p4891_p4 }
  0x59   : > { %4901 = shalt.err (!%p4898_p10)
}
  0x5a   : > { %4701 = dma.hbm_to_vmem [thread:$0]  (!%p5476_p6), %s6794_s7, 512, %s5480_s20, [#allocation15], %s6750_s28, %s6750_s28, %s6752_s23  }
  0x5b   : > { %s6795_s9 = sld [smem:[#allocation49_spill]] }
  0x61   : > { %s4902_s24 = scalar_lea.hbm %s6795_s9, 256 }
  0x62   : > { %p4903_p11 = scmp.ne.s32.totalorder %s6795_s9, %s4902_s24  ;;  %p4909_p0 = scmp.lt.u32.totalorder %s4902_s24, %s6795_s9 }
  0x64   : > { %p4905_p12 = pnand %p4903_p11, %p5492_p8 }
  0x66   : > { %p4906_p13 = pneg %p4905_p12 }
  0x68   : > { %p4911_p2 = pnand %p4909_p0, %p4906_p13 }
  0x6a   : > { %4914 = shalt.err (!%p4911_p2)
}
  0x6b   : > { %s4915_s17 = scalar_lea.vmem %s467_s22, 256  ;;  %p4923_p5 = scmp.lt.s32.totalorder %s467_s22, %s467_s22 }
  0x6c   : > { %p4916_p4 = scmp.ne.s32.totalorder %s467_s22, %s4915_s17  ;;  %p4924_p10 = scmp.lt.s32.totalorder %s4915_s17, %s4915_s17 }
  0x6e   : > { %p4918_p7 = pnand %p4916_p4, %p5492_p8  ;;  %p4925_p1 = por %p4924_p10, %p4923_p5 }
  0x70   : > { %p4919_p9 = pneg %p4918_p7 }
  0x72   : > { %p4926_p3 = pnand %p4925_p1, %p4919_p9 }
  0x74   : > { %4929 = shalt.err (!%p4926_p3)
}
  0x75   : > { %4707 = dma.hbm_to_vmem [thread:$0]  (!%p5476_p6), %s6795_s9, 256, %s467_s22, [#allocation18], %s6750_s28, %s6750_s28, %s6752_s23  }
  0x76   : > { %s5339_s2 = smov [#allocation20]   ;;  %s6796_s11 = sld [smem:[#allocation50_spill]] }
  0x77   : > { %s492_s4 = sshll.u32 %s5339_s2, 4  ;;  %s493_s4 = int_to_ptr.vmem [resolvable:$true] %s492_s4 }
  0x7c   : > { %s4930_s16 = scalar_lea.hbm %s6796_s11, 256 }
  0x7d   : > { %p4931_p1 = scmp.ne.s32.totalorder %s6796_s11, %s4930_s16  ;;  %p4937_p12 = scmp.lt.u32.totalorder %s4930_s16, %s6796_s11 }
  0x7f   : > { %p4933_p3 = pnand %p4931_p1, %p5492_p8 }
  0x81   : > { %p4934_p11 = pneg %p4933_p3 }
  0x83   : > { %p4939_p13 = pnand %p4937_p12, %p4934_p11 }
  0x85   : > { %4942 = shalt.err (!%p4939_p13)
}
  0x86   : > { %s4943_s22 = scalar_lea.vmem %s493_s4, 256  ;;  %p4951_p7 = scmp.lt.s32.totalorder %s493_s4, %s493_s4 }
  0x87   : > { %p4944_p0 = scmp.ne.s32.totalorder %s493_s4, %s4943_s22  ;;  %p4952_p9 = scmp.lt.s32.totalorder %s4943_s22, %s4943_s22 }
  0x89   : > { %p4946_p2 = pnand %p4944_p0, %p5492_p8  ;;  %p4953_p5 = por %p4952_p9, %p4951_p7 }
  0x8b   : > { %p4947_p4 = pneg %p4946_p2 }
  0x8d   : > { %p4954_p10 = pnand %p4953_p5, %p4947_p4 }
  0x8f   : > { %4957 = shalt.err (!%p4954_p10)
}
  0x90   : > { %4713 = dma.hbm_to_vmem [thread:$0]  (!%p5476_p6), %s6796_s11, 256, %s493_s4, [#allocation21], %s6750_s28, %s6750_s28, %s6752_s23  }
  0x91   : > { %s4178_s2 = sadd.s32 4294967294, %s5332_s30   ;;  %s53_s5 = sadd.s32 1, %s5328_s29 }
  0x92   : > { %p55_p1 = scmp.ge.s32.totalorder %s53_s5, 2  ;;  %s60_s24 = sadd.s32 1, %s5320_s27 }
  0x93   : > { %p67_p3 = scmp.ne.s32.totalorder %s5320_s27, %s5316_s26  ;;  %p68_p11 = scmp.eq.s32.totalorder %s5332_s30, 0 }
  0x94   : > { %s6858_s5 = smov (%p55_p1, %s53_s5), 0  ;;  %p73_p13 = scmp.ne.s32.totalorder %s5316_s26, %s5312_s25 }
  0x95   : > { %6797 = sst [smem:[#allocation38_spill]] %s6858_s5  ;;  %p5593_p12 = por %p68_p11, %p67_p3 }
  0x96   : > { %s57_s4 = ssub.s32 %s5328_s29, %s6858_s5  ;;  %p396_p0 = scmp.eq.s32.totalorder %s5460_s14, 1 }
  0x97   : > { %p58_p2 = scmp.eq.s32.totalorder %s57_s4, 0  ;;  %p6799_p4 = scmp.eq.s32.totalorder %s5460_s14, 0 }
  0x98   : > { %p5608_p9 = por %p396_p0, %p67_p3  ;;  %p402_p5 = scmp.eq.s32.totalorder %s4178_s2, 1 }
  0x99   : > { %p5604_p7 = por %p6799_p4, %p73_p13  ;;  %p4747_p1 = scmp.lt.s32.totalorder %s5332_s30, 2 }
  0x9a   : > { %s6801_s21 = scalar_select %p5608_p9, 1, 0 }
  0x9b   : > { %s6800_s19 = scalar_select %p5604_p7, 1, 0 }
  0x9c   : > { %s5613_s13 = scalar_select %p58_p2, %s5320_s27, %s60_s24  }
  0x9d   : > { %p5615_p10 = por %p402_p5, %p73_p13  ;;  %s5621_s22 = sand.u32 1, %s5320_s27  }
  0x9e   : > { %6802 = sst [smem:[#allocation39_spill]] %s5613_s13  ;;  %s6754_s20 = sshll.u32 %s5328_s29, 6 }
  0x9f   : > { %s6803_s17 = scalar_select %p5615_p10, 1, 0 }
  0xa0   : > { %s6755_s0 = sshll.u32 %s5621_s22, 2  ;;  %p5627_p11 = pnand %p4747_p1, %p5593_p12 }
  0xa1   : > { %6804 = sst [smem:[#allocation40_spill]] %s6803_s17  ;;  %s5632_s2 = sand.u32 1, %s5332_s30  }
  0xa2   : > { %s6805_s4 = scalar_select %p5627_p11, 1, 0 }
  0xa3   : > { %s6806_s1 = sld [smem:[#allocation42_spill]]  ;;  %s541_s16 = scalar_lea.vmem [#allocation5], %s6755_s0 }
  0xa4   : > { %s549_s6 = sshll.u32 %s541_s16, 4  ;;  %p5650_p12 = pneg %p5627_p11  ;;  %s5643_s6 = int_to_ptr.vmem [resolvable:$true] %s549_s6 }
  0xa6   : > { %s6807_s11 = scalar_select %p5650_p12, 1, 0 }
  0xa9   : > { %s5639_s23 = scalar_lea.hbm %s6806_s1, %s6754_s20  ;;  %s4963_s20 = scalar_lea.hbm %s6806_s1, 128 }
  0xaa   : > { %s4958_s9 = scalar_lea.hbm %s5639_s23, 64  ;;  %p4964_p2 = scmp.lt.u32.totalorder %s5639_s23, %s6806_s1 }
  0xab   : > { %p4959_p3 = scmp.ne.s32.totalorder %s5639_s23, %s4958_s9  ;;  %p4965_p4 = scmp.lt.u32.totalorder %s4963_s20, %s4958_s9 }
  0xac   : > { %p4967_p1 = scmp.lt.u32.totalorder %s4958_s9, %s5639_s23 }
  0xad   : > { %p4961_p13 = pnand %p5650_p12, %p4959_p3  ;;  %p4966_p5 = por %p4965_p4, %p4964_p2 }
  0xaf   : > { %p4962_p0 = pneg %p4961_p13  ;;  %p4968_p10 = por %p4967_p1, %p4966_p5 }
  0xb1   : > { %p4969_p9 = pnand %p4968_p10, %p4962_p0 }
  0xb3   : > { %4972 = shalt.err (!%p4969_p9)
}
  0xb4   : > { %s4973_s7 = scalar_lea.vmem %s5643_s6, 64  ;;  %s5340_s28 = smov [#allocation5]  }
  0xb5   : > { %p4974_p3 = scmp.ne.s32.totalorder %s5643_s6, %s4973_s7  ;;  %s4978_s24 = sshll.u32 %s5340_s28, 4  ;;  %s4979_s24 = int_to_ptr.vmem [resolvable:$false] %s4978_s24 }
  0xb6   : > { %s4980_s0 = scalar_lea.vmem %s4979_s24, 128  ;;  %p4981_p6 = scmp.lt.s32.totalorder %s5643_s6, %s4979_s24 }
  0xb7   : > { %p4976_p13 = pnand %p4974_p3, %p5650_p12  ;;  %p4982_p8 = scmp.lt.s32.totalorder %s4980_s0, %s4973_s7 }
  0xb9   : > { %p4977_p7 = pneg %p4976_p13  ;;  %p4983_p2 = por %p4982_p8, %p4981_p6 }
  0xbb   : > { %p4984_p4 = pnand %p4983_p2, %p4977_p7 }
  0xbd   : > { %4987 = shalt.err (!%p4984_p4)
}
  0xbe   : > { %s6808_s9 = scalar_lea.sflag [#allocation6], %s5632_s2  ;;  %s5676_s20 = sshll.u32 %s5621_s22, 3 }
  0xbf   : > { %4723 = dma.hbm_to_vmem [thread:$0]  (!%p5627_p11), %s5639_s23, 64, %s5643_s6, %s6808_s9  }
  0xc0   : > { %s5679_s16 = sshll.u32 %s5328_s29, 7  ;;  %s6809_s3 = sld [smem:[#allocation44_spill]] }
  0xc1   : > { %s583_s0 = scalar_lea.vmem [#allocation8], %s5676_s20  ;;  %s5341_s6 = smov [#allocation16]  }
  0xc2   : > { %s591_s1 = sshll.u32 %s583_s0, 4  ;;  %s5690_s23 = sshll.u32 %s5341_s6, 4  ;;  %s5688_s1 = int_to_ptr.vmem [resolvable:$true] %s591_s1  ;;  %s454_s23 = int_to_ptr.vmem [resolvable:$true] %s5690_s23 }
  0xc3   : > { %s6768_s9 = scalar_lea.sflag [#allocation9], %s5632_s2 }
  0xc6   : > { %s5685_s24 = scalar_lea.hbm %s6809_s3, %s5679_s16  ;;  %s4993_s13 = scalar_lea.hbm %s6809_s3, 256 }
  0xc7   : > { %s4988_s5 = scalar_lea.hbm %s5685_s24, 128  ;;  %p4994_p9 = scmp.lt.u32.totalorder %s5685_s24, %s6809_s3 }
  0xc8   : > { %p4989_p6 = scmp.ne.s32.totalorder %s5685_s24, %s4988_s5  ;;  %p4995_p10 = scmp.lt.u32.totalorder %s4993_s13, %s4988_s5 }
  0xc9   : > { %p4997_p5 = scmp.lt.u32.totalorder %s4988_s5, %s5685_s24 }
  0xca   : > { %p4991_p8 = pnand %p4989_p6, %p5650_p12  ;;  %p4996_p0 = por %p4995_p10, %p4994_p9 }
  0xcc   : > { %p4992_p7 = pneg %p4991_p8  ;;  %p4998_p1 = por %p4997_p5, %p4996_p0 }
  0xce   : > { %p4999_p3 = pnand %p4998_p1, %p4992_p7 }
  0xd0   : > { %5002 = shalt.err (!%p4999_p3)
}
  0xd1   : > { %s5003_s0 = scalar_lea.vmem %s5688_s1, 128  ;;  %s5342_s6 = smov [#allocation8]  }
  0xd2   : > { %p5004_p13 = scmp.ne.s32.totalorder %s5688_s1, %s5003_s0  ;;  %s5008_s7 = sshll.u32 %s5342_s6, 4  ;;  %s5009_s7 = int_to_ptr.vmem [resolvable:$false] %s5008_s7 }
  0xd3   : > { %s5010_s27 = scalar_lea.vmem %s5009_s7, 256  ;;  %p5011_p6 = scmp.lt.s32.totalorder %s5688_s1, %s5009_s7 }
  0xd4   : > { %p5006_p2 = pnand %p5004_p13, %p5650_p12  ;;  %p5012_p8 = scmp.lt.s32.totalorder %s5010_s27, %s5003_s0 }
  0xd6   : > { %p5007_p4 = pneg %p5006_p2  ;;  %p5013_p9 = por %p5012_p8, %p5011_p6 }
  0xd8   : > { %p5014_p10 = pnand %p5013_p9, %p5007_p4 }
  0xda   : > { %5017 = shalt.err (!%p5014_p10)
}
  0xdb   : > { %4729 = dma.hbm_to_vmem [thread:$0]  (!%p5627_p11), %s5685_s24, 128, %s5688_s1, %s6768_s9  }
  0xdc   : > { %s5018_s13 = scalar_lea.hbm %s6736_s8, 256  ;;  %p6810_p0 = scmp.ne.s32.totalorder %s6793_s15, 0 }
  0xdd   : > { %p5019_p7 = scmp.ne.s32.totalorder %s6736_s8, %s5018_s13  ;;  %p5025_p3 = scmp.lt.u32.totalorder %s5018_s13, %s6736_s8 }
  0xdf   : > { %p5021_p5 = pnand %p5019_p7, %p6810_p0 }
  0xe1   : > { %p5022_p1 = pneg %p5021_p5 }
  0xe3   : > { %p5027_p13 = pnand %p5025_p3, %p5022_p1 }
  0xe5   : > { %5030 = shalt.err (!%p5027_p13)
}
  0xe6   : > { %s5031_s27 = scalar_lea.vmem %s454_s23, 256  ;;  %p5039_p8 = scmp.lt.s32.totalorder %s454_s23, %s454_s23 }
  0xe7   : > { %p5032_p2 = scmp.ne.s32.totalorder %s454_s23, %s5031_s27  ;;  %p5040_p9 = scmp.lt.s32.totalorder %s5031_s27, %s5031_s27 }
  0xe9   : > { %p5034_p4 = pnand %p5032_p2, %p6810_p0  ;;  %p5041_p10 = por %p5040_p9, %p5039_p8 }
  0xeb   : > { %p5035_p6 = pneg %p5034_p4 }
  0xed   : > { %p5042_p11 = pnand %p5041_p10, %p5035_p6 }
  0xef   : > { %5045 = shalt.err (!%p5042_p11)
}
  0xf0   : > { %p6811_p7 = scmp.ne.s32.totalorder %s6791_s18, 0  ;;  %s6812_s1 = smov 4  }
  0xf1   : > { %s6813_s24 = smov 64   ;;  %s5343_s13 = smov [#allocation19]  }
  0xf2   : > { %4704 = dma.hbm_to_vmem [thread:$0]  (!%p6811_p7), %s6736_s8, 256, %s454_s23, [#allocation15], %s6813_s24, %s6813_s24, %s6812_s1  }
  0xf3   : > { %s479_s28 = sshll.u32 %s5343_s13, 4  ;;  %s5344_s6 = smov [#allocation22]   ;;  %s480_s28 = int_to_ptr.vmem [resolvable:$true] %s479_s28 }
  0xf4   : > { %s505_s0 = sshll.u32 %s5344_s6, 4  ;;  %s5046_s9 = scalar_lea.hbm %s6738_s10, 256  ;;  %s506_s0 = int_to_ptr.vmem [resolvable:$true] %s505_s0 }
  0xf5   : > { %p5047_p11 = scmp.ne.s32.totalorder %s6738_s10, %s5046_s9  ;;  %p5053_p3 = scmp.lt.u32.totalorder %s5046_s9, %s6738_s10 }
  0xf7   : > { %p5049_p5 = pnand %p5047_p11, %p6810_p0 }
  0xf9   : > { %p5050_p1 = pneg %p5049_p5 }
  0xfb   : > { %p5055_p13 = pnand %p5053_p3, %p5050_p1 }
  0xfd   : > { %5058 = shalt.err (!%p5055_p13)
}
  0xfe   : > { %s5059_s23 = scalar_lea.vmem %s480_s28, 256  ;;  %p5067_p8 = scmp.lt.s32.totalorder %s480_s28, %s480_s28 }
  0xff   : > { %p5060_p2 = scmp.ne.s32.totalorder %s480_s28, %s5059_s23  ;;  %p5068_p9 = scmp.lt.s32.totalorder %s5059_s23, %s5059_s23 }
 0x101   : > { %p5062_p4 = pnand %p5060_p2, %p6810_p0  ;;  %p5069_p10 = por %p5068_p9, %p5067_p8 }
 0x103   : > { %p5063_p6 = pneg %p5062_p4 }
 0x105   : > { %p5070_p12 = pnand %p5069_p10, %p5063_p6 }
 0x107   : > { %5073 = shalt.err (!%p5070_p12)
}
 0x108   : > { %4710 = dma.hbm_to_vmem [thread:$0]  (!%p6811_p7), %s6738_s10, 256, %s480_s28, [#allocation18], %s6813_s24, %s6813_s24, %s6812_s1  }
 0x109   : > { %s5074_s5 = scalar_lea.hbm %s6740_s12, 256 }
 0x10a   : > { %p5075_p11 = scmp.ne.s32.totalorder %s6740_s12, %s5074_s5  ;;  %p5081_p1 = scmp.lt.u32.totalorder %s5074_s5, %s6740_s12 }
 0x10c   : > { %p5077_p12 = pnand %p5075_p11, %p6810_p0 }
 0x10e   : > { %p5078_p5 = pneg %p5077_p12 }
 0x110   : > { %p5083_p3 = pnand %p5081_p1, %p5078_p5 }
 0x112   : > { %5086 = shalt.err (!%p5083_p3)
}
 0x113   : > { %s5087_s30 = scalar_lea.vmem %s506_s0, 256  ;;  %p5095_p6 = scmp.lt.s32.totalorder %s506_s0, %s506_s0 }
 0x114   : > { %p5088_p13 = scmp.ne.s32.totalorder %s506_s0, %s5087_s30  ;;  %p5096_p8 = scmp.lt.s32.totalorder %s5087_s30, %s5087_s30 }
 0x116   : > { %p5090_p2 = pnand %p5088_p13, %p6810_p0  ;;  %p5097_p9 = por %p5096_p8, %p5095_p6 }
 0x118   : > { %p5091_p4 = pneg %p5090_p2 }
 0x11a   : > { %p5098_p10 = pnand %p5097_p9, %p5091_p4 }
 0x11c   : > { %5101 = shalt.err (!%p5098_p10)
}
 0x11d   : > { %4716 = dma.hbm_to_vmem [thread:$0]  (!%p6811_p7), %s6740_s12, 256, %s506_s0, [#allocation21], %s6813_s24, %s6813_s24, %s6812_s1  }
 0x11e   : > { %s6814_s15 = sshll.u32 %s5328_s29, 6  ;;  %s6815_s17 = sld [smem:[#allocation41_spill]] }
 0x11f   : > { %s6816_s5 = sshll.u32 %s5621_s22, 2  ;;  %s4192_s6 = sshll.u32 %s5621_s22, 5 }
 0x120   : > { %s523_s18 = scalar_lea.vmem [#allocation2], %s6816_s5  ;;  %s520_s7 = scalar_lea.sflag [#allocation3], %s5621_s22 }
 0x121   : > { %s530_s13 = sshll.u32 %s523_s18, 4  ;;  %p6817_p11 = scmp.ne.s32.totalorder %s6807_s11, 0  ;;  %s531_s13 = int_to_ptr.vmem [resolvable:$true] %s530_s13 }
 0x124   : > { %s5785_s9 = scalar_lea.hbm %s6815_s17, %s6814_s15  ;;  %s5107_s28 = scalar_lea.hbm %s6815_s17, 128 }
 0x125   : > { %s5102_s27 = scalar_lea.hbm %s5785_s9, 64  ;;  %p5108_p5 = scmp.lt.u32.totalorder %s5785_s9, %s6815_s17 }
 0x126   : > { %p5103_p0 = scmp.ne.s32.totalorder %s5785_s9, %s5102_s27  ;;  %p5109_p1 = scmp.lt.u32.totalorder %s5107_s28, %s5102_s27 }
 0x127   : > { %p5111_p13 = scmp.lt.u32.totalorder %s5102_s27, %s5785_s9 }
 0x128   : > { %p5105_p7 = pnand %p5103_p0, %p6817_p11  ;;  %p5110_p3 = por %p5109_p1, %p5108_p5 }
 0x12a   : > { %p5106_p12 = pneg %p5105_p7  ;;  %p5112_p2 = por %p5111_p13, %p5110_p3 }
 0x12c   : > { %p5113_p4 = pnand %p5112_p2, %p5106_p12 }
 0x12e   : > { %5116 = shalt.err (!%p5113_p4)
}
 0x12f   : > { %s5117_s3 = scalar_lea.vmem %s531_s13, 64  ;;  %s5345_s25 = smov [#allocation2]  }
 0x130   : > { %p5118_p6 = scmp.ne.s32.totalorder %s531_s13, %s5117_s3  ;;  %s5122_s5 = sshll.u32 %s5345_s25, 4  ;;  %s5123_s5 = int_to_ptr.vmem [resolvable:$false] %s5122_s5 }
 0x131   : > { %s5124_s18 = scalar_lea.vmem %s5123_s5, 128  ;;  %p5125_p10 = scmp.lt.s32.totalorder %s531_s13, %s5123_s5 }
 0x132   : > { %p5120_p8 = pnand %p5118_p6, %p6817_p11  ;;  %p5126_p0 = scmp.lt.s32.totalorder %s5124_s18, %s5117_s3 }
 0x134   : > { %p5121_p9 = pneg %p5120_p8  ;;  %p5127_p7 = por %p5126_p0, %p5125_p10 }
 0x136   : > { %p5128_p1 = pnand %p5127_p7, %p5121_p9 }
 0x138   : > { %5131 = shalt.err (!%p5128_p1)
}
 0x139   : > { %p6818_p5 = scmp.ne.s32.totalorder %s6805_s4, 0  ;;  %s4288_s27 = sshll.u32 %s5328_s29, 9 }
 0x13a   : > { %s560_s0 = scalar_lea.vmem [#allocation7], %s4192_s6  ;;  %s6819_s15 = sld [smem:[#allocation43_spill]] }
 0x13b   : > { %4720 = dma.hbm_to_vmem [thread:$0]  (!%p6818_p5), %s5785_s9, 64, %s531_s13, %s520_s7  }
 0x13c   : > { %s569_s30 = sshll.u32 %s560_s0, 4  ;;  %s5816_s30 = int_to_ptr.vmem [resolvable:$true] %s569_s30 }
 0x140   : > { %s5814_s25 = scalar_lea.hbm %s6819_s15, %s4288_s27  ;;  %s5137_s13 = scalar_lea.hbm %s6819_s15, 1024 }
 0x141   : > { %s5132_s3 = scalar_lea.hbm %s5814_s25, 512  ;;  %p5138_p2 = scmp.lt.u32.totalorder %s5814_s25, %s6819_s15 }
 0x142   : > { %p5133_p12 = scmp.ne.s32.totalorder %s5814_s25, %s5132_s3  ;;  %p5139_p4 = scmp.lt.u32.totalorder %s5137_s13, %s5132_s3 }
 0x143   : > { %p5141_p8 = scmp.lt.u32.totalorder %s5132_s3, %s5814_s25 }
 0x144   : > { %p5135_p3 = pnand %p5133_p12, %p6817_p11  ;;  %p5140_p6 = por %p5139_p4, %p5138_p2 }
 0x146   : > { %p5136_p13 = pneg %p5135_p3  ;;  %p5142_p9 = por %p5141_p8, %p5140_p6 }
 0x148   : > { %p5143_p10 = pnand %p5142_p9, %p5136_p13 }
 0x14a   : > { %5146 = shalt.err (!%p5143_p10)
}
 0x14b   : > { %s5147_s5 = scalar_lea.vmem %s5816_s30, 512  ;;  %s5346_s18 = smov [#allocation7]  }
 0x14c   : > { %p5148_p0 = scmp.ne.s32.totalorder %s5816_s30, %s5147_s5  ;;  %s5152_s27 = sshll.u32 %s5346_s18, 4  ;;  %s5153_s27 = int_to_ptr.vmem [resolvable:$false] %s5152_s27 }
 0x14d   : > { %s5154_s0 = scalar_lea.vmem %s5153_s27, 1024  ;;  %p5155_p12 = scmp.lt.s32.totalorder %s5816_s30, %s5153_s27 }
 0x14e   : > { %p5150_p7 = pnand %p5148_p0, %p6817_p11  ;;  %p5156_p3 = scmp.lt.s32.totalorder %s5154_s0, %s5147_s5 }
 0x150   : > { %p5151_p1 = pneg %p5150_p7  ;;  %p5157_p2 = por %p5156_p3, %p5155_p12 }
 0x152   : > { %p5158_p4 = pnand %p5157_p2, %p5151_p1 }
 0x154   : > { %5161 = shalt.err (!%p5158_p4)
}
 0x155   : > { %s6820_s28 = scalar_lea.sflag [#allocation6], %s5632_s2  ;;  %s6821_s9 = sld [smem:[#allocation45_spill]] }
 0x156   : > { %4726 = dma.hbm_to_vmem [thread:$0]  (!%p6818_p5), %s5814_s25, 512, %s5816_s30, %s6820_s28, %s6813_s24, %s6813_s24, %s6812_s1  }
 0x157   : > { %s602_s13 = scalar_lea.vmem [#allocation10], %s5676_s20 }
 0x158   : > { %s610_s6 = sshll.u32 %s602_s13, 4  ;;  %s611_s6 = int_to_ptr.vmem [resolvable:$true] %s610_s6 }
 0x15b   : > { %s5848_s22 = scalar_lea.hbm %s6821_s9, %s5679_s16  ;;  %s5167_s1 = scalar_lea.hbm %s6821_s9, 256 }
 0x15c   : > { %s5162_s7 = scalar_lea.hbm %s5848_s22, 128  ;;  %p5168_p9 = scmp.lt.u32.totalorder %s5848_s22, %s6821_s9 }
 0x15d   : > { %p5163_p13 = scmp.ne.s32.totalorder %s5848_s22, %s5162_s7  ;;  %p5169_p10 = scmp.lt.u32.totalorder %s5167_s1, %s5162_s7 }
 0x15e   : > { %p5171_p7 = scmp.lt.u32.totalorder %s5162_s7, %s5848_s22 }
 0x15f   : > { %p5165_p6 = pnand %p5163_p13, %p6817_p11  ;;  %p5170_p0 = por %p5169_p10, %p5168_p9 }
 0x161   : > { %p5166_p8 = pneg %p5165_p6  ;;  %p5172_p1 = por %p5171_p7, %p5170_p0 }
 0x163   : > { %p5173_p12 = pnand %p5172_p1, %p5166_p8 }
 0x165   : > { %5176 = shalt.err (!%p5173_p12)
}
 0x166   : > { %s5177_s25 = scalar_lea.vmem %s611_s6, 128  ;;  %s5347_s27 = smov [#allocation10]  }
 0x167   : > { %p5178_p3 = scmp.ne.s32.totalorder %s611_s6, %s5177_s25  ;;  %s5182_s0 = sshll.u32 %s5347_s27, 4  ;;  %s5183_s0 = int_to_ptr.vmem [resolvable:$false] %s5182_s0 }
 0x168   : > { %s5184_s28 = scalar_lea.vmem %s5183_s0, 256  ;;  %p5185_p13 = scmp.lt.s32.totalorder %s611_s6, %s5183_s0 }
 0x169   : > { %p5180_p2 = pnand %p5178_p3, %p6817_p11  ;;  %p5186_p6 = scmp.lt.s32.totalorder %s5184_s28, %s5177_s25 }
 0x16b   : > { %p5181_p4 = pneg %p5180_p2  ;;  %p5187_p5 = por %p5186_p6, %p5185_p13 }
 0x16d   : > { %p5188_p9 = pnand %p5187_p5, %p5181_p4 }
 0x16f   : > { %5191 = shalt.err (!%p5188_p9)
}
 0x170   : > { %p6822_p10 = scmp.ne.s32.totalorder %s6805_s4, 0  ;;  %s6823_s23 = scalar_lea.sflag [#allocation9], %s5632_s2 }
 0x171   : > { %s6824_s7 = sld [smem:[#allocation46_spill]]  ;;  %s621_s18 = scalar_lea.vmem [#allocation11], %s5676_s20 }
 0x172   : > { %4732 = dma.hbm_to_vmem [thread:$0]  (!%p6822_p10), %s5848_s22, 128, %s611_s6, %s6823_s23  }
 0x173   : > { %s629_s1 = sshll.u32 %s621_s18, 4  ;;  %s618_s24 = scalar_lea.sflag [#allocation12], %s5632_s2  ;;  %s630_s1 = int_to_ptr.vmem [resolvable:$true] %s629_s1 }
 0x177   : > { %s5874_s5 = scalar_lea.hbm %s6824_s7, %s5679_s16  ;;  %s5197_s6 = scalar_lea.hbm %s6824_s7, 256 }
 0x178   : > { %s5192_s30 = scalar_lea.hbm %s5874_s5, 128  ;;  %p5198_p7 = scmp.lt.u32.totalorder %s5874_s5, %s6824_s7 }
 0x179   : > { %p5193_p5 = scmp.ne.s32.totalorder %s5874_s5, %s5192_s30  ;;  %p5199_p1 = scmp.lt.u32.totalorder %s5197_s6, %s5192_s30 }
 0x17a   : > { %p5201_p3 = scmp.lt.u32.totalorder %s5192_s30, %s5874_s5 }
 0x17b   : > { %p5195_p8 = pnand %p5193_p5, %p6817_p11  ;;  %p5200_p12 = por %p5199_p1, %p5198_p7 }
 0x17d   : > { %p5196_p0 = pneg %p5195_p8  ;;  %p5202_p2 = por %p5201_p3, %p5200_p12 }
 0x17f   : > { %p5203_p4 = pnand %p5202_p2, %p5196_p0 }
 0x181   : > { %5206 = shalt.err (!%p5203_p4)
}
 0x182   : > { %s5207_s2 = scalar_lea.vmem %s630_s1, 128  ;;  %s5348_s20 = smov [#allocation11]  }
 0x183   : > { %p5208_p13 = scmp.ne.s32.totalorder %s630_s1, %s5207_s2  ;;  %s5212_s0 = sshll.u32 %s5348_s20, 4  ;;  %s5213_s0 = int_to_ptr.vmem [resolvable:$false] %s5212_s0 }
 0x184   : > { %s5214_s28 = scalar_lea.vmem %s5213_s0, 256  ;;  %p5215_p5 = scmp.lt.s32.totalorder %s630_s1, %s5213_s0 }
 0x185   : > { %p5210_p6 = pnand %p5208_p13, %p6817_p11  ;;  %p5216_p8 = scmp.lt.s32.totalorder %s5214_s28, %s5207_s2 }
 0x187   : > { %p5211_p9 = pneg %p5210_p6  ;;  %p5217_p10 = por %p5216_p8, %p5215_p5 }
 0x189   : > { %p5218_p1 = pnand %p5217_p10, %p5211_p9 }
 0x18b   : > { %5221 = shalt.err (!%p5218_p1)
}
 0x18c   : > { %p6825_p7 = scmp.ne.s32.totalorder %s6805_s4, 0  ;;  %s6826_s23 = sld [smem:[#allocation37_spill]] }
 0x18e   : > { %4735 = dma.hbm_to_vmem [thread:$0]  (!%p6825_p7), %s5874_s5, 128, %s630_s1, %s618_s24  }
 0x192   : > { %p6827_p0 = scmp.ne.s32.totalorder %s6826_s23, 0 }
 0x193   : > { %s5898_s11 = sand.u32 (!%p6827_p0), 1, %s5316_s26   ;;  %p6828_p11 = scmp.ne.s32.totalorder (!%p6827_p0), %s6800_s19, 0 }
 0x194   : > { %638 = sbr.rel (%p6827_p0) target bundleno = 2054 (0x806), region = 72  ;;  %s5901_s3 = sshll.u32 (!%p6827_p0), %s5898_s11, 2 }
 0x195   : > { %s641_s13 = scalar_lea.sflag (!%p6827_p0), [#allocation3], %s5898_s11  ;;  %s644_s18 = scalar_lea.vmem (!%p6827_p0), [#allocation2], %s5901_s3 }
 0x19b   : > { %5275 = dma.done.wait (%p6828_p11), %s641_s13, 64  }
 0x19c   : > { %5277 = vsyncadd (%p6828_p11), %s641_s13, 4294967232  ;;  %s649_s4 = sand.u32 1, %s5460_s14   ;;  %s653_s1 = scalar_lea.vmem [#allocation5], %s5901_s3 }
 0x19d   : > { %s650_s5 = scalar_lea.sflag [#allocation6], %s649_s4 }
 0x19e   : > { %5279 = dma.done.wait (%p6828_p11), %s650_s5, 576  }
 0x19f   : > { %5281 = vsyncadd (%p6828_p11), %s650_s5, 4294966720  ;;  %s4204_s24 = sshll.u32 %s5898_s11, 5  ;;  %s5917_s30 = sshll.u32 %s5898_s11, 3 }
 0x1a0   : > { %s5919_s25 = scalar_lea.vmem [#allocation7], %s4204_s24  ;;  %s668_s22 = scalar_lea.sflag [#allocation9], %s649_s4 }
 0x1a1   : > { %s671_s6 = scalar_lea.vmem [#allocation8], %s5917_s30 }
 0x1a2   : > { %5283 = dma.done.wait (%p6828_p11), %s668_s22, 256  }
 0x1a3   : > { %5285 = vsyncadd (%p6828_p11), %s668_s22, 4294967040  ;;  %s680_s27 = scalar_lea.vmem [#allocation10], %s5917_s30  ;;  %s686_s16 = scalar_lea.sflag [#allocation12], %s649_s4 }
 0x1a4   : > { %s689_s2 = scalar_lea.vmem [#allocation11], %s5917_s30 }
 0x1a5   : > { %5287 = dma.done.wait (%p6828_p11), %s686_s16, 128  }
 0x1a6   : > { %5289 = vsyncadd (%p6828_p11), %s686_s16, 4294967168  ;;  %p6829_p10 = scmp.eq.s32.totalorder %s5460_s14, 0 }
 0x1a8   : > { %5291 = dma.done.wait (%p6829_p10), [#allocation12], 512   ;;  %p6830_p12 = pmov %p6829_p10 }
 0x1a9   : > { %p6831_p3 = pmov %p6829_p10 }
 0x1aa   : > { %5293 = vsyncadd (%p6830_p12), [#allocation12], 4294966784 }
 0x1ab   : > { %5295 = dma.done.wait (%p6831_p3), [#allocation15], 768   ;;  %p6832_p2 = pmov %p6831_p3 }
 0x1ad   : > { %5297 = vsyncadd (%p6832_p2), [#allocation15], 4294966528  ;;  %p6833_p4 = pmov %p6832_p2 }
 0x1ae   : > { %p6834_p13 = pmov %p6832_p2 }
 0x1af   : > { %5299 = dma.done.wait (%p6833_p4), [#allocation18], 512  }
 0x1b0   : > { %5301 = vsyncadd (%p6834_p13), [#allocation18], 4294966784  ;;  %p6835_p6 = pmov %p6832_p2 }
 0x1b1   : > { %p6836_p9 = pmov %p6832_p2 }
 0x1b2   : > { %5303 = dma.done.wait (%p6835_p6), [#allocation21], 512  }
 0x1b3   : > { %5305 = vsyncadd (%p6836_p9), [#allocation21], 4294966784  ;;  %v5349_v0 = vmov 0.0   ;;  %vm5350_vm0 = vmmov 0   ;;  %v4822_v1 = vld [vmem:[#allocation16] sm:$0xff]   ;;  %v4823_v2 = vld [vmem:[#allocation16 + $0x8] sm:$0xff]   ;;  %v1261_v17 = vlaneseq }
 0x1b4   : > { %4373 = vmatprep.subr.bf16.mxu0 %v5349_v0  ;;  %4377 = vmatprep.mubr.msk.bf16.mxu0 %vm5350_vm0, %v5349_v0  ;;  %v790_v3 = vld [vmem:[%s653_s1] sm:$0xf]  ;;  %vm807_vm1 = vcmask 261120   ;;  %v4824_v4 = vld [vmem:[#allocation19] sm:$0xff]   ;;  %vm1059_vm2 = vcmask 1043456   ;;  %v4826_v9 = vld [vmem:[#allocation17] sm:$0xff]  }
 0x1b5   : > { %4381 = vmatprep.subr.bf16.mxu1 %v5349_v0  ;;  %4385 = vmatprep.mubr.msk.bf16.mxu1 %vm5350_vm0, %v5349_v0  ;;  %v4825_v5 = vld [vmem:[#allocation19 + $0x8] sm:$0xff]   ;;  %v789_v6 = vld [vmem:[%s644_s18] sm:$0xf]  ;;  %v4827_v10 = vld [vmem:[#allocation17 + $0x8] sm:$0xff]   ;;  %v5351_v15 = vmov 1966171168  }
 0x1b6   : > { %4374 = vmatpush3.bf16.msra.mxu0 %v4822_v1  ;;  %v1054_v7 = vld [vmem:[#allocation22] sm:$0xf]  ;;  %4382 = vmatpush3.bf16.msra.mxu1 %v4826_v9  ;;  %v4828_v11 = vld [vmem:[#allocation20] sm:$0xff]   ;;  %v4829_v12 = vld [vmem:[#allocation20 + $0x8] sm:$0xff]   ;;  %v1259_v16 = vunpack.c.l.s4 %v5351_v15  ;;  %v1262_v19 = vshrl.u32 %v1261_v17, 7  ;;  %vm1055_vm3 = vcmask 64512  }
 0x1b7   : > { %4375 = vmatprep.subr.bf16.mxu0 %v5349_v0  ;;  %v1061_v8 = vsel %vm1059_vm2, %v1054_v7, 0  ;;  %4383 = vmatprep.subr.bf16.mxu1 %v5349_v0  ;;  %v1105_v13 = vld [vmem:[#allocation22 + $0x4] sm:$0xf]  ;;  %v1157_v21 = vld [vmem:[#allocation22 + $0x8] sm:$0xf]  ;;  %s5352_s14 = smov 104  }
 0x1b8   : > { %v1113_v14 = vsel %vm1059_vm2, %v1105_v13, 0  ;;  %v1260_v18 = vunpack.c.0.s8 %v1259_v16  ;;  %v1164_v26 = vsel %vm1059_vm2, %v1157_v21, 0  ;;  %s5353_s19 = smov 120   ;;  %v5996_v30 = vsub.s32 0, %v1262_v19  ;;  %s5354_s20 = smov 112  }
 0x1b9   : > { %v1208_v59 = vld [vmem:[#allocation22 + $0xc] sm:$0xf]  ;;  %v1030_v62 = vld [vmem:[#allocation13] sm:$0xf]  ;;  %vm1402_vm4 = vcmask 1040384   ;;  %vm1446_vm6 = vcmask 1041408  }
 0x1ba   : > { %4376 = vmatpush3.bf16.msra.mxu0 %v4823_v2  ;;  %4384 = vmatpush3.bf16.msra.mxu1 %v4827_v10  ;;  %v5982_v20 = vsub.s32 %v1260_v18, %v1262_v19  ;;  %v1215_v60 = vsel %vm1059_vm2, %v1208_v59, 0  ;;  %v1825_v63 = vsel %vm1055_vm3, %v1030_v62, 0  ;;  %vm1403_vm5 = vsmask.f32 256  ;;  %v1033_v18 = vld [vmem:[#allocation13 + $0xc] sm:$0xf] }
 0x1bb   : > { %4389 = vmatprep.subr.bf16.mxu0 %v5349_v0  ;;  %4397 = vmatprep.subr.bf16.mxu1 %v5349_v0  ;;  %vm1447_vm7 = vsmask.f32 1280  ;;  %vm6106_vm8 = vmand %vm1402_vm4, %vm1403_vm5  ;;  %vm2567_vm10 = vcmask 1041409   ;;  %vm2570_vm11 = vcmask 1042434   ;;  %vm2573_vm12 = vcmask 1043459   ;;  %s5355_s0 = smov 8  }
 0x1bc   : > { %vm6114_vm9 = vmand %vm1446_vm6, %vm1447_vm7  ;;  %vm2576_vm13 = vcmask 1044484   ;;  %vm2579_vm14 = vcmask 1045509   ;;  %vm2582_vm15 = vcmask 1046534   ;;  %vm3246_vm5 = vcmask 1042432   ;;  %s6841_s28 = sld [smem:[#allocation35_spill]]  ;;  %s5356_s23 = smov 16  }
 0x1bd   : > { %4378 = vmatmul.mubr.msk.bf16.vlgmr.msra.gmra.mrb[0].mxu0 %vm807_vm1, %v790_v3  ;;  %4386 = vmatmul.mubr.msk.bf16.vlgmr.msra.gmra.mrb[0].mxu1 %vm807_vm1, %v789_v6  ;;  %v1031_v3 = vld [vmem:[#allocation13 + $0x4] sm:$0xf]  ;;  %s5357_s13 = smov 24   ;;  %s784_s4 = scalar_lea.vmem [#allocation23], %s5901_s3 }
 0x1be   : > { %4390 = vmatpush3.bf16.msra.mxu0 %v4824_v4  ;;  %4393 = vmatprep.mubr.msk.bf16.mxu0 %vm5350_vm0, %v5349_v0  ;;  %s3912_s5 = sshll.u32 %s784_s4, 4  ;;  %s6842_s30 = sld [smem:[#allocation51_spill]]  ;;  %s6681_s5 = int_to_ptr.vmem [resolvable:$true] %s3912_s5 }
 0x1bf   : > { %4391 = vmatprep.subr.bf16.mxu0 %v5349_v0  ;;  %4401 = vmatprep.mubr.msk.bf16.mxu1 %vm5350_vm0, %v5349_v0  ;;  %p6844_p8 = scmp.ne.s32.totalorder %s6801_s21, 0  ;;  %s5358_s3 = smov [#allocation23]  }
 0x1c0   : > { %4398 = vmatpush3.bf16.msra.mxu1 %v4828_v11  ;;  %s5226_s16 = sshll.u32 %s5358_s3, 4  ;;  %s5227_s16 = int_to_ptr.vmem [resolvable:$false] %s5226_s16 }
 0x1c1   : > { %4399 = vmatprep.subr.bf16.mxu1 %v5349_v0  ;;  %p5229_p0 = scmp.lt.s32.totalorder %s6681_s5, %s5227_s16 }
 0x1c2   : > { %4392 = vmatpush3.bf16.msra.mxu0 %v4825_v5  ;;  %v1871_v5 = vsel %vm1055_vm3, %v1031_v3, 0  ;;  %v1037_v3 = vld [vmem:[#allocation13 + $0x1c] sm:$0xf]  ;;  %s4285_s18 = sshll.u32 %s6841_s28, 6 }
 0x1c3   : > { %4405 = vmatprep.subr.bf16.mxu0 %v5349_v0 }
 0x1c4   : > { %4400 = vmatpush3.bf16.msra.mxu1 %v4829_v12  ;;  %v1028_v12 = vld [vmem:[%s5919_s25 + $0x18] sm:$0xf]  ;;  %s6843_s22 = smov %s6842_s30 }
 0x1c5   : > { %4394 = vmatmul.mubr.msk.bf16.vlgmr.msra.gmra.mrb[4].mxu0 %vm807_vm1, %v789_v6  ;;  %4411 = vmatprep.subr.bf16.mxu1 %v5349_v0 }
 0x1c6   : > { %4407 = vmatprep.mubr.msk.bf16.mxu0 %vm5350_vm0, %v5349_v0  ;;  %4406 = vmatpush3.bf16.msra.mxu0 %v1061_v8 }
 0x1c7   : > { %4417 = vmatprep.subr.bf16.mxu0 %v5349_v0  ;;  %4402 = vmatmul.mubr.msk.bf16.vlgmr.msra.gmra.mrb[4].mxu1 %vm807_vm1, %v789_v6 }
 0x1c8   : > { %4412 = vmatpush3.bf16.msra.mxu1 %v1113_v14  ;;  %4413 = vmatprep.mubr.msk.bf16.mxu1 %vm5350_vm0, %v5349_v0  ;;  %v1032_v14 = vld [vmem:[#allocation13 + $0x8] sm:$0xf] }
 0x1c9   : > { %4423 = vmatprep.subr.bf16.mxu1 %v5349_v0 }
 0x290   : > { %v845_v22 = vpop.f32.mrb[0].mxu0  ;;  %v904_v6 = vpop.f32.mrb[0].mxu1 }
 0x291   : > { %v5984_v23 = vpack.c.bf16 %v845_v22, %v845_v22  ;;  %v4379_v24 = vpop.f32.mrb[1].mxu0  ;;  %v6099_v7 = vpack.c.bf16 %v904_v6, %v904_v6  ;;  %v4387_v8 = vpop.f32.mrb[1].mxu1  ;;  %v1917_v22 = vsel %vm1055_vm3, %v1032_v14, 0 }
 0x292   : > { %v848_v25 = vpop.f32.mrb[2].mxu0  ;;  %v907_v10 = vpop.f32.mrb[2].mxu1 }
 0x293   : > { %1209 = vrot.lane.b32.xlu1 %v5984_v23, %s5352_s14  ;;  %1107 = vrot.lane.b32.xlu0 %v5984_v23, %s5353_s19  ;;  %v4380_v27 = vpop.f32.mrb[3].mxu0  ;;  %v1264_v28 = vrot.slane %v5984_v23, %v5982_v20  ;;  %v4388_v11 = vpop.f32.mrb[3].mxu1 }
 0x294   : > { %4408 = vmatmul.mubr.msk.bf16.vlgmr.msra.gmra.mrb[8].mxu0 %vm1055_vm3, %v5984_v23 }
 0x295   : > { %v1272_v29 = vrot.slane %v1264_v28, %v5982_v20  ;;  %4418 = vmatpush3.bf16.msra.mxu0 %v1164_v26  ;;  %4419 = vmatprep.mubr.msk.bf16.mxu0 %vm5350_vm0, %v5349_v0  ;;  %v1265_v33 = vcombine.high %v1264_v28, %v1264_v28  ;;  %v1963_v28 = vsel %vm1055_vm3, %v1033_v18, 0 }
 0x296   : > { %4429 = vmatprep.subr.bf16.mxu0 %v5349_v0 }
 0x297   : > { %1158 = vrot.lane.b32.xlu0 %v5984_v23, %s5354_s20  ;;  %v4232_v31 = vpack.i.b16 %v1272_v29, %v1272_v29  ;;  %v1283_v32 = vunpack.i.h.s16 %v1272_v29  ;;  %v1279_v37 = vrot.slane %v1265_v33, %v5982_v20  ;;  %v1280_v43 = vcombine.high %v1272_v29, %v1272_v29 }
 0x298   : > { %v6061_v54 = vpop.f32.mrb[4].mxu0 }
 0x299   : > { %v6004_v34 = vrot.slane %v4232_v31, %v5996_v30  ;;  %v1291_v35 = vpack.i.b16 %v1283_v32, %v1283_v32  ;;  %v1285_v38 = vunpack.i.h.s16 %v1279_v37  ;;  %v4233_v39 = vpack.i.b16 %v1279_v37, %v1279_v37  ;;  %v4395_v55 = vpop.f32.mrb[5].mxu0 }
 0x29a   : > { %v1287_v44 = vunpack.i.h.s16 %v1280_v43  ;;  %v4234_v45 = vpack.i.b16 %v1280_v43, %v1280_v43  ;;  %v1281_v49 = vcombine.high %v1279_v37, %v1279_v37  ;;  %v963_v57 = vpop.f32.mrb[6].mxu0  ;;  %v1035_v37 = vld [vmem:[#allocation13 + $0x14] sm:$0xf] }
 0x29b   : > { %1338 = vrot.lane.b32.xlu1 %v6004_v34, %s5353_s19  ;;  %v6009_v36 = vrot.slane %v1291_v35, %v5996_v30  ;;  %v1293_v40 = vpack.i.b16 %v1285_v38, %v1285_v38  ;;  %v6023_v41 = vrot.slane %v4233_v39, %v5996_v30  ;;  %v4396_v58 = vpop.f32.mrb[7].mxu0 }
 0x29c   : > { %v1295_v46 = vpack.i.b16 %v1287_v44, %v1287_v44  ;;  %v6041_v47 = vrot.slane %v4234_v45, %v5996_v30  ;;  %v1289_v50 = vunpack.i.h.s16 %v1281_v49  ;;  %v4235_v51 = vpack.i.b16 %v1281_v49, %v1281_v49 }
 0x29d   : > { %1340 = vrot.lane.b32.xlu0 %v6009_v36, %s5353_s19  ;;  %v6028_v42 = vrot.slane %v1293_v40, %v5996_v30 }
 0x29e   : > { %v6046_v48 = vrot.slane %v1295_v46, %v5996_v30  ;;  %v1297_v52 = vpack.i.b16 %v1289_v50, %v1289_v50  ;;  %v6059_v53 = vrot.slane %v4235_v51, %v5996_v30 }
 0x29f   : > { %1362 = vrot.lane.b32.xlu1 %v6004_v34, %s5354_s20 }
 0x2a0   : > { %v6066_v56 = vrot.slane %v1297_v52, %v5996_v30 }
 0x2a1   : > { %1364 = vrot.lane.b32.xlu0 %v6009_v36, %s5354_s20 }
 0x2a3   : > { %1378 = vrot.lane.b32.xlu1 %v6004_v34, %s5352_s14 }
 0x2a5   : > { %1380 = vrot.lane.b32.xlu0 %v6009_v36, %s5352_s14 }
 0x2a7   : > { %1342 = vrot.lane.b32.xlu1 %v6023_v41, %s5353_s19 }
 0x2a9   : > { %1344 = vrot.lane.b32.xlu0 %v6028_v42, %s5353_s19 }
 0x2ab   : > { %1366 = vrot.lane.b32.xlu1 %v6023_v41, %s5354_s20 }
 0x2ad   : > { %1368 = vrot.lane.b32.xlu0 %v6028_v42, %s5354_s20 }
 0x2af   : > { %1382 = vrot.lane.b32.xlu1 %v6023_v41, %s5352_s14 }
 0x2b1   : > { %1384 = vrot.lane.b32.xlu0 %v6028_v42, %s5352_s14 }
 0x2b3   : > { %1346 = vrot.lane.b32.xlu1 %v6041_v47, %s5353_s19 }
 0x2b5   : > { %1348 = vrot.lane.b32.xlu0 %v6046_v48, %s5353_s19 }
 0x2b7   : > { %1370 = vrot.lane.b32.xlu1 %v6041_v47, %s5354_s20 }
 0x2b9   : > { %1372 = vrot.lane.b32.xlu0 %v6046_v48, %s5354_s20 }
 0x2bb   : > { %1386 = vrot.lane.b32.xlu1 %v6041_v47, %s5352_s14 }
 0x2bd   : > { %1388 = vrot.lane.b32.xlu0 %v6046_v48, %s5352_s14 }
 0x2bf   : > { %1350 = vrot.lane.b32.xlu1 %v6059_v53, %s5353_s19 }
 0x2c1   : > { %1352 = vrot.lane.b32.xlu0 %v6066_v56, %s5353_s19 }
 0x2c3   : > { %1374 = vrot.lane.b32.xlu1 %v6059_v53, %s5354_s20 }
 0x2c5   : > { %1376 = vrot.lane.b32.xlu0 %v6066_v56, %s5354_s20 }
 0x2c7   : > { %1390 = vrot.lane.b32.xlu1 %v6059_v53, %s5352_s14 }
 0x2c9   : > { %1392 = vrot.lane.b32.xlu0 %v6066_v56, %s5352_s14 }
 0x2cb   : > { %2655 = vrot.lane.b32.xlu1 %v6099_v7, %s5353_s19 }
 0x2cd   : > { %2737 = vrot.lane.b32.xlu0 %v6099_v7, %s5354_s20 }
 0x2cf   : > { %2819 = vrot.lane.b32.xlu1 %v6099_v7, %s5352_s14 }
 0x305   : > { %v6079_v61 = vpop.permute.xlu0 %1107  ;;  %v6087_v1 = vpop.permute.xlu1 %1209 }
 0x306   : > { %4414 = vmatmul.mubr.msk.bf16.vlgmr.msra.gmra.mrb[8].mxu1 %vm1055_vm3, %v6079_v61 }
 0x307   : > { %4424 = vmatpush3.bf16.msra.mxu1 %v1215_v60  ;;  %4425 = vmatprep.mubr.msk.bf16.mxu1 %vm5350_vm0, %v5349_v0  ;;  %v1036_v60 = vld [vmem:[#allocation13 + $0x18] sm:$0xf] }
 0x308   : > { %4435 = vmatprep.subr.bf16.mxu1 %v5349_v0 }
 0x309   : > { %v6089_v2 = vpop.permute.xlu0 %1158 }
 0x30a   : > { %4420 = vmatmul.mubr.msk.bf16.vlgmr.msra.gmra.mrb[12].mxu0 %vm1055_vm3, %v6089_v2 }
 0x30b   : > { %4430 = vmatpush3.bf16.xpose.msra.mxu0 %v1825_v63  ;;  %4431 = vmatprep.mubr.msk.bf16.mxu0 %vm5350_vm0, %v5349_v0 }
 0x30c   : > { %4441 = vmatprep.subr.bf16.mxu0 %v5349_v0 }
 0x30d   : > { %v1339_v4 = vpop.permute.xlu1 %1338 }
 0x30e   : > { %4426 = vmatmul.mubr.msk.bf16.vlgmr.msra.gmra.mrb[12].mxu1 %vm1055_vm3, %v6087_v1  ;;  %v1405_v17 = vsel %vm6106_vm8, %v6004_v34, %v1339_v4  ;;  %v1034_v34 = vld [vmem:[#allocation13 + $0x10] sm:$0xf] }
 0x30f   : > { %v1341_v9 = vpop.permute.xlu0 %1340  ;;  %4437 = vmatprep.mubr.msk.bf16.mxu1 %vm5350_vm0, %v5349_v0  ;;  %v2009_v40 = vsel %vm1055_vm3, %v1034_v34, 0 }
 0x310   : > { %4436 = vmatpush3.bf16.xpose.msra.mxu1 %v1871_v5  ;;  %v1406_v24 = vsel %vm6106_vm8, %v6009_v36, %v1341_v9 }
 0x311   : > { %v1363_v13 = vpop.permute.xlu1 %1362  ;;  %4447 = vmatprep.subr.bf16.mxu1 %v5349_v0 }
 0x312   : > { %v1416_v19 = vsel %vm1402_vm4, %v1405_v17, %v1363_v13 }
 0x313   : > { %v1365_v15 = vpop.permute.xlu0 %1364 }
 0x314   : > { %v1420_v26 = vsel %vm1402_vm4, %v1406_v24, %v1365_v15 }
 0x315   : > { %v1379_v21 = vpop.permute.xlu1 %1378 }
 0x316   : > { %v1449_v25 = vsel %vm6114_vm9, %v1416_v19, %v1379_v21 }
 0x317   : > { %v1381_v27 = vpop.permute.xlu0 %1380  ;;  %4432 = vmatmul.mubr.msk.bf16.vlgmr.msra.gmra.mrb[16].mxu0 %vm1055_vm3, %v1449_v25 }
 0x318   : > { %v1450_v29 = vsel %vm6114_vm9, %v1420_v26, %v1381_v27  ;;  %4442 = vmatpush3.bf16.xpose.msra.mxu0 %v1917_v22  ;;  %4443 = vmatprep.mubr.msk.bf16.mxu0 %vm5350_vm0, %v5349_v0 }
 0x319   : > { %v1343_v31 = vpop.permute.xlu1 %1342  ;;  %4438 = vmatmul.mubr.msk.bf16.vlgmr.msra.gmra.mrb[16].mxu1 %vm1055_vm3, %v1450_v29  ;;  %4453 = vmatprep.subr.bf16.mxu0 %v5349_v0  ;;  %v1022_v29 = vld [vmem:[%s5919_s25] sm:$0xf] }
 0x31a   : > { %4448 = vmatpush3.bf16.xpose.msra.mxu1 %v1963_v28  ;;  %4449 = vmatprep.mubr.msk.bf16.mxu1 %vm5350_vm0, %v5349_v0  ;;  %v1407_v36 = vsel %vm6106_vm8, %v6023_v41, %v1343_v31  ;;  %v2055_v41 = vsel %vm1055_vm3, %v1035_v37, 0  ;;  %v2193_v31 = vsel %vm807_vm1, %v1022_v29, 0 }
 0x31b   : > { %v1345_v32 = vpop.permute.xlu0 %1344  ;;  %4459 = vmatprep.subr.bf16.mxu1 %v5349_v0 }
 0x31c   : > { %v1408_v43 = vsel %vm6106_vm8, %v6028_v42, %v1345_v32  ;;  %v1016_v42 = vpop.f32.mrb[4].mxu1  ;;  %v1023_v32 = vld [vmem:[%s5919_s25 + $0x4] sm:$0xf] }
 0x31d   : > { %v1367_v33 = vpop.permute.xlu1 %1366  ;;  %v6164_v51 = vpack.c.bf16 %v1016_v42, %v6061_v54  ;;  %v4403_v52 = vpop.f32.mrb[5].mxu1  ;;  %v2101_v54 = vsel %vm1055_vm3, %v1036_v60, 0 }
 0x31e   : > { %v1424_v38 = vsel %vm1402_vm4, %v1407_v36, %v1367_v33  ;;  %v1019_v57 = vpop.f32.mrb[6].mxu1  ;;  %v2239_v33 = vsel %vm807_vm1, %v1023_v32, 0 }
 0x31f   : > { %v1369_v35 = vpop.permute.xlu0 %1368  ;;  %v4404_v58 = vpop.f32.mrb[7].mxu1 }
 0x320   : > { %v1428_v45 = vsel %vm1402_vm4, %v1408_v43, %v1369_v35 }
 0x321   : > { %v1383_v39 = vpop.permute.xlu1 %1382 }
 0x322   : > { %v1451_v44 = vsel %vm6114_vm9, %v1424_v38, %v1383_v39 }
 0x323   : > { %v1385_v46 = vpop.permute.xlu0 %1384  ;;  %4444 = vmatmul.mubr.msk.bf16.vlgmr.msra.gmra.mrb[20].mxu0 %vm1055_vm3, %v1451_v44 }
 0x324   : > { %v1452_v49 = vsel %vm6114_vm9, %v1428_v45, %v1385_v46  ;;  %4454 = vmatpush3.bf16.xpose.msra.mxu0 %v2009_v40  ;;  %4455 = vmatprep.mubr.msk.bf16.mxu0 %vm5350_vm0, %v5349_v0 }
 0x325   : > { %v1347_v50 = vpop.permute.xlu1 %1346  ;;  %4450 = vmatmul.mubr.msk.bf16.vlgmr.msra.gmra.mrb[20].mxu1 %vm1055_vm3, %v1452_v49  ;;  %4465 = vmatprep.subr.bf16.mxu0 %v5349_v0 }
 0x326   : > { %4460 = vmatpush3.bf16.xpose.msra.mxu1 %v2055_v41  ;;  %4461 = vmatprep.mubr.msk.bf16.mxu1 %vm5350_vm0, %v5349_v0  ;;  %v1409_v63 = vsel %vm6106_vm8, %v6041_v47, %v1347_v50  ;;  %v2147_v47 = vsel %vm1055_vm3, %v1037_v3, 0  ;;  %v1024_v3 = vld [vmem:[%s5919_s25 + $0x8] sm:$0xf] }
 0x327   : > { %v1349_v55 = vpop.permute.xlu0 %1348  ;;  %4471 = vmatprep.subr.bf16.mxu1 %v5349_v0 }
 0x328   : > { %v1410_v6 = vsel %vm6106_vm8, %v6046_v48, %v1349_v55 }
 0x329   : > { %v1371_v59 = vpop.permute.xlu1 %1370 }
 0x32a   : > { %v1432_v4 = vsel %vm1402_vm4, %v1409_v63, %v1371_v59 }
 0x32b   : > { %v1373_v62 = vpop.permute.xlu0 %1372 }
 0x32c   : > { %v1436_v9 = vsel %vm1402_vm4, %v1410_v6, %v1373_v62 }
 0x32d   : > { %v1387_v5 = vpop.permute.xlu1 %1386 }
 0x32e   : > { %v1453_v8 = vsel %vm6114_vm9, %v1432_v4, %v1387_v5 }
 0x32f   : > { %v1389_v10 = vpop.permute.xlu0 %1388  ;;  %4456 = vmatmul.mubr.msk.bf16.vlgmr.msra.gmra.mrb[24].mxu0 %vm1055_vm3, %v1453_v8 }
 0x330   : > { %v1454_v11 = vsel %vm6114_vm9, %v1436_v9, %v1389_v10  ;;  %4466 = vmatpush3.bf16.xpose.msra.mxu0 %v2101_v54  ;;  %4467 = vmatprep.mubr.msk.bf16.mxu0 %vm5350_vm0, %v5349_v0 }
 0x331   : > { %v1351_v13 = vpop.permute.xlu1 %1350  ;;  %4462 = vmatmul.mubr.msk.bf16.vlgmr.msra.gmra.mrb[24].mxu1 %vm1055_vm3, %v1454_v11  ;;  %4477 = vmatprep.subr.bf16.mxu0 %v5349_v0 }
 0x332   : > { %4472 = vmatpush3.bf16.xpose.msra.mxu1 %v2147_v47  ;;  %4473 = vmatprep.mubr.msk.bf16.mxu1 %vm5350_vm0, %v5349_v0  ;;  %v1411_v17 = vsel %vm6106_vm8, %v6059_v53, %v1351_v13 }
 0x333   : > { %v1353_v48 = vpop.permute.xlu0 %1352  ;;  %4483 = vmatprep.subr.bf16.mxu1 %v5349_v0 }
 0x334   : > { %v1412_v21 = vsel %vm6106_vm8, %v6066_v56, %v1353_v48  ;;  %v1025_v48 = vld [vmem:[%s5919_s25 + $0xc] sm:$0xf] }
 0x335   : > { %v1375_v14 = vpop.permute.xlu1 %1374 }
 0x336   : > { %v1440_v18 = vsel %vm1402_vm4, %v1411_v17, %v1375_v14 }
 0x337   : > { %v1377_v15 = vpop.permute.xlu0 %1376 }
 0x338   : > { %v1444_v24 = vsel %vm1402_vm4, %v1412_v21, %v1377_v15 }
 0x339   : > { %v1391_v19 = vpop.permute.xlu1 %1390 }
 0x33a   : > { %v1455_v22 = vsel %vm6114_vm9, %v1440_v18, %v1391_v19  ;;  %v6244_v19 = vsel %vm807_vm1, %v1024_v3, 0 }
 0x33b   : > { %v1393_v25 = vpop.permute.xlu0 %1392  ;;  %4468 = vmatmul.mubr.msk.bf16.vlgmr.msra.gmra.mrb[28].mxu0 %vm1055_vm3, %v1455_v22 }
 0x33c   : > { %v1456_v53 = vsel %vm6114_vm9, %v1444_v24, %v1393_v25  ;;  %4479 = vmatprep.mubr.msk.bf16.mxu0 %vm5350_vm0, %v5349_v0  ;;  %4478 = vmatpush3.bf16.xpose.msra.mxu0 %v2193_v31 }
 0x33d   : > { %4474 = vmatmul.mubr.msk.bf16.vlgmr.msra.gmra.mrb[28].mxu1 %vm1055_vm3, %v1456_v53  ;;  %4489 = vmatprep.subr.bf16.mxu0 %v5349_v0 }
 0x33e   : > { %4485 = vmatprep.mubr.msk.bf16.mxu1 %vm5350_vm0, %v5349_v0  ;;  %4484 = vmatpush3.bf16.xpose.msra.mxu1 %v2239_v33 }
 0x33f   : > { %4495 = vmatprep.subr.bf16.mxu1 %v5349_v0 }
 0x367   : > { %v1097_v56 = vpop.f32.mrb[8].mxu0 }
 0x368   : > { %v4409_v26 = vpop.f32.mrb[9].mxu0  ;;  %v1103_v34 = vpack.c.bf16 %v1097_v56, %v1097_v56 }
 0x369   : > { %v1100_v27 = vpop.f32.mrb[10].mxu0 }
 0x36a   : > { %v4410_v28 = vpop.f32.mrb[11].mxu0  ;;  %v1464_v35 = vrot.slane %v1103_v34, %v5982_v20  ;;  %v6249_v27 = vsel %vm807_vm1, %v1025_v48, 0 }
 0x36c   : > { %v1465_v36 = vcombine.high %v1464_v35, %v1464_v35  ;;  %v1472_v37 = vrot.slane %v1464_v35, %v5982_v20 }
 0x36e   : > { %v1479_v38 = vrot.slane %v1465_v36, %v5982_v20  ;;  %v1480_v39 = vcombine.high %v1472_v37, %v1472_v37  ;;  %v1483_v43 = vunpack.i.h.s16 %v1472_v37  ;;  %v4236_v41 = vpack.i.b16 %v1472_v37, %v1472_v37 }
 0x370   : > { %v1481_v40 = vcombine.high %v1479_v38, %v1479_v38  ;;  %v1485_v44 = vunpack.i.h.s16 %v1479_v38  ;;  %v1487_v45 = vunpack.i.h.s16 %v1480_v39  ;;  %v6216_v49 = vpack.i.b16 %v1483_v43, %v1483_v43 }
 0x371   : > { %v4237_v42 = vpack.i.b16 %v1479_v38, %v1479_v38  ;;  %v4238_v58 = vpack.i.b16 %v1480_v39, %v1480_v39  ;;  %v6227_v54 = vrot.slane %v4236_v41, %v5996_v30 }
 0x372   : > { %v1489_v46 = vunpack.i.h.s16 %v1481_v40  ;;  %v6218_v57 = vpack.i.b16 %v1485_v44, %v1485_v44  ;;  %v6220_v59 = vpack.i.b16 %v1487_v45, %v1487_v45  ;;  %v4239_v4 = vpack.i.b16 %v1481_v40, %v1481_v40 }
 0x373   : > { %v1604_v6 = vrot.slane %v6216_v49, %v5996_v30  ;;  %v6232_v9 = vrot.slane %v4237_v42, %v5996_v30  ;;  %v6239_v15 = vrot.slane %v4238_v58, %v5996_v30 }
 0x374   : > { %v6224_v5 = vpack.i.b16 %v1489_v46, %v1489_v46  ;;  %v1612_v14 = vrot.slane %v6218_v57, %v5996_v30  ;;  %v1620_v17 = vrot.slane %v6220_v59, %v5996_v30  ;;  %v6252_v28 = vrot.slane %v4239_v4, %v5996_v30 }
 0x376   : > { %v1628_v29 = vrot.slane %v6224_v5, %v5996_v30 }
 0x3d9   : > { %v1149_v50 = vpop.f32.mrb[8].mxu1 }
 0x3da   : > { %v1155_v52 = vpack.c.bf16 %v1149_v50, %v1149_v50  ;;  %v4415_v55 = vpop.f32.mrb[9].mxu1 }
 0x3db   : > { %v1152_v60 = vpop.f32.mrb[10].mxu1 }
 0x3dc   : > { %v1497_v62 = vrot.slane %v1155_v52, %v5982_v20  ;;  %v4416_v63 = vpop.f32.mrb[11].mxu1 }
 0x3dd   : > { %v1200_v8 = vpop.f32.mrb[12].mxu0 }
 0x3de   : > { %v1498_v10 = vcombine.high %v1497_v62, %v1497_v62  ;;  %v1505_v47 = vrot.slane %v1497_v62, %v5982_v20  ;;  %v1206_v11 = vpack.c.bf16 %v1200_v8, %v1200_v8  ;;  %v4421_v13 = vpop.f32.mrb[13].mxu0 }
 0x3df   : > { %v1203_v18 = vpop.f32.mrb[14].mxu0 }
 0x3e0   : > { %v1512_v21 = vrot.slane %v1498_v10, %v5982_v20  ;;  %v1513_v22 = vcombine.high %v1505_v47, %v1505_v47  ;;  %v1516_v24 = vunpack.i.h.s16 %v1505_v47  ;;  %v4240_v25 = vpack.i.b16 %v1505_v47, %v1505_v47  ;;  %v4422_v53 = vpop.f32.mrb[15].mxu0 }
 0x3e1   : > { %v1530_v56 = vrot.slane %v1206_v11, %v5982_v20  ;;  %v1251_v26 = vpop.f32.mrb[12].mxu1 }
 0x3e2   : > { %v6256_v31 = vcombine.high %v1512_v21, %v1512_v21  ;;  %v1518_v32 = vunpack.i.h.s16 %v1512_v21  ;;  %v1520_v33 = vunpack.i.h.s16 %v1513_v22  ;;  %v1638_v34 = vpack.i.b16 %v1516_v24, %v1516_v24  ;;  %v4427_v35 = vpop.f32.mrb[13].mxu1 }
 0x3e3   : > { %v4241_v36 = vpack.i.b16 %v1512_v21, %v1512_v21  ;;  %v4242_v37 = vpack.i.b16 %v1513_v22, %v1513_v22  ;;  %v1648_v38 = vrot.slane %v4240_v25, %v5996_v30  ;;  %v1531_v39 = vcombine.high %v1530_v56, %v1530_v56  ;;  %v1254_v40 = vpop.f32.mrb[14].mxu1 }
 0x3e4   : > { %v1522_v43 = vunpack.i.h.s16 %v6256_v31  ;;  %v1640_v44 = vpack.i.b16 %v1518_v32, %v1518_v32  ;;  %v6260_v45 = vpack.i.b16 %v1520_v33, %v1520_v33  ;;  %v4243_v46 = vpack.i.b16 %v6256_v31, %v6256_v31  ;;  %v4428_v41 = vpop.f32.mrb[15].mxu1 }
 0x3e5   : > { %v1652_v50 = vrot.slane %v1638_v34, %v5996_v30  ;;  %v1656_v42 = vrot.slane %v4241_v36, %v5996_v30  ;;  %v1664_v52 = vrot.slane %v4242_v37, %v5996_v30  ;;  %v1538_v55 = vrot.slane %v1530_v56, %v5982_v20 }
 0x3e6   : > { %v6268_v58 = vpack.i.b16 %v1522_v43, %v1522_v43  ;;  %v1660_v60 = vrot.slane %v1640_v44, %v5996_v30  ;;  %v1668_v62 = vrot.slane %v6260_v45, %v5996_v30  ;;  %v1545_v63 = vrot.slane %v1531_v39, %v5982_v20 }
 0x3e7   : > { %v1546_v3 = vcombine.high %v1538_v55, %v1538_v55  ;;  %v1549_v4 = vunpack.i.h.s16 %v1538_v55  ;;  %v4244_v8 = vpack.i.b16 %v1538_v55, %v1538_v55  ;;  %v1257_v10 = vpack.c.bf16 %v1251_v26, %v1251_v26 }
 0x3e8   : > { %v6274_v47 = vcombine.high %v1545_v63, %v1545_v63  ;;  %v1551_v11 = vunpack.i.h.s16 %v1545_v63  ;;  %v4245_v13 = vpack.i.b16 %v1545_v63, %v1545_v63  ;;  %v1773_v48 = vsel %vm6106_vm8, %v6227_v54, %v1648_v38 }
 0x3e9   : > { %v1553_v18 = vunpack.i.h.s16 %v1546_v3  ;;  %v1686_v21 = vpack.i.b16 %v1549_v4, %v1549_v4  ;;  %v4246_v22 = vpack.i.b16 %v1546_v3, %v1546_v3  ;;  %v1696_v24 = vrot.slane %v4244_v8, %v5996_v30 }
 0x3ea   : > { %v1555_v25 = vunpack.i.h.s16 %v6274_v47  ;;  %v1688_v53 = vpack.i.b16 %v1551_v11, %v1551_v11  ;;  %v4247_v56 = vpack.i.b16 %v6274_v47, %v6274_v47  ;;  %v1563_v26 = vrot.slane %v1257_v10, %v5982_v20 }
 0x3eb   : > { %v1690_v32 = vpack.i.b16 %v1553_v18, %v1553_v18  ;;  %v1700_v33 = vrot.slane %v1686_v21, %v5996_v30  ;;  %v1783_v34 = vsel %vm1402_vm4, %v1773_v48, %v1696_v24  ;;  %v1774_v54 = vsel %vm6106_vm8, %v1604_v6, %v1652_v50 }
 0x3ec   : > { %v6291_v35 = vpack.i.b16 %v1555_v25, %v1555_v25  ;;  %v1564_v36 = vcombine.high %v1563_v26, %v1563_v26  ;;  %v1571_v37 = vrot.slane %v1563_v26, %v5982_v20  ;;  %v1704_v38 = vrot.slane %v4245_v13, %v5996_v30 }
 0x3ed   : > { %v1787_v39 = vsel %vm1402_vm4, %v1774_v54, %v1700_v33  ;;  %v1775_v40 = vsel %vm6106_vm8, %v6232_v9, %v1656_v42  ;;  %v1708_v43 = vrot.slane %v1688_v53, %v5996_v30  ;;  %v1776_v49 = vsel %vm6106_vm8, %v1612_v14, %v1660_v60  ;;  %v1027_v54 = vld [vmem:[%s5919_s25 + $0x14] sm:$0xf] }
 0x3ee   : > { %v1578_v6 = vrot.slane %v1564_v36, %v5982_v20  ;;  %v1579_v44 = vcombine.high %v1571_v37, %v1571_v37  ;;  %v1582_v45 = vunpack.i.h.s16 %v1571_v37  ;;  %v4248_v41 = vpack.i.b16 %v1571_v37, %v1571_v37 }
 0x3ef   : > { %v1791_v50 = vsel %vm1402_vm4, %v1775_v40, %v1704_v38  ;;  %v1795_v55 = vsel %vm1402_vm4, %v1776_v49, %v1708_v43  ;;  %v1712_v63 = vrot.slane %v4246_v22, %v5996_v30  ;;  %v1777_v9 = vsel %vm6106_vm8, %v6239_v15, %v1664_v52 }
 0x3f0   : > { %v1580_v42 = vcombine.high %v1578_v6, %v1578_v6  ;;  %v1584_v57 = vunpack.i.h.s16 %v1578_v6  ;;  %v1586_v3 = vunpack.i.h.s16 %v1579_v44  ;;  %v1726_v4 = vpack.i.b16 %v1582_v45, %v1582_v45 }
 0x3f1   : > { %v4249_v14 = vpack.i.b16 %v1578_v6, %v1578_v6  ;;  %v4250_v60 = vpack.i.b16 %v1579_v44, %v1579_v44  ;;  %v1736_v8 = vrot.slane %v4248_v41, %v5996_v30  ;;  %v1799_v10 = vsel %vm1402_vm4, %v1777_v9, %v1712_v63  ;;  %v2656_v6 = vpop.permute.xlu1 %2655  ;;  %v2738_v41 = vpop.permute.xlu0 %2737 }
 0x3f2   : > { %v1728_v47 = vpack.i.b16 %v1584_v57, %v1584_v57  ;;  %v1730_v11 = vpack.i.b16 %v1586_v3, %v1586_v3  ;;  %v1740_v13 = vrot.slane %v1726_v4, %v5996_v30  ;;  %v1716_v48 = vrot.slane %v1690_v32, %v5996_v30 }
 0x3f3   : > { %v1813_v18 = vsel %vm6114_vm9, %v1783_v34, %v1736_v8  ;;  %v1744_v15 = vrot.slane %v4249_v14, %v5996_v30  ;;  %v1752_v52 = vrot.slane %v4250_v60, %v5996_v30  ;;  %v1778_v21 = vsel %vm6106_vm8, %v1620_v17, %v1668_v62  ;;  %v1026_v34 = vld [vmem:[%s5919_s25 + $0x10] sm:$0xf] }
 0x3f4   : > { %4480 = vmatmul.mubr.msk.bf16.vlgmr.msra.gmra.mrb[16].mxu0 %vm807_vm1, %v1813_v18  ;;  %v1814_v22 = vsel %vm6114_vm9, %v1787_v39, %v1740_v13  ;;  %v1748_v24 = vrot.slane %v1728_v47, %v5996_v30  ;;  %v1756_v25 = vrot.slane %v1730_v11, %v5996_v30  ;;  %v1803_v53 = vsel %vm1402_vm4, %v1778_v21, %v1716_v48 }
 0x3f5   : > { %4490 = vmatpush3.bf16.xpose.msra.mxu0 %v6244_v19  ;;  %4486 = vmatmul.mubr.msk.bf16.vlgmr.msra.gmra.mrb[16].mxu1 %vm807_vm1, %v1814_v22  ;;  %v1815_v59 = vsel %vm6114_vm9, %v1791_v50, %v1744_v15  ;;  %v1817_v17 = vsel %vm6114_vm9, %v1799_v10, %v1752_v52  ;;  %v1672_v62 = vrot.slane %v4243_v46, %v5996_v30  ;;  %v1588_v26 = vunpack.i.h.s16 %v1580_v42  ;;  %v2820_v50 = vpop.permute.xlu1 %2819 }
 0x3f6   : > { %4496 = vmatpush3.bf16.xpose.msra.mxu1 %v6249_v27  ;;  %4491 = vmatprep.mubr.msk.bf16.mxu0 %vm5350_vm0, %v5349_v0  ;;  %v1816_v19 = vsel %vm6114_vm9, %v1795_v55, %v1748_v24  ;;  %v1818_v32 = vsel %vm6114_vm9, %v1803_v53, %v1756_v25  ;;  %v1720_v33 = vrot.slane %v4247_v56, %v5996_v30  ;;  %v2423_v43 = vsel %vm807_vm1, %v1027_v54, 0 }
 0x3f7   : > { %4501 = vmatprep.subr.bf16.mxu0 %v5349_v0  ;;  %4497 = vmatprep.mubr.msk.bf16.mxu1 %vm5350_vm0, %v5349_v0  ;;  %v4251_v31 = vpack.i.b16 %v1580_v42, %v1580_v42  ;;  %v1779_v27 = vsel %vm6106_vm8, %v6252_v28, %v1672_v62  ;;  %v1676_v46 = vrot.slane %v6268_v58, %v5996_v30  ;;  %v2377_v58 = vsel %vm807_vm1, %v1026_v34, 0 }
 0x3f8   : > { %4507 = vmatprep.subr.bf16.mxu1 %v5349_v0  ;;  %v1807_v36 = vsel %vm1402_vm4, %v1779_v27, %v1720_v33  ;;  %v1724_v56 = vrot.slane %v6291_v35, %v5996_v30  ;;  %v1732_v37 = vpack.i.b16 %v1588_v26, %v1588_v26  ;;  %v2469_v49 = vsel %vm807_vm1, %v1028_v12, 0 }
 0x3f9   : > { %v1760_v38 = vrot.slane %v4251_v31, %v5996_v30  ;;  %v1780_v28 = vsel %vm6106_vm8, %v1628_v29, %v1676_v46  ;;  %v1029_v29 = vld [vmem:[%s5919_s25 + $0x1c] sm:$0xf]  ;;  %v2673_v44 = vsel %vm1055_vm3, %v2656_v6, 0  ;;  %v2589_v45 = vsel %vm1055_vm3, %v6099_v7, 0  ;;  %s6679_s25 = scalar_lea.hbm %s6842_s30, %s4285_s18 }
 0x3fa   : > { %v1764_v39 = vrot.slane %v1732_v37, %v5996_v30  ;;  %v1811_v40 = vsel %vm1402_vm4, %v1780_v28, %v1724_v56  ;;  %v2515_v16 = vsel %vm807_vm1, %v1029_v29, 0  ;;  %v2755_v55 = vsel %vm1055_vm3, %v2738_v41, 0 }
 0x3fb   : > { %v1819_v35 = vsel %vm6114_vm9, %v1807_v36, %v1760_v38  ;;  %v2837_v7 = vsel %vm1055_vm3, %v2820_v50, 0 }
 0x3fc   : > { %4492 = vmatmul.mubr.msk.bf16.vlgmr.msra.gmra.mrb[20].mxu0 %vm807_vm1, %v1815_v59  ;;  %v1820_v5 = vsel %vm6114_vm9, %v1811_v40, %v1764_v39 }
 0x3fd   : > { %4502 = vmatpush3.bf16.xpose.msra.mxu0 %v2377_v58  ;;  %4498 = vmatmul.mubr.msk.bf16.vlgmr.msra.gmra.mrb[20].mxu1 %vm807_vm1, %v1816_v19 }
 0x3fe   : > { %4508 = vmatpush3.bf16.xpose.msra.mxu1 %v2423_v43  ;;  %4503 = vmatprep.mubr.msk.bf16.mxu0 %vm5350_vm0, %v5349_v0 }
 0x3ff   : > { %4513 = vmatprep.subr.bf16.mxu0 %v5349_v0  ;;  %4509 = vmatprep.mubr.msk.bf16.mxu1 %vm5350_vm0, %v5349_v0 }
 0x400   : > { %4519 = vmatprep.subr.bf16.mxu1 %v5349_v0 }
 0x404   : > { %4504 = vmatmul.mubr.msk.bf16.vlgmr.msra.gmra.mrb[24].mxu0 %vm807_vm1, %v1817_v17 }
 0x405   : > { %4514 = vmatpush3.bf16.xpose.msra.mxu0 %v2469_v49  ;;  %4510 = vmatmul.mubr.msk.bf16.vlgmr.msra.gmra.mrb[24].mxu1 %vm807_vm1, %v1818_v32 }
 0x406   : > { %4520 = vmatpush3.bf16.xpose.msra.mxu1 %v2515_v16  ;;  %4515 = vmatprep.mubr.msk.bf16.mxu0 %vm5350_vm0, %v5349_v0 }
 0x407   : > { %4525 = vmatprep.subr.bf16.mxu0 %v5349_v0  ;;  %4521 = vmatprep.mubr.msk.bf16.mxu1 %vm5350_vm0, %v5349_v0 }
 0x408   : > { %4531 = vmatprep.subr.bf16.mxu1 %v5349_v0 }
 0x40c   : > { %4516 = vmatmul.mubr.msk.bf16.vlgmr.msra.gmra.mrb[28].mxu0 %vm807_vm1, %v1819_v35 }
 0x40d   : > { %4526 = vmatpush3.bf16.xpose.msra.mxu0 %v2589_v45  ;;  %4522 = vmatmul.mubr.msk.bf16.vlgmr.msra.gmra.mrb[28].mxu1 %vm807_vm1, %v1820_v5  ;;  %vm2585_vm1 = vcmask 1047559  }
 0x40e   : > { %4532 = vmatpush3.bf16.xpose.msra.mxu1 %v2673_v44  ;;  %4527 = vmatprep.mubr.msk.bf16.mxu0 %vm5350_vm0, %v5349_v0 }
 0x40f   : > { %4537 = vmatprep.subr.bf16.mxu0 %v5349_v0  ;;  %4533 = vmatprep.mubr.msk.bf16.mxu1 %vm5350_vm0, %v5349_v0 }
 0x410   : > { %4543 = vmatprep.subr.bf16.mxu1 %v5349_v0 }
 0x414   : > { %4528 = vmatmul.mubr.msk.bf16.vlgmr.msra.gmra.mrb[32].mxu0 %vm1055_vm3, %v5984_v23 }
 0x415   : > { %4538 = vmatpush3.bf16.xpose.msra.mxu0 %v2755_v55  ;;  %4534 = vmatmul.mubr.msk.bf16.vlgmr.msra.gmra.mrb[32].mxu1 %vm1055_vm3, %v6079_v61 }
 0x416   : > { %4544 = vmatpush3.bf16.xpose.msra.mxu1 %v2837_v7  ;;  %4539 = vmatprep.mubr.msk.bf16.mxu0 %vm5350_vm0, %v5349_v0 }
 0x417   : > { %4545 = vmatprep.mubr.msk.bf16.mxu1 %vm5350_vm0, %v5349_v0  ;;  %4549 = vmatprep.subr.bf16.mxu0 %v5349_v0 }
 0x418   : > { %4555 = vmatprep.subr.bf16.mxu1 %v5349_v0 }
 0x41c   : > { %4540 = vmatmul.mubr.msk.bf16.vlgmr.msra.gmra.mrb[36].mxu0 %vm1055_vm3, %v6089_v2 }
 0x41d   : > { %4546 = vmatmul.mubr.msk.bf16.vlgmr.msra.gmra.mrb[36].mxu1 %vm1055_vm3, %v6087_v1  ;;  %4551 = vmatprep.mubr.msk.bf16.mxu0 %vm5350_vm0, %v5349_v0 }
 0x41e   : > { %4557 = vmatprep.mubr.msk.bf16.mxu1 %vm5350_vm0, %v5349_v0 }
 0x4c7   : > { %v2229_v23 = vpop.f32.mrb[16].mxu0 }
 0x4c8   : > { %v2657_v61 = vrot.slane %v2229_v23, 1  ;;  %v2739_v63 = vrot.slane %v2229_v23, 2  ;;  %v4481_v9 = vpop.f32.mrb[17].mxu0  ;;  %v2275_v42 = vpop.f32.mrb[16].mxu1  ;;  %v2821_v57 = vrot.slane %v2229_v23, 3 }
 0x4c9   : > { %v2232_v3 = vpop.f32.mrb[18].mxu0  ;;  %v2566_v4 = vrot.slane %v2275_v42, 7  ;;  %v2740_v14 = vrot.slane %v2275_v42, 1  ;;  %v2822_v2 = vrot.slane %v2275_v42, 2  ;;  %v4487_v60 = vpop.f32.mrb[17].mxu1 }
 0x4ca   : > { %v2658_v1 = vsel %vm2567_vm10, %v2275_v42, %v2657_v61  ;;  %v4482_v8 = vpop.f32.mrb[19].mxu0  ;;  %v2278_v10 = vpop.f32.mrb[18].mxu1 }
 0x4cb   : > { %v2568_v47 = vsel %vm2567_vm10, %v2566_v4, %v2229_v23  ;;  %v4488_v11 = vpop.f32.mrb[19].mxu1  ;;  %v2741_v13 = vsel %vm2567_vm10, %v2740_v14, %v2739_v63  ;;  %v2823_v48 = vsel %vm2567_vm10, %v2822_v2, %v2821_v57  ;;  %v1046_v57 = vld [vmem:[%s671_s6] sm:$0xff]  ;;  %s3898_s6 = scalar_lea.sflag [#allocation4], %s5898_s11 }
 0x4cf   : > { %v2321_v18 = vpop.f32.mrb[20].mxu0 }
 0x4d0   : > { %v2569_v15 = vrot.slane %v2321_v18, 6  ;;  %v2659_v52 = vrot.slane %v2321_v18, 7  ;;  %v2742_v21 = vsel %vm2570_vm11, %v2321_v18, %v2741_v13  ;;  %v2824_v22 = vrot.slane %v2321_v18, 1  ;;  %v4493_v24 = vpop.f32.mrb[21].mxu0  ;;  %v2367_v25 = vpop.f32.mrb[20].mxu1 }
 0x4d1   : > { %v2324_v53 = vpop.f32.mrb[22].mxu0  ;;  %v2572_v59 = vrot.slane %v2367_v25, 5  ;;  %v2661_v17 = vrot.slane %v2367_v25, 6  ;;  %v2743_v62 = vrot.slane %v2367_v25, 7  ;;  %v4499_v26 = vpop.f32.mrb[21].mxu1 }
 0x4d2   : > { %v2571_v19 = vsel %vm2570_vm11, %v2569_v15, %v2568_v47  ;;  %v2660_v32 = vsel %vm2570_vm11, %v2659_v52, %v2658_v1  ;;  %v2825_v33 = vsel %vm2570_vm11, %v2824_v22, %v2823_v48  ;;  %v4494_v34 = vpop.f32.mrb[23].mxu0  ;;  %v2370_v31 = vpop.f32.mrb[22].mxu1  ;;  %v1051_v26 = vsub.f32 1.0, %v1046_v57 }
 0x4d3   : > { %v2574_v27 = vsel %vm2573_vm12, %v2572_v59, %v2571_v19  ;;  %v2662_v46 = vsel %vm2573_vm12, %v2661_v17, %v2660_v32  ;;  %v2744_v54 = vsel %vm2573_vm12, %v2743_v62, %v2742_v21  ;;  %v2826_v36 = vsel %vm2573_vm12, %v2367_v25, %v2825_v33  ;;  %v4500_v56 = vpop.f32.mrb[23].mxu1 }
 0x4d4   : > { %v1052_v31 = vmul.f32 1e+30, %v1051_v26 }
 0x4d7   : > { %v2413_v37 = vpop.f32.mrb[24].mxu0 }
 0x4d8   : > { %v2575_v38 = vrot.slane %v2413_v37, 4  ;;  %v2663_v28 = vrot.slane %v2413_v37, 5  ;;  %v2745_v58 = vrot.slane %v2413_v37, 6  ;;  %v2827_v39 = vrot.slane %v2413_v37, 7  ;;  %v4505_v40 = vpop.f32.mrb[25].mxu0  ;;  %v2459_v43 = vpop.f32.mrb[24].mxu1 }
 0x4d9   : > { %v2416_v35 = vpop.f32.mrb[26].mxu0  ;;  %v2578_v5 = vrot.slane %v2459_v43, 3  ;;  %v2665_v12 = vrot.slane %v2459_v43, 4  ;;  %v2747_v29 = vrot.slane %v2459_v43, 5  ;;  %v2829_v49 = vrot.slane %v2459_v43, 6  ;;  %v4511_v16 = vpop.f32.mrb[25].mxu1 }
 0x4da   : > { %v4506_v6 = vpop.f32.mrb[27].mxu0  ;;  %v2462_v44 = vpop.f32.mrb[26].mxu1  ;;  %v2577_v45 = vsel %vm2576_vm13, %v2575_v38, %v2574_v27  ;;  %v2664_v41 = vsel %vm2576_vm13, %v2663_v28, %v2662_v46  ;;  %v2746_v50 = vsel %vm2576_vm13, %v2745_v58, %v2744_v54  ;;  %v2828_v55 = vsel %vm2576_vm13, %v2827_v39, %v2826_v36 }
 0x4db   : > { %v4512_v7 = vpop.f32.mrb[27].mxu1  ;;  %v2580_v23 = vsel %vm2579_vm14, %v2578_v5, %v2577_v45  ;;  %v2666_v61 = vsel %vm2579_vm14, %v2665_v12, %v2664_v41  ;;  %v2748_v63 = vsel %vm2579_vm14, %v2747_v29, %v2746_v50  ;;  %v2830_v9 = vsel %vm2579_vm14, %v2829_v49, %v2828_v55 }
 0x4df   : > { %v2505_v42 = vpop.f32.mrb[28].mxu0 }
 0x4e0   : > { %v2581_v3 = vrot.slane %v2505_v42, 2  ;;  %v2667_v4 = vrot.slane %v2505_v42, 3  ;;  %v2749_v14 = vrot.slane %v2505_v42, 4  ;;  %v2831_v2 = vrot.slane %v2505_v42, 5  ;;  %v4517_v60 = vpop.f32.mrb[29].mxu0  ;;  %v2551_v1 = vpop.f32.mrb[28].mxu1 }
 0x4e1   : > { %v2508_v8 = vpop.f32.mrb[30].mxu0  ;;  %v2584_v10 = vrot.slane %v2551_v1, 1  ;;  %v2669_v47 = vrot.slane %v2551_v1, 2  ;;  %v2751_v11 = vrot.slane %v2551_v1, 3  ;;  %v2833_v13 = vrot.slane %v2551_v1, 4  ;;  %v4523_v48 = vpop.f32.mrb[29].mxu1 }
 0x4e2   : > { %v4518_v18 = vpop.f32.mrb[31].mxu0  ;;  %v2554_v15 = vpop.f32.mrb[30].mxu1  ;;  %v2583_v52 = vsel %vm2582_vm15, %v2581_v3, %v2580_v23  ;;  %v2668_v21 = vsel %vm2582_vm15, %v2667_v4, %v2666_v61  ;;  %v2750_v22 = vsel %vm2582_vm15, %v2749_v14, %v2748_v63  ;;  %v2832_v24 = vsel %vm2582_vm15, %v2831_v2, %v2830_v9 }
 0x4e3   : > { %v4524_v25 = vpop.f32.mrb[31].mxu1  ;;  %v2586_v53 = vsel %vm2585_vm1, %v2584_v10, %v2583_v52  ;;  %v2670_v59 = vsel %vm2585_vm1, %v2669_v47, %v2668_v21  ;;  %v2752_v17 = vsel %vm2585_vm1, %v2751_v11, %v2750_v22  ;;  %v2834_v62 = vsel %vm2585_vm1, %v2833_v13, %v2832_v24  ;;  %v1038_v24 = vld [vmem:[#allocation14] sm:$0xf] }
 0x4e4   : > { %v1039_v25 = vld [vmem:[#allocation14 + $0x4] sm:$0xf] }
 0x4e7   : > { %v2625_v19 = vpop.f32.mrb[32].mxu0 }
 0x4e8   : > { %v2626_v32 = vadd.f32 %v2625_v19, %v2586_v53  ;;  %v4529_v33 = vpop.f32.mrb[33].mxu0  ;;  %v2709_v34 = vpop.f32.mrb[32].mxu1  ;;  %v3267_v53 = vsel %vm1059_vm2, %v1038_v24, 0  ;;  %v1049_v19 = vld [vmem:[%s689_s2] sm:$0xff]  ;;  %s5228_s2 = scalar_lea.vmem %s5227_s16, 128 }
 0x4e9   : > { %v2628_v27 = vpop.f32.mrb[34].mxu0  ;;  %v2710_v46 = vadd.f32 %v2709_v34, %v2670_v59  ;;  %v4535_v54 = vpop.f32.mrb[33].mxu1  ;;  %v3313_v59 = vsel %vm1059_vm2, %v1039_v25, 0  ;;  %4550 = vmatpush3.bf16.msra.mxu0 %v3267_v53 }
 0x4ea   : > { %v2631_v36 = vmul.f32 0.35355338, %v2626_v32  ;;  %v4530_v56 = vpop.f32.mrb[35].mxu0  ;;  %v2712_v37 = vpop.f32.mrb[34].mxu1  ;;  %4556 = vmatpush3.bf16.msra.mxu1 %v3313_v59  ;;  %4561 = vmatprep.subr.bf16.mxu0 %v5349_v0 }
 0x4eb   : > { %v2715_v38 = vmul.f32 0.35355338, %v2710_v46  ;;  %v4536_v28 = vpop.f32.mrb[35].mxu1  ;;  %4567 = vmatprep.subr.bf16.mxu1 %v5349_v0 }
 0x4ec   : > { %v2632_v58 = vsub.f32 %v2631_v36, %v1052_v31 }
 0x4ed   : > { %v2716_v39 = vsub.f32 %v2715_v38, %v1052_v31 }
 0x4ee   : > { %v2633_v40 = vsel %vm1055_vm3, %v2632_v58, -inf }
 0x4ef   : > { %v2791_v43 = vpop.f32.mrb[36].mxu0  ;;  %2634 = vmax.xlane.f32.xlu0 %v2633_v40  ;;  %v2717_v35 = vsel %vm1055_vm3, %v2716_v39, -inf  ;;  %v1040_v40 = vld [vmem:[#allocation14 + $0x8] sm:$0xf] }
 0x4f0   : > { %v2792_v5 = vadd.f32 %v2791_v43, %v2752_v17  ;;  %v4541_v12 = vpop.f32.mrb[37].mxu0  ;;  %2718 = vmax.xlane.f32.xlu1 %v2717_v35  ;;  %v2873_v29 = vpop.f32.mrb[36].mxu1 }
 0x4f1   : > { %v2794_v49 = vpop.f32.mrb[38].mxu0  ;;  %v2874_v16 = vadd.f32 %v2873_v29, %v2834_v62  ;;  %v4547_v6 = vpop.f32.mrb[37].mxu1 }
 0x4f2   : > { %v2797_v44 = vmul.f32 0.35355338, %v2792_v5  ;;  %v4542_v45 = vpop.f32.mrb[39].mxu0  ;;  %v2876_v41 = vpop.f32.mrb[38].mxu1  ;;  %v1041_v49 = vld [vmem:[#allocation14 + $0xc] sm:$0xf] }
 0x4f3   : > { %v2879_v50 = vmul.f32 0.35355338, %v2874_v16  ;;  %v4548_v55 = vpop.f32.mrb[39].mxu1 }
 0x4f4   : > { %v2798_v7 = vsub.f32 %v2797_v44, %v1052_v31  ;;  %v3359_v44 = vsel %vm1059_vm2, %v1040_v40, 0 }
 0x4f5   : > { %v2880_v61 = vsub.f32 %v2879_v50, %v1052_v31  ;;  %v1050_v31 = vpack.c.bf16 %v1049_v19, %v1049_v19 }
 0x4f6   : > { %v2799_v23 = vsel %vm1055_vm3, %v2798_v7, -inf }
 0x4f7   : > { %2800 = vmax.xlane.f32.xlu0 %v2799_v23  ;;  %v2881_v63 = vsel %vm1055_vm3, %v2880_v61, -inf }
 0x4fb   : > { %2882 = vmax.xlane.f32.xlu0 %v2881_v63  ;;  %v3405_v63 = vsel %vm1059_vm2, %v1041_v49, 0 }
 0x57c   : > { %v2635_v9 = vpop.xlane.xlu0 %2634 }
 0x57d   : > { %v2636_v42 = vsub.f32 %v2632_v58, %v2635_v9  ;;  %v2719_v57 = vpop.xlane.xlu1 %2718 }
 0x57e   : > { %v2720_v3 = vsub.f32 %v2716_v39, %v2719_v57 }
 0x57f   : > { %v2637_v4 = vmul.f32 1.442695, %v2636_v42 }
 0x580   : > { %v2721_v14 = vmul.f32 1.442695, %v2720_v3 }
 0x581   : > { %4830 = vpow2.f32 %v2637_v4 }
 0x582   : > { %4832 = vpow2.f32 %v2721_v14 }
 0x584   : > { %v2801_v2 = vpop.xlane.xlu0 %2800 }
 0x585   : > { %v2802_v60 = vsub.f32 %v2798_v7, %v2801_v2 }
 0x587   : > { %v2803_v1 = vmul.f32 1.442695, %v2802_v60 }
 0x588   : > { %v2883_v8 = vpop.xlane.xlu0 %2882 }
 0x589   : > { %4834 = vpow2.f32 %v2803_v1  ;;  %v2884_v10 = vsub.f32 %v2880_v61, %v2883_v8 }
 0x58b   : > { %v4831_v47 = vpop.eup %4830  ;;  %v2885_v11 = vmul.f32 1.442695, %v2884_v10 }
 0x58c   : > { %v4833_v13 = vpop.eup %4832  ;;  %v2639_v48 = vsel %vm1055_vm3, %v4831_v47, 0.0 }
 0x58d   : > { %4836 = vpow2.f32 %v2885_v11  ;;  %2640 = vadd.xlane.f32.xlu1 %v2639_v48  ;;  %v2723_v18 = vsel %vm1055_vm3, %v4833_v13, 0.0 }
 0x58e   : > { %2724 = vadd.xlane.f32.xlu0 %v2723_v18 }
 0x593   : > { %v4835_v15 = vpop.eup %4834 }
 0x594   : > { %v2805_v52 = vsel %vm1055_vm3, %v4835_v15, 0.0 }
 0x595   : > { %2806 = vadd.xlane.f32.xlu1 %v2805_v52 }
 0x597   : > { %v4837_v21 = vpop.eup %4836 }
 0x598   : > { %v2887_v22 = vsel %vm1055_vm3, %v4837_v21, 0.0 }
 0x599   : > { %2888 = vadd.xlane.f32.xlu0 %v2887_v22 }
 0x5a6   : > { %3698 = vrot.lane.b32.xlu1 %v6164_v51, %s5353_s19 }
 0x61a   : > { %v2641_v17 = vpop.xlane.xlu1 %2640 }
 0x61b   : > { %4838 = vrcp.f32 %v2641_v17  ;;  %v2725_v62 = vpop.xlane.xlu0 %2724 }
 0x61c   : > { %4840 = vrcp.f32 %v2725_v62 }
 0x622   : > { %v2807_v26 = vpop.xlane.xlu1 %2806 }
 0x623   : > { %4842 = vrcp.f32 %v2807_v26 }
 0x625   : > { %v4839_v32 = vpop.eup %4838 }
 0x626   : > { %v4841_v33 = vpop.eup %4840  ;;  %v2889_v34 = vpop.xlane.xlu0 %2888  ;;  %v2643_v27 = vmul.f32 %v4839_v32, %v4831_v47 }
 0x627   : > { %4844 = vrcp.f32 %v2889_v34  ;;  %v2727_v46 = vmul.f32 %v4841_v33, %v4833_v13 }
 0x628   : > { %v6474_v54 = vpack.c.bf16 %v2643_v27, %v2643_v27  ;;  %v2909_v38 = vrot.slane %v2643_v27, %v5982_v20  ;;  %v2902_v43 = vcombine.high %v2643_v27, %v2643_v27 }
 0x629   : > { %v6476_v36 = vpack.c.bf16 %v2727_v46, %v2727_v46  ;;  %v2967_v37 = vrot.slane %v2727_v46, %v5982_v20  ;;  %v2960_v5 = vcombine.high %v2727_v46, %v2727_v46 }
 0x62a   : > { %v2646_v56 = vmul.bf16 %v6474_v54, %v1050_v31  ;;  %v2917_v35 = vcombine.high %v2909_v38, %v2909_v38  ;;  %v6488_v6 = vrot.slane %v2909_v38, %v5982_v20  ;;  %v6498_v7 = vrot.slane %v2902_v43, %v5982_v20 }
 0x62b   : > { %v2730_v28 = vmul.bf16 %v6476_v36, %v1050_v31  ;;  %v2975_v39 = vcombine.high %v2967_v37, %v2967_v37  ;;  %v2983_v12 = vrot.slane %v2967_v37, %v5982_v20  ;;  %v2974_v61 = vrot.slane %v2960_v5, %v5982_v20 }
 0x62c   : > { %2648 = vrot.lane.b32.xlu0 %v2646_v56, %s5355_s0  ;;  %v6501_v23 = vrot.slane %v2917_v35, %v5982_v20  ;;  %v2947_v4 = vcombine.high %v6488_v6, %v6488_v6 }
 0x62d   : > { %v4843_v58 = vpop.eup %4842  ;;  %2732 = vrot.lane.b32.xlu1 %v2730_v28, %s5355_s0  ;;  %v2997_v45 = vrot.slane %v2975_v39, %v5982_v20  ;;  %v3005_v9 = vcombine.high %v2983_v12, %v2983_v12  ;;  %v3112_v14 = vrot.slane %v2983_v12, %v5996_v30  ;;  %v2976_v27 = vcombine.high %v2974_v61, %v2974_v61 }
 0x62e   : > { %v2809_v29 = vmul.f32 %v4843_v58, %v4835_v15  ;;  %v6536_v38 = vrot.slane %v2974_v61, %v5982_v20  ;;  %v2949_v40 = vcombine.high %v6501_v23, %v6501_v23  ;;  %v2918_v61 = vcombine.high %v6498_v7, %v6498_v7 }
 0x62f   : > { %v3007_v1 = vcombine.high %v2997_v45, %v2997_v45  ;;  %v3116_v8 = vrot.slane %v2997_v45, %v5996_v30  ;;  %v3120_v15 = vrot.slane %v3005_v9, %v5996_v30  ;;  %v3229_v25 = vsel %vm1402_vm4, %v6488_v6, %v3112_v14 }
 0x630   : > { %3818 = vrot.lane.b32.xlu0 %v6164_v51, %s5352_s14  ;;  %v6494_v41 = vpack.c.bf16 %v2809_v29, %v2809_v29  ;;  %v3017_v50 = vrot.slane %v2809_v29, %v5982_v20  ;;  %v3010_v10 = vcombine.high %v2809_v29, %v2809_v29 }
 0x631   : > { %v4845_v16 = vpop.eup %4844  ;;  %3758 = vrot.lane.b32.xlu1 %v6164_v51, %s5354_s20  ;;  %v3230_v26 = vsel %vm1402_vm4, %v6501_v23, %v3116_v8  ;;  %v3124_v39 = vrot.slane %v3007_v1, %v5996_v30  ;;  %v3231_v29 = vsel %vm1402_vm4, %v2947_v4, %v3120_v15  ;;  %v2932_v8 = vrot.slane %v6498_v7, %v5982_v20 }
 0x632   : > { %v2891_v55 = vmul.f32 %v4845_v16, %v4837_v21  ;;  %v2812_v42 = vmul.bf16 %v6494_v41, %v1050_v31  ;;  %v3025_v57 = vcombine.high %v3017_v50, %v3017_v50  ;;  %v3033_v3 = vrot.slane %v3017_v50, %v5982_v20 }
 0x633   : > { %v3024_v17 = vrot.slane %v3010_v10, %v5982_v20  ;;  %v3004_v16 = vrot.slane %v2976_v27, %v5982_v20  ;;  %v3232_v50 = vsel %vm1402_vm4, %v2949_v40, %v3124_v39  ;;  %v3006_v15 = vcombine.high %v6536_v38, %v6536_v38 }
 0x634   : > { %v6510_v2 = vpack.c.bf16 %v2891_v55, %v2891_v55  ;;  %v3067_v60 = vrot.slane %v2891_v55, %v5982_v20  ;;  %v3047_v47 = vrot.slane %v3025_v57, %v5982_v20  ;;  %v3060_v13 = vcombine.high %v2891_v55, %v2891_v55  ;;  %v1042_v55 = vld [vmem:[#allocation14 + $0x10] sm:$0xf] }
 0x635   : > { %2814 = vrot.lane.b32.xlu1 %v2812_v42, %s5355_s0  ;;  %v3055_v52 = vcombine.high %v3033_v3, %v3033_v3  ;;  %v3152_v21 = vrot.slane %v3033_v3, %v5996_v30  ;;  %v3026_v43 = vcombine.high %v3024_v17, %v3024_v17  ;;  %v3040_v6 = vrot.slane %v3024_v17, %v5982_v20  ;;  %v1043_v3 = vld [vmem:[#allocation14 + $0x14] sm:$0xf] }
 0x636   : > { %v2894_v11 = vmul.bf16 %v6510_v2, %v1050_v31  ;;  %v3075_v48 = vcombine.high %v3067_v60, %v3067_v60  ;;  %v3083_v18 = vrot.slane %v3067_v60, %v5982_v20  ;;  %v3156_v22 = vrot.slane %v3047_v47, %v5996_v30 }
 0x637   : > { %v3238_v62 = vsel %vm1446_vm6, %v3229_v25, %v3152_v21  ;;  %v3057_v19 = vcombine.high %v3047_v47, %v3047_v47  ;;  %v3074_v32 = vrot.slane %v3060_v13, %v5982_v20  ;;  %v3160_v37 = vrot.slane %v3055_v52, %v5996_v30 }
 0x638   : > { %2896 = vrot.lane.b32.xlu0 %v2894_v11, %s5355_s0  ;;  %v3192_v24 = vrot.slane %v3083_v18, %v5996_v30  ;;  %v3097_v53 = vrot.slane %v3075_v48, %v5982_v20  ;;  %v3105_v59 = vcombine.high %v3083_v18, %v3083_v18  ;;  %v3239_v56 = vsel %vm1446_vm6, %v3230_v26, %v3156_v22 }
 0x639   : > { %v3164_v5 = vrot.slane %v3057_v19, %v5996_v30  ;;  %v3076_v12 = vcombine.high %v3074_v32, %v3074_v32  ;;  %v3240_v45 = vsel %vm1446_vm6, %v3231_v29, %v3160_v37  ;;  %v3090_v23 = vrot.slane %v3074_v32, %v5982_v20  ;;  %v1045_v19 = vld [vmem:[#allocation14 + $0x1c] sm:$0xf] }
 0x63a   : > { %v3247_v33 = vsel %vm3246_vm5, %v3238_v62, %v3192_v24  ;;  %v3196_v34 = vrot.slane %v3097_v53, %v5996_v30  ;;  %v3107_v31 = vcombine.high %v3097_v53, %v3097_v53  ;;  %v3200_v58 = vrot.slane %v3105_v59, %v5996_v30  ;;  %v1044_v53 = vld [vmem:[#allocation14 + $0x18] sm:$0xf] }
 0x63b   : > { %v3255_v46 = vpack.c.bf16 %v3247_v33, %v3247_v33  ;;  %v3241_v9 = vsel %vm1446_vm6, %v3232_v50, %v3164_v5  ;;  %v3054_v42 = vrot.slane %v3026_v43, %v5982_v20  ;;  %v3104_v4 = vrot.slane %v3076_v12, %v5982_v20 }
 0x63c   : > { %v3248_v28 = vsel %vm3246_vm5, %v3239_v56, %v3196_v34  ;;  %v3204_v49 = vrot.slane %v3107_v31, %v5996_v30  ;;  %v3451_v60 = vsel %vm1059_vm2, %v1042_v55, 0  ;;  %v3168_v1 = vrot.slane %v3040_v6, %v5996_v30 }
 0x63d   : > { %4552 = vmatmul.mubr.msk.bf16.vlgmr.msra.gmra.mrb[40].mxu0 %vm1055_vm3, %v3255_v46  ;;  %v3256_v35 = vpack.c.bf16 %v3248_v28, %v3248_v28  ;;  %v3208_v10 = vrot.slane %v3090_v23, %v5996_v30  ;;  %v3132_v47 = vrot.slane %v3004_v16, %v5996_v30  ;;  %v2946_v11 = vrot.slane %v2918_v61, %v5982_v20 }
 0x63e   : > { %4562 = vmatpush3.bf16.msra.mxu0 %v3359_v44  ;;  %4563 = vmatprep.mubr.msk.bf16.mxu0 %vm5350_vm0, %v5349_v0  ;;  %v3249_v44 = vsel %vm3246_vm5, %v3240_v45, %v3200_v58  ;;  %v3250_v57 = vsel %vm3246_vm5, %v3241_v9, %v3204_v49  ;;  %v3497_v48 = vsel %vm1059_vm2, %v1043_v3, 0  ;;  %v3172_v18 = vrot.slane %v3054_v42, %v5996_v30  ;;  %v1047_v45 = vld [vmem:[%s680_s27] sm:$0xff]  ;;  %s5222_s27 = scalar_lea.vmem %s6681_s5, 64 }
 0x63f   : > { %4558 = vmatmul.mubr.msk.bf16.vlgmr.msra.gmra.mrb[40].mxu1 %vm1055_vm3, %v3256_v35  ;;  %4573 = vmatprep.subr.bf16.mxu0 %v5349_v0  ;;  %v3257_v14 = vpack.c.bf16 %v3249_v44, %v3249_v44  ;;  %v3258_v13 = vpack.c.bf16 %v3250_v57, %v3250_v57  ;;  %v3212_v52 = vrot.slane %v3104_v4, %v5996_v30  ;;  %v3543_v31 = vsel %vm1059_vm2, %v1044_v53, 0  ;;  %p5223_p5 = scmp.ne.s32.totalorder %s6681_s5, %s5222_s27  ;;  %p5230_p11 = scmp.lt.s32.totalorder %s5228_s2, %s5222_s27 }
 0x640   : > { %4568 = vmatpush3.bf16.msra.mxu1 %v3405_v63  ;;  %4569 = vmatprep.mubr.msk.bf16.mxu1 %vm5350_vm0, %v5349_v0  ;;  %v3128_v63 = vrot.slane %v6536_v38, %v5996_v30  ;;  %v3008_v21 = vcombine.high %v3004_v16, %v3004_v16  ;;  %v3056_v22 = vcombine.high %v3040_v6, %v3040_v6  ;;  %v3589_v28 = vsel %vm1059_vm2, %v1045_v19, 0  ;;  %v3699_v6 = vpop.permute.xlu1 %3698 }
 0x641   : > { %4579 = vmatprep.subr.bf16.mxu1 %v5349_v0  ;;  %v3234_v25 = vsel %vm1402_vm4, %v2946_v11, %v3132_v47  ;;  %v3106_v59 = vcombine.high %v3090_v23, %v3090_v23  ;;  %v3058_v62 = vcombine.high %v3054_v42, %v3054_v42  ;;  %v3136_v32 = vrot.slane %v3006_v15, %v5996_v30  ;;  %p5224_p1 = pnand %p5223_p5, %p6844_p8  ;;  %p5231_p10 = por %p5230_p11, %p5229_p0 }
 0x642   : > { %v3233_v7 = vsel %vm1402_vm4, %v2932_v8, %v3128_v63  ;;  %v3243_v17 = vsel %vm1446_vm6, %v3234_v25, %v3172_v18  ;;  %v3108_v33 = vcombine.high %v3104_v4, %v3104_v4  ;;  %v3176_v27 = vrot.slane %v3056_v22, %v5996_v30 }
 0x643   : > { %v3242_v20 = vsel %vm1446_vm6, %v3233_v7, %v3168_v1  ;;  %v3252_v26 = vsel %vm3246_vm5, %v3243_v17, %v3212_v52  ;;  %v2948_v46 = vcombine.high %v2932_v8, %v2932_v8  ;;  %v3216_v56 = vrot.slane %v3106_v59, %v5996_v30  ;;  %p5225_p7 = pneg %p5224_p1 }
 0x644   : > { %v3251_v24 = vsel %vm3246_vm5, %v3242_v20, %v3208_v10  ;;  %v3140_v37 = vrot.slane %v3008_v21, %v5996_v30  ;;  %v3260_v38 = vpack.c.bf16 %v3252_v26, %v3252_v26  ;;  %v3180_v58 = vrot.slane %v3058_v62, %v5996_v30 }
 0x645   : > { %4564 = vmatmul.mubr.msk.bf16.vlgmr.msra.gmra.mrb[44].mxu0 %vm1055_vm3, %v3257_v14  ;;  %v3259_v34 = vpack.c.bf16 %v3251_v24, %v3251_v24  ;;  %v3235_v39 = vsel %vm1402_vm4, %v2948_v46, %v3136_v32  ;;  %v2950_v40 = vcombine.high %v2946_v11, %v2946_v11  ;;  %v3220_v43 = vrot.slane %v3108_v33, %v5996_v30  ;;  %p5232_p12 = pnand %p5231_p10, %p5225_p7 }
 0x646   : > { %4574 = vmatpush3.bf16.msra.mxu0 %v3451_v60  ;;  %4575 = vmatprep.mubr.msk.bf16.mxu0 %vm5350_vm0, %v5349_v0  ;;  %v3244_v35 = vsel %vm1446_vm6, %v3235_v39, %v3176_v27  ;;  %v1048_v44 = vpack.c.bf16 %v1047_v45, %v1047_v45  ;;  %vm3654_vm2 = vcmask 130048  }
 0x647   : > { %4570 = vmatmul.mubr.msk.bf16.vlgmr.msra.gmra.mrb[44].mxu1 %vm1055_vm3, %v3258_v13  ;;  %4585 = vmatprep.subr.bf16.mxu0 %v5349_v0  ;;  %v3253_v5 = vsel %vm3246_vm5, %v3244_v35, %v3216_v56  ;;  %v3236_v12 = vsel %vm1402_vm4, %v2950_v40, %v3140_v37  ;;  %vm3895_vm4 = vcmask 257024  }
 0x648   : > { %4580 = vmatpush3.bf16.msra.mxu1 %v3497_v48  ;;  %4581 = vmatprep.mubr.msk.bf16.mxu1 %vm5350_vm0, %v5349_v0  ;;  %v3245_v29 = vsel %vm1446_vm6, %v3236_v12, %v3180_v58  ;;  %v3261_v49 = vpack.c.bf16 %v3253_v5, %v3253_v5  ;;  %v2645_v50 = vmul.bf16 %v6474_v54, %v1048_v44 }
 0x649   : > { %4591 = vmatprep.subr.bf16.mxu1 %v5349_v0  ;;  %v3254_v30 = vsel %vm3246_vm5, %v3245_v29, %v3220_v43  ;;  %v2729_v55 = vmul.bf16 %v6476_v36, %v1048_v44  ;;  %v2811_v36 = vmul.bf16 %v6494_v41, %v1048_v44  ;;  %v2893_v3 = vmul.bf16 %v6510_v2, %v1048_v44 }
 0x64a   : > { %v3262_v16 = vpack.c.bf16 %v3254_v30, %v3254_v30 }
 0x64d   : > { %4576 = vmatmul.mubr.msk.bf16.vlgmr.msra.gmra.mrb[48].mxu0 %vm1055_vm3, %v3259_v34 }
 0x64e   : > { %4586 = vmatpush3.bf16.msra.mxu0 %v3543_v31  ;;  %4587 = vmatprep.mubr.msk.bf16.mxu0 %vm5350_vm0, %v5349_v0 }
 0x64f   : > { %4582 = vmatmul.mubr.msk.bf16.vlgmr.msra.gmra.mrb[48].mxu1 %vm1055_vm3, %v3260_v38  ;;  %4597 = vmatprep.subr.bf16.mxu0 %v5349_v0 }
 0x650   : > { %4592 = vmatpush3.bf16.msra.mxu1 %v3589_v28  ;;  %4593 = vmatprep.mubr.msk.bf16.mxu1 %vm5350_vm0, %v5349_v0 }
 0x651   : > { %4603 = vmatprep.subr.bf16.mxu1 %v5349_v0 }
 0x655   : > { %4588 = vmatmul.mubr.msk.bf16.vlgmr.msra.gmra.mrb[52].mxu0 %vm1055_vm3, %v3261_v49 }
 0x656   : > { %4598 = vmatpush3.bf16.msra.mxu0 %v6164_v51  ;;  %4599 = vmatprep.mubr.msk.bf16.mxu0 %vm5350_vm0, %v5349_v0 }
 0x657   : > { %4594 = vmatmul.mubr.msk.bf16.vlgmr.msra.gmra.mrb[52].mxu1 %vm1055_vm3, %v3262_v16  ;;  %4609 = vmatprep.subr.bf16.mxu0 %v5349_v0 }
 0x658   : > { %4604 = vmatpush3.bf16.msra.mxu1 %v3699_v6  ;;  %4605 = vmatprep.mubr.msk.bf16.mxu1 %vm5350_vm0, %v5349_v0 }
 0x659   : > { %4615 = vmatprep.subr.bf16.mxu1 %v5349_v0 }
 0x69e   : > { %v2649_v51 = vpop.permute.xlu0 %2648 }
 0x69f   : > { %v2652_v23 = vsel %vm1055_vm3, %v2645_v50, %v2649_v51  ;;  %v2733_v61 = vpop.permute.xlu1 %2732 }
 0x6a0   : > { %v2736_v9 = vsel %vm1055_vm3, %v2729_v55, %v2733_v61  ;;  %4600 = vmatmul.mubr.msk.bf16.vlgmr.msra.gmra.mrb[56].mxu0 %vm3654_vm2, %v2652_v23 }
 0x6a1   : > { %4606 = vmatmul.mubr.msk.bf16.vlgmr.msra.gmra.mrb[56].mxu1 %vm3654_vm2, %v2736_v9  ;;  %4611 = vmatprep.mubr.msk.bf16.mxu0 %vm5350_vm0, %v5349_v0 }
 0x6a2   : > { %v3819_v42 = vpop.permute.xlu0 %3818  ;;  %4617 = vmatprep.mubr.msk.bf16.mxu1 %vm5350_vm0, %v5349_v0  ;;  %vm3892_vm0 = vcmask 195584  }
 0x6a3   : > { %4616 = vmatpush3.bf16.msra.mxu1 %v3819_v42  ;;  %v3759_v54 = vpop.permute.xlu1 %3758 }
 0x6a4   : > { %4610 = vmatpush3.bf16.msra.mxu0 %v3759_v54 }
 0x6a7   : > { %v2815_v63 = vpop.permute.xlu1 %2814 }
 0x6a8   : > { %v2818_v57 = vsel %vm1055_vm3, %v2811_v36, %v2815_v63 }
 0x6a9   : > { %4612 = vmatmul.mubr.msk.bf16.vlgmr.msra.gmra.mrb[60].mxu0 %vm3654_vm2, %v2818_v57 }
 0x6aa   : > { %v2897_v4 = vpop.permute.xlu0 %2896 }
 0x6ab   : > { %v2900_v14 = vsel %vm1055_vm3, %v2893_v3, %v2897_v4 }
 0x6ac   : > { %4618 = vmatmul.mubr.msk.bf16.vlgmr.msra.gmra.mrb[60].mxu1 %vm3654_vm2, %v2900_v14 }
 0x710   : > { %v3303_v60 = vpop.f32.mrb[40].mxu0 }
 0x711   : > { %v3701_v1 = vrot.slane %v3303_v60, 1  ;;  %v4553_v0 = vpop.f32.mrb[41].mxu0  ;;  %v3761_v8 = vrot.slane %v3303_v60, 2  ;;  %v3821_v10 = vrot.slane %v3303_v60, 3 }
 0x712   : > { %v3306_v47 = vpop.f32.mrb[42].mxu0  ;;  %v3349_v11 = vpop.f32.mrb[40].mxu1 }
 0x713   : > { %v3639_v41 = vrot.slane %v3349_v11, 7  ;;  %v3702_v13 = vsel %vm2567_vm10, %v3349_v11, %v3701_v1  ;;  %v3762_v48 = vrot.slane %v3349_v11, 1  ;;  %v3822_v18 = vrot.slane %v3349_v11, 2  ;;  %v4554_v15 = vpop.f32.mrb[43].mxu0  ;;  %v4559_v7 = vpop.f32.mrb[41].mxu1 }
 0x714   : > { %v3352_v2 = vpop.f32.mrb[42].mxu1 }
 0x715   : > { %v3640_v52 = vsel %vm2567_vm10, %v3639_v41, %v3303_v60  ;;  %v4560_v21 = vpop.f32.mrb[43].mxu1  ;;  %v3763_v20 = vsel %vm2567_vm10, %v3762_v48, %v3761_v8  ;;  %v3823_v22 = vsel %vm2567_vm10, %v3822_v18, %v3821_v10 }
 0x718   : > { %v3395_v24 = vpop.f32.mrb[44].mxu0 }
 0x719   : > { %v3641_v25 = vrot.slane %v3395_v24, 6  ;;  %v3703_v53 = vrot.slane %v3395_v24, 7  ;;  %v3764_v59 = vsel %vm2570_vm11, %v3395_v24, %v3763_v20  ;;  %v3824_v17 = vrot.slane %v3395_v24, 1  ;;  %v4565_v62 = vpop.f32.mrb[45].mxu0 }
 0x71a   : > { %v3398_v26 = vpop.f32.mrb[46].mxu0  ;;  %v3441_v19 = vpop.f32.mrb[44].mxu1 }
 0x71b   : > { %v3642_v32 = vsel %vm2570_vm11, %v3641_v25, %v3640_v52  ;;  %v3704_v33 = vsel %vm2570_vm11, %v3703_v53, %v3702_v13  ;;  %v3643_v34 = vrot.slane %v3441_v19, 5  ;;  %v3705_v31 = vrot.slane %v3441_v19, 6  ;;  %v4566_v27 = vpop.f32.mrb[47].mxu0  ;;  %v4571_v46 = vpop.f32.mrb[45].mxu1 }
 0x71c   : > { %v3765_v56 = vrot.slane %v3441_v19, 7  ;;  %v3825_v37 = vsel %vm2570_vm11, %v3824_v17, %v3823_v22  ;;  %v3444_v38 = vpop.f32.mrb[46].mxu1 }
 0x71d   : > { %v3644_v28 = vsel %vm2573_vm12, %v3643_v34, %v3642_v32  ;;  %v3706_v58 = vsel %vm2573_vm12, %v3705_v31, %v3704_v33  ;;  %v3826_v39 = vsel %vm2573_vm12, %v3441_v19, %v3825_v37  ;;  %v4572_v40 = vpop.f32.mrb[47].mxu1 }
 0x71e   : > { %v3766_v43 = vsel %vm2573_vm12, %v3765_v56, %v3764_v59 }
 0x720   : > { %v3487_v35 = vpop.f32.mrb[48].mxu0 }
 0x721   : > { %v3645_v5 = vrot.slane %v3487_v35, 4  ;;  %v3707_v12 = vrot.slane %v3487_v35, 5  ;;  %v3767_v29 = vrot.slane %v3487_v35, 6  ;;  %v3827_v30 = vrot.slane %v3487_v35, 7  ;;  %v4577_v49 = vpop.f32.mrb[49].mxu0 }
 0x722   : > { %v3490_v16 = vpop.f32.mrb[50].mxu0  ;;  %v3533_v6 = vpop.f32.mrb[48].mxu1 }
 0x723   : > { %v3647_v45 = vrot.slane %v3533_v6, 3  ;;  %v3709_v44 = vrot.slane %v3533_v6, 4  ;;  %v3769_v50 = vrot.slane %v3533_v6, 5  ;;  %v3829_v51 = vrot.slane %v3533_v6, 6  ;;  %v4578_v55 = vpop.f32.mrb[51].mxu0  ;;  %v4583_v23 = vpop.f32.mrb[49].mxu1 }
 0x724   : > { %v3536_v61 = vpop.f32.mrb[50].mxu1  ;;  %v3646_v9 = vsel %vm2576_vm13, %v3645_v5, %v3644_v28  ;;  %v3708_v42 = vsel %vm2576_vm13, %v3707_v12, %v3706_v58  ;;  %v3768_v54 = vsel %vm2576_vm13, %v3767_v29, %v3766_v43  ;;  %v3828_v36 = vsel %vm2576_vm13, %v3827_v30, %v3826_v39 }
 0x725   : > { %v4584_v63 = vpop.f32.mrb[51].mxu1  ;;  %v3648_v57 = vsel %vm2579_vm14, %v3647_v45, %v3646_v9  ;;  %v3710_v3 = vsel %vm2579_vm14, %v3709_v44, %v3708_v42  ;;  %v3770_v4 = vsel %vm2579_vm14, %v3769_v50, %v3768_v54  ;;  %v3830_v14 = vsel %vm2579_vm14, %v3829_v51, %v3828_v36 }
 0x728   : > { %v3579_v60 = vpop.f32.mrb[52].mxu0 }
 0x729   : > { %v3649_v1 = vrot.slane %v3579_v60, 2  ;;  %v3711_v0 = vrot.slane %v3579_v60, 3  ;;  %v3771_v8 = vrot.slane %v3579_v60, 4  ;;  %v3831_v10 = vrot.slane %v3579_v60, 5  ;;  %v4589_v47 = vpop.f32.mrb[53].mxu0 }
 0x72a   : > { %v3582_v11 = vpop.f32.mrb[54].mxu0  ;;  %v3625_v41 = vpop.f32.mrb[52].mxu1 }
 0x72b   : > { %v3651_v13 = vrot.slane %v3625_v41, 1  ;;  %v3713_v48 = vrot.slane %v3625_v41, 2  ;;  %v3773_v18 = vrot.slane %v3625_v41, 3  ;;  %v3833_v15 = vrot.slane %v3625_v41, 4  ;;  %v4590_v7 = vpop.f32.mrb[55].mxu0  ;;  %v4595_v2 = vpop.f32.mrb[53].mxu1 }
 0x72c   : > { %v3628_v52 = vpop.f32.mrb[54].mxu1  ;;  %v3650_v21 = vsel %vm2582_vm15, %v3649_v1, %v3648_v57  ;;  %v3712_v20 = vsel %vm2582_vm15, %v3711_v0, %v3710_v3  ;;  %v3772_v22 = vsel %vm2582_vm15, %v3771_v8, %v3770_v4  ;;  %v3832_v24 = vsel %vm2582_vm15, %v3831_v10, %v3830_v14 }
 0x72d   : > { %v4596_v25 = vpop.f32.mrb[55].mxu1  ;;  %v3652_v53 = vsel %vm2585_vm1, %v3651_v13, %v3650_v21  ;;  %v3714_v59 = vsel %vm2585_vm1, %v3713_v48, %v3712_v20  ;;  %v3774_v17 = vsel %vm2585_vm1, %v3773_v18, %v3772_v22  ;;  %v3834_v62 = vsel %vm2585_vm1, %v3833_v15, %v3832_v24 }
 0x773   : > { %v3691_v26 = vpop.f32.mrb[56].mxu0 }
 0x774   : > { %v3692_v19 = vadd.f32 %v3691_v26, %v3652_v53  ;;  %v4601_v32 = vpop.f32.mrb[57].mxu0  ;;  %v3752_v33 = vpop.f32.mrb[56].mxu1 }
 0x775   : > { %v3694_v34 = vpop.f32.mrb[58].mxu0  ;;  %v3753_v31 = vadd.f32 %v3752_v33, %v3714_v59  ;;  %v4607_v27 = vpop.f32.mrb[57].mxu1 }
 0x776   : > { %v4602_v46 = vpop.f32.mrb[59].mxu0  ;;  %v3755_v56 = vpop.f32.mrb[58].mxu1 }
 0x777   : > { %3879 = vrot.lane.b32.xlu1 %v3753_v31, %s5355_s0  ;;  %v4608_v37 = vpop.f32.mrb[59].mxu1 }
 0x77c   : > { %v3812_v38 = vpop.f32.mrb[60].mxu0 }
 0x77d   : > { %v3813_v28 = vadd.f32 %v3812_v38, %v3774_v17  ;;  %v4613_v58 = vpop.f32.mrb[61].mxu0 }
 0x77e   : > { %v3815_v39 = vpop.f32.mrb[62].mxu0 }
 0x77f   : > { %v3872_v40 = vpop.f32.mrb[60].mxu1  ;;  %v4614_v43 = vpop.f32.mrb[63].mxu0  ;;  %3883 = vrot.lane.b32.xlu0 %v3813_v28, %s5356_s23 }
 0x780   : > { %v3873_v35 = vadd.f32 %v3872_v40, %v3834_v62  ;;  %v4619_v5 = vpop.f32.mrb[61].mxu1 }
 0x781   : > { %v3875_v12 = vpop.f32.mrb[62].mxu1 }
 0x782   : > { %3887 = vrot.lane.b32.xlu1 %v3873_v35, %s5357_s13  ;;  %v4620_v29 = vpop.f32.mrb[63].mxu1 }
 0x7e9   : > { %v3880_v30 = vpop.permute.xlu1 %3879 }
 0x7ea   : > { %v3890_v49 = vsel %vm1055_vm3, %v3692_v19, %v3880_v30 }
 0x7f1   : > { %v3884_v16 = vpop.permute.xlu0 %3883 }
 0x7f2   : > { %v3891_v6 = vsel %vm3654_vm2, %v3890_v49, %v3884_v16 }
 0x7f4   : > { %v3888_v45 = vpop.permute.xlu1 %3887 }
 0x7f5   : > { %v3893_v44 = vsel %vm3892_vm0, %v3891_v6, %v3888_v45 }
 0x7f6   : > { %v3894_v50 = vpack.c.bf16 %v3893_v44, %v3893_v44 }
 0x7f8   : > { %3896 = vst.msk [vmem:[%s784_s4] sm:$0xf] %vm3895_vm4, %v3894_v50 }
 0x7f9   : > { %5235 = shalt.err (!%p5232_p12)
}
 0x7fa   : > { %s5236_s11 = scalar_lea.hbm %s6679_s25, 64  ;;  %s5240_s20 = scalar_lea.hbm %s6843_s22, 128 }
 0x7fb   : > { %p5237_p3 = scmp.ne.s32.totalorder %s6679_s25, %s5236_s11  ;;  %p5241_p13 = scmp.lt.u32.totalorder %s6679_s25, %s6843_s22 }
 0x7fc   : > { %p5242_p6 = scmp.lt.u32.totalorder %s5240_s20, %s5236_s11  ;;  %p5244_p5 = scmp.lt.u32.totalorder %s5236_s11, %s6679_s25 }
 0x7fd   : > { %p5238_p2 = pnand %p5237_p3, %p6844_p8 }
 0x7fe   : > { %p5243_p9 = por %p5242_p6, %p5241_p13 }
 0x7ff   : > { %p5239_p4 = pneg %p5238_p2 }
 0x800   : > { %p5245_p1 = por %p5244_p5, %p5243_p9 }
 0x802   : > { %p5246_p7 = pnand %p5245_p1, %p5239_p4 }
 0x804   : > { %5249 = shalt.err (!%p5246_p7)
}
 0x805   : > { %4693 = dma.vmem_to_hbm [thread:$0]  (%p6844_p8), %s6681_s5, 64, %s6679_s25, %s3898_s6  }
 0x806 PF: > { %s6845_s23 = sld [smem:[#allocation33_spill]]  ;;  %s6846_s13 = sld [smem:[#allocation40_spill]] }
 0x807   : > { %s6847_s18 = sld [smem:[#allocation36_spill]] }
 0x80c   : > { %s3924_s4 = sand.u32 1, %s6845_s23   ;;  %p6848_p0 = scmp.ne.s32.totalorder %s6846_s13, 0 }
 0x80d   : > { %p6849_p11 = scmp.ge.s32.totalorder %s6847_s18, 2  ;;  %s3925_s1 = scalar_lea.sflag [#allocation4], %s3924_s4 }
 0x80f   : > { %p4737_p10 = pnand %p6849_p11, %p6848_p0 }
 0x811   : > { %5307 = dma.done.wait (!%p4737_p10), %s3925_s1, 64  }
 0x812   : > { %5309 = vsyncadd (!%p4737_p10), %s3925_s1, 4294967232  ;;  %s41_s30 = sadd.s32 1, %s6847_s18   ;;  %s6850_s24 = sld [smem:[#allocation34_spill]] }
 0x813   : > { %p38_p12 = scmp.ge.s32.totalorder %s41_s30, 4   ;;  %s6851_s27 = sld [smem:[#allocation39_spill]] }
 0x814   : > { %s6852_s21 = sld [smem:[#allocation38_spill]]  ;;  %s6853_s25 = smov %s5316_s26 }
 0x815   : > { %s6855_s28 = smov %s5328_s29  ;;  %40 = sbr.rel (!%p38_p12) target bundleno = 27 (0x1b), region = 211 }
 0x818   : > { %s6854_s26 = smov %s6850_s24 }
 0x81a   : > { %s6856_s29 = smov %s6852_s21 }
 0x81c   :  { %3930 = vsyncpa [#allocation3], 1 }
 0x81d   :  { %3932 = vsyncpa [#allocation3 + $0x1], 1 }
 0x81e   :  { %3933 = vsyncpa [#allocation6], 1 }
 0x81f   :  { %3935 = vsyncpa [#allocation6 + $0x1], 1 }
 0x820   :  { %3936 = vsyncpa [#allocation9], 1 }
 0x821   :  { %3938 = vsyncpa [#allocation9 + $0x1], 1 }
 0x822   :  { %3939 = vsyncpa [#allocation12], 1 }
 0x823   :  { %3941 = vsyncpa [#allocation12 + $0x1], 1 }
 0x824   :  { %3942 = vsyncpa [#allocation15], 1 }
 0x825   :  { %3943 = vsyncpa [#allocation18], 1 }
 0x826   :  { %3944 = vsyncpa [#allocation21], 1 }
 0x827   :  { %3945 = vsyncpa [#allocation4], 1 }
 0x828   :  { %3947 = vsyncpa [#allocation4 + $0x1], 1 }

</bundles_post_ra>
